<compile_context>
chip_gen: v7x
topology: tpu7x:2x2x1
jax: 0.10.0
libtpu: 0.0.40
codegen_flags: <defaults>
</compile_context>

<pallas_src>
import numpy as np
import jax
import jax.numpy as jnp
from jax.experimental import pallas as pl
from jax.experimental.pallas import tpu as pltpu


def _round_up(x, m):
    return ((x + m - 1) // m) * m


def _default_num_tiles():
    # v7x has 2 TensorCores per chip -> split P into 2 parallel tiles.
    # v5e / v6e have a single TC -> a grid is just a sequential loop, so use 1.
    try:
        kind = jax.devices()[0].device_kind.lower()
    except Exception:
        return 1
    return 2 if "v7" in kind else 1


# ----------------------------------------------------------------------------
# Pallas kernel: gather-by-one-hot-matmul, output directly (H_out, TP)
#
# Per grid step i (tile of P):
#   idx_ref:   (1, TP)        int32  -- one lane-dense P-tile of the flat index
#   table_ref: (H_out, K_pad) f32    -- pre-transposed, zero-padded bias table
#   out_ref:   (H_out, TP)    f32    -- lane-dense output tile (heads = sublanes)
# ----------------------------------------------------------------------------
def _rpb_gather_kernel(idx_ref, table_ref, out_ref):
    k_pad = table_ref.shape[1]
    tp = idx_ref.shape[1]

    idx = idx_ref[...]                                              # (1, TP)
    k_iota = jax.lax.broadcasted_iota(jnp.int32, (k_pad, tp), 0)    # (K_pad, TP)
    one_hot_t = (k_iota == idx).astype(table_ref.dtype)             # (K_pad, TP)
    # (H_out, K_pad) @ (K_pad, TP) -> (H_out, TP): small stationary table,
    # lane-dense result, no transpose needed.
    out_ref[...] = jnp.dot(table_ref[...], one_hot_t,
                           preferred_element_type=jnp.float32)


def _gather_bias(table, rel_pos_index, num_heads, *, num_tiles=None):
    """table: (K, H) f32, rel_pos_index: (N, N) int32 -> (H, N, N) f32."""
    N = rel_pos_index.shape[0]
    P = N * N
    K = table.shape[0]
    if num_tiles is None:
        num_tiles = _default_num_tiles()

    K_pad = _round_up(K, 128)               # safe MXU contraction length
    H_out = _round_up(num_heads, 8)         # sublane-aligned output rows
    P_pad = _round_up(P, 128 * num_tiles)   # lane-aligned tiles, grid divides evenly
    tile_p = P_pad // num_tiles

    # Padded idx entries point at row 0 (valid, < K); their output columns are
    # sliced off.  Padded table rows/heads are zero, so the gather stays exact.
    idx_row = jnp.zeros((1, P_pad), jnp.int32)
    idx_row = idx_row.at[0, :P].set(rel_pos_index.reshape(-1).astype(jnp.int32))

    table_t = jnp.zeros((H_out, K_pad), jnp.float32)
    table_t = table_t.at[:num_heads, :K].set(jnp.asarray(table, jnp.float32).T)

    out_hp = pl.pallas_call(
        _rpb_gather_kernel,
        out_shape=jax.ShapeDtypeStruct((H_out, P_pad), jnp.float32),
        grid=(num_tiles,),
        in_specs=[
            pl.BlockSpec((1, tile_p), lambda i: (0, i)),        # lane-dense idx tile
            pl.BlockSpec((H_out, K_pad), lambda i: (0, 0)),     # full tiny table, reused
        ],
        out_specs=pl.BlockSpec((H_out, tile_p), lambda i: (0, i)),
        compiler_params=pltpu.CompilerParams(
            dimension_semantics=("parallel",),   # v7x: one tile per TensorCore
        ),
        cost_estimate=pl.CostEstimate(
            flops=2 * P_pad * K_pad * H_out,
            transcendentals=0,
            bytes_accessed=4 * (P_pad + K_pad * H_out + H_out * P_pad),
        ),
    )(idx_row, table_t)

    return out_hp[:num_heads, :P].reshape(num_heads, N, N)


# ----------------------------------------------------------------------------
# Glue: index-table construction (mirrors the PyTorch __init__ buffer logic)
# ----------------------------------------------------------------------------
def make_relative_position_index(window_size):
    Wh, Ww = window_size
    num_rel = (2 * Wh - 1) * (2 * Ww - 1) + 3
    coords = np.stack(
        np.meshgrid(np.arange(Wh), np.arange(Ww), indexing="ij")
    )                                                     # (2, Wh, Ww)
    coords_flatten = coords.reshape(2, -1)                # (2, Wh*Ww)
    relative_coords = coords_flatten[:, :, None] - coords_flatten[:, None, :]
    relative_coords = relative_coords.transpose(1, 2, 0).copy()  # (P0, P0, 2)
    relative_coords[:, :, 0] += Wh - 1
    relative_coords[:, :, 1] += Ww - 1
    relative_coords[:, :, 0] *= 2 * Ww - 1
    N = Wh * Ww + 1
    rpi = np.zeros((N, N), dtype=np.int32)
    rpi[1:, 1:] = relative_coords.sum(-1)
    rpi[0, 0:] = num_rel - 3
    rpi[0:, 0] = num_rel - 2
    rpi[0, 0] = num_rel - 1
    return jnp.asarray(rpi, jnp.int32)


# ----------------------------------------------------------------------------
# Module-equivalent wrapper
# ----------------------------------------------------------------------------
class RelativePositionBiasPallas:
    def __init__(self, window_size, num_heads, key):
        self.window_size = tuple(window_size)
        self.num_heads = num_heads
        self.num_relative_distance = (
            (2 * window_size[0] - 1) * (2 * window_size[1] - 1) + 3
        )
        # PyTorch init is zeros; use a deterministic random table so the
        # kernel output is non-trivial.
        self.relative_position_bias_table = (
            0.02
            * jax.random.normal(
                key, (self.num_relative_distance, num_heads), dtype=jnp.float32
            )
        )
        self.relative_position_index = make_relative_position_index(self.window_size)
        # Cache keyed by window size; invalidated if the table object changes
        # (so parameter updates do not return stale biases).
        self._bias_cache = {}

    def __call__(self, training_window_size):
        training_window_size = tuple(int(x) for x in training_window_size)
        cached = self._bias_cache.get(training_window_size)
        if cached is not None and cached[0] is self.relative_position_bias_table:
            return cached[1]

        if training_window_size == self.window_size:
            out = _gather_bias(
                self.relative_position_bias_table,
                self.relative_position_index,
                self.num_heads,
            )
        else:
            # Different window size: bicubic-resize the 2D part of the table
            # (plain-JAX glue), then run the same Pallas gather kernel.
            Wh, Ww = self.window_size
            tWh, tWw = training_window_size
            new_num_rel = (2 * tWh - 1) * (2 * tWw - 1) + 3
            old = (
                self.relative_position_bias_table[:-3, :]
                .T.reshape(self.num_heads, 2 * Wh - 1, 2 * Ww - 1)
            )
            # TODO(synk): jax.image.resize "cubic" uses the Keys kernel (a=-0.5);
            # PyTorch F.interpolate bicubic uses a=-0.75, so this branch is not
            # bit-exact with PyTorch (structure/shapes match).
            new = jax.image.resize(
                old, (self.num_heads, 2 * tWh - 1, 2 * tWw - 1), method="cubic"
            )
            new_table = jnp.concatenate(
                [
                    new.reshape(self.num_heads, new_num_rel - 3).T,
                    self.relative_position_bias_table[-3:, :],
                ],
                axis=0,
            )
            new_index = make_relative_position_index(training_window_size)
            out = _gather_bias(new_table, new_index, self.num_heads)

        self._bias_cache[training_window_size] = (
            self.relative_position_bias_table, out)
        return out


# ----------------------------------------------------------------------------
# Pure-JAX reference for the equal-window-size path
# ----------------------------------------------------------------------------
def reference_bias(table, rel_pos_index):
    N = rel_pos_index.shape[0]
    flat = table[rel_pos_index.reshape(-1)]               # (N*N, H)
    return flat.reshape(N, N, -1).transpose(2, 0, 1)      # (H, N, N)


if __name__ == "__main__":
    key = jax.random.PRNGKey(0)
    window_size = (8, 8)      # -> N = 65, num_relative_distance = 228
    num_heads = 8

    module = RelativePositionBiasPallas(window_size, num_heads, key)

    # Main path: training window == module window (pure gather in Pallas).
    out = module(window_size)
    out = jax.block_until_ready(out)
    N = window_size[0] * window_size[1] + 1
    assert out.shape == (num_heads, N, N)

    ref = reference_bias(module.relative_position_bias_table,
                         module.relative_position_index)
    np.testing.assert_allclose(np.asarray(out), np.asarray(ref),
                               rtol=1e-6, atol=1e-6)

    # Cached path (second call must reuse the same computed bias).
    out_cached = module(window_size)
    np.testing.assert_allclose(np.asarray(out_cached), np.asarray(out))

    # Resized path: different training window (resize glue + same kernel).
    out2 = module((6, 6))
    out2 = jax.block_until_ready(out2)
    assert out2.shape == (num_heads, 6 * 6 + 1, 6 * 6 + 1)

    print("KERNEL_OK")
</pallas_src>

<mosaic_0001>
module attributes {stable_mosaic.version = 11 : i64} {
  func.func @_rpb_gather_kernel(%arg0: i32, %arg1: memref<1x4352xi32, #tpu.memory_space<vmem>>, %arg2: memref<8x256xf32, #tpu.memory_space<vmem>>, %arg3: memref<8x4352xf32, #tpu.memory_space<vmem>>) attributes {dimension_semantics = [#tpu.dimension_semantics<parallel>], iteration_bounds = array<i64: 1>, scalar_prefetch = 0 : i64, scratch_operands = 0 : i64, tpu.core_type = #tpu.core_type<tc>, window_params = [{transform_indices = @transform_0, window_bounds = array<i64: 1, 4352>}, {pipeline_mode = #tpu.pipeline_mode<synchronous>, transform_indices = @transform_1, window_bounds = array<i64: 8, 256>}, {transform_indices = @transform_2, window_bounds = array<i64: 8, 4352>}]} {
    %c0 = arith.constant 0 : index
    %c0_0 = arith.constant 0 : index
    %0 = vector.load %arg1[%c0, %c0_0] : memref<1x4352xi32, #tpu.memory_space<vmem>>, vector<1x4352xi32>
    %1 = tpu.iota {dimensions = array<i32: 0>} : vector<256x4352xi32>
    %2 = vector.broadcast %0 : vector<1x4352xi32> to vector<256x4352xi32>
    %3 = arith.cmpi eq, %1, %2 : vector<256x4352xi32>
    %4 = arith.extui %3 : vector<256x4352xi1> to vector<256x4352xi32>
    %5 = arith.sitofp %4 : vector<256x4352xi32> to vector<256x4352xf32>
    %c0_1 = arith.constant 0 : index
    %c0_2 = arith.constant 0 : index
    %6 = vector.load %arg2[%c0_1, %c0_2] : memref<8x256xf32, #tpu.memory_space<vmem>>, vector<8x256xf32>
    %cst = arith.constant dense<0.000000e+00> : vector<8x4352xf32>
    %7 = tpu.matmul %6, %5, %cst {dimension_numbers = #tpu.dot_dimension_numbers<[1], [0], [0], [1], [0, 0, 1, 1], [], []>} : vector<8x256xf32>, vector<256x4352xf32>, vector<8x4352xf32> -> vector<8x4352xf32>
    %c0_3 = arith.constant 0 : index
    %c0_4 = arith.constant 0 : index
    %8 = vector.load %arg3[%c0_3, %c0_4] : memref<8x4352xf32, #tpu.memory_space<vmem>>, vector<8x4352xf32>
    tpu.vector_store %arg3[%c0_3, %c0_4], %7 {strides = array<i32>} : memref<8x4352xf32, #tpu.memory_space<vmem>>, vector<8x4352xf32>,
    return
  }
  func.func @transform_0(%arg0: i32) -> (i32, i32) {
    %c0_i32 = arith.constant 0 : i32
    %c0_i32_0 = arith.constant 0 : i32
    return %c0_i32, %arg0 : i32, i32
  }
  func.func @transform_1(%arg0: i32) -> (i32, i32) {
    %c0_i32 = arith.constant 0 : i32
    %c0_i32_0 = arith.constant 0 : i32
    %c0_i32_1 = arith.constant 0 : i32
    return %c0_i32, %c0_i32_0 : i32, i32
  }
  func.func @transform_2(%arg0: i32) -> (i32, i32) {
    %c0_i32 = arith.constant 0 : i32
    %c0_i32_0 = arith.constant 0 : i32
    return %c0_i32, %arg0 : i32, i32
  }
}

</mosaic_0001>

<bundles_post_ra>
// kernel: tpu_custom_call.1
= control target key start
LH: loop header
LB: loop body
LE: loop exit
PB: predicated region body
PF: predicated region fallthrough
CT: control target
= control target key end

     0   :  { %7 = vsyncpa [#allocation3], 0  ;;  %s12209_s0 = inlined_call_operand.hbm [shape: s32[1,4352], index: 0, kind: input, shape index: {}]   ;;  %s12210_s1 = inlined_call_operand.hbm [shape: f32[8,256], index: 1, kind: input, shape index: {}]   ;;  %s12211_s2 = inlined_call_operand.hbm [shape: f32[8,4352], index: 2, kind: output, shape index: {}]  }
   0x1   :  { %8 = vsyncpa [#allocation6], 0 }
   0x2   :  { %9 = vsyncpa [#allocation4], 0  ;;  %s8080_s9 = smov [#allocation2]   ;;  %s8081_s11 = smov [#allocation5]  }
   0x3   :  { %s16_s10 = sshll.u32 %s8080_s9, 4  ;;  %s26_s12 = sshll.u32 %s8081_s11, 4  ;;  %s17_s10 = int_to_ptr.vmem [resolvable:$true] %s16_s10  ;;  %s27_s12 = int_to_ptr.vmem [resolvable:$true] %s26_s12 }
   0x4   :  { %s8008_s15 = scalar_lea.hbm %s12209_s0, 544 }
   0x5   :  { %p8009_p0 = scmp.ne.s32.totalorder %s12209_s0, %s8008_s15  ;;  %p8012_p1 = scmp.lt.u32.totalorder %s8008_s15, %s12209_s0 }
   0x7   :  { %p8014_p2 = pnand %p8012_p1, %p8009_p0 }
   0x9   :  { %8017 = shalt.err (!%p8014_p2)
}
   0xa   :  { %s8018_s20 = scalar_lea.vmem %s17_s10, 544  ;;  %p8023_p4 = scmp.lt.s32.totalorder %s17_s10, %s17_s10 }
   0xb   :  { %p8019_p3 = scmp.ne.s32.totalorder %s17_s10, %s8018_s20  ;;  %p8024_p5 = scmp.lt.s32.totalorder %s8018_s20, %s8018_s20 }
   0xd   :  { %p8025_p6 = por %p8024_p5, %p8023_p4 }
   0xf   :  { %p8026_p7 = pnand %p8025_p6, %p8019_p3 }
  0x11   :  { %8029 = shalt.err (!%p8026_p7)
}
  0x12   :  { %19 = dma.hbm_to_vmem [thread:$0]  %s12209_s0, 544, %s17_s10, [#allocation3]  }
  0x13   :  { %s8030_s25 = scalar_lea.hbm %s12210_s1, 256 }
  0x14   :  { %p8031_p8 = scmp.ne.s32.totalorder %s12210_s1, %s8030_s25  ;;  %p8034_p9 = scmp.lt.u32.totalorder %s8030_s25, %s12210_s1 }
  0x16   :  { %p8036_p10 = pnand %p8034_p9, %p8031_p8 }
  0x18   :  { %8039 = shalt.err (!%p8036_p10)
}
  0x19   :  { %s8040_s30 = scalar_lea.vmem %s27_s12, 256  ;;  %p8045_p12 = scmp.lt.s32.totalorder %s27_s12, %s27_s12 }
  0x1a   :  { %p8041_p11 = scmp.ne.s32.totalorder %s27_s12, %s8040_s30  ;;  %p8046_p13 = scmp.lt.s32.totalorder %s8040_s30, %s8040_s30 }
  0x1c   :  { %p8047_p0 = por %p8046_p13, %p8045_p12 }
  0x1e   :  { %p8048_p1 = pnand %p8047_p0, %p8041_p11 }
  0x20   :  { %8051 = shalt.err (!%p8048_p1)
}
  0x21   :  { %29 = dma.hbm_to_vmem [thread:$0]  %s12210_s1, 256, %s27_s12, [#allocation6]  }
  0x22   :  { %8074 = dma.done.wait [#allocation3], 544  }
  0x23   :  { %8075 = vsyncadd [#allocation3], 4294966752 }
  0x24   :  { %8076 = dma.done.wait [#allocation6], 256  }
  0x25   :  { %8077 = vsyncadd [#allocation6], 4294967040  ;;  %v41_v0 = vlaneseq  ;;  %v8134_v5 = vld [vmem:[#allocation2] sm:$0xff]  ;;  %v8142_v8 = vld [vmem:[#allocation5 + $0x8] sm:$0xff]  ;;  %v8082_v13 = vmov 1.0|1.0  }
  0x26   :  { %3540 = vmatprep.mubr.f32.mxu0 %v8142_v8  ;;  %3611 = vmatprep.mubr.f32.mxu1 %v8142_v8  ;;  %v8642_v63 = vld [vmem:[#allocation5] sm:$0xff]  ;;  %v9171_v42 = vld [vmem:[#allocation5 + $0x8] sm:$0xff]  ;;  %v10856_v46 = vld [vmem:[#allocation2 + $0x18] sm:$0xff]  ;;  %s8083_s1 = smov [#allocation7]  }
  0x27   :  { %v8123_v1 = vshrl.u32 %v41_v0, 7  ;;  %v9016_v59 = vld [vmem:[#allocation2 + $0x8] sm:$0xff]  ;;  %s4723_s4 = sshll.u32 %s8083_s1, 4  ;;  %s4724_s4 = int_to_ptr.vmem [resolvable:$true] %s4723_s4 }
  0x28   :  { %v10067_v38 = vld [vmem:[#allocation5 + $0x8] sm:$0xff]  ;;  %s8052_s5 = scalar_lea.vmem %s4724_s4, 4352  ;;  %p8057_p3 = scmp.lt.s32.totalorder %s4724_s4, %s4724_s4 }
  0x29   :  { %v8126_v2 = vsub.s32 1, %v8123_v1  ;;  %v8129_v3 = vsub.s32 0, %v8123_v1  ;;  %v8132_v4 = vadd.s32 8, %v8123_v1  ;;  %v8137_v6 = vadd.s32 16, %v8123_v1  ;;  %p8053_p2 = scmp.ne.s32.totalorder %s4724_s4, %s8052_s5  ;;  %p8058_p4 = scmp.lt.s32.totalorder %s8052_s5, %s8052_s5 }
  0x2a   :  { %v8140_v7 = vadd.s32 24, %v8123_v1  ;;  %v8153_v11 = vadd.s32 32, %v8123_v1  ;;  %v8156_v12 = vadd.s32 40, %v8123_v1  ;;  %v8182_v14 = vadd.s32 48, %v8123_v1 }
  0x2b   :  { %v8146_v9 = vrot.slane %v8134_v5, %v8126_v2  ;;  %v8150_v10 = vrot.slane %v8134_v5, %v8129_v3  ;;  %v8185_v15 = vadd.s32 56, %v8123_v1  ;;  %v8198_v16 = vadd.s32 64, %v8123_v1  ;;  %p8059_p5 = por %p8058_p4, %p8057_p3 }
  0x2c   :  { %v8201_v17 = vadd.s32 72, %v8123_v1  ;;  %v8214_v18 = vadd.s32 80, %v8123_v1  ;;  %v8217_v19 = vadd.s32 88, %v8123_v1  ;;  %v8230_v20 = vadd.s32 96, %v8123_v1 }
  0x2d   :  { %vm211_vm0 = vcmp.eq.s32.totalorder %v8123_v1, %v8146_v9  ;;  %vm245_vm1 = vcmp.eq.s32.totalorder %v8132_v4, %v8146_v9  ;;  %vm210_vm2 = vcmp.eq.s32.totalorder %v8123_v1, %v8150_v10  ;;  %vm244_vm3 = vcmp.eq.s32.totalorder %v8132_v4, %v8150_v10  ;;  %p8060_p6 = pnand %p8059_p5, %p8053_p2 }
  0x2e   :  { %vm6909_vm4 = vmpackc.low %vm245_vm1, %vm211_vm0  ;;  %vm279_vm5 = vcmp.eq.s32.totalorder %v8137_v6, %v8146_v9  ;;  %vm313_vm6 = vcmp.eq.s32.totalorder %v8140_v7, %v8146_v9  ;;  %vm278_vm7 = vcmp.eq.s32.totalorder %v8137_v6, %v8150_v10  ;;  %vm312_vm8 = vcmp.eq.s32.totalorder %v8140_v7, %v8150_v10 }
  0x2f   :  { %6910 = vmatprep.subr.msk.bf16.mxu0 %vm6909_vm4, %v8082_v13  ;;  %vm6911_vm9 = vmpackc.low %vm244_vm3, %vm210_vm2  ;;  %vm347_vm10 = vcmp.eq.s32.totalorder %v8153_v11, %v8146_v9  ;;  %vm381_vm11 = vcmp.eq.s32.totalorder %v8156_v12, %v8146_v9  ;;  %vm346_vm15 = vcmp.eq.s32.totalorder %v8153_v11, %v8150_v10  ;;  %vm380_vm0 = vcmp.eq.s32.totalorder %v8156_v12, %v8150_v10 }
  0x30   :  { %6912 = vmatpush1.bf16.msk.msra.mxu0 %vm6911_vm9, %v8082_v13  ;;  %vm6913_vm12 = vmpackc.low %vm313_vm6, %vm279_vm5  ;;  %vm415_vm1 = vcmp.eq.s32.totalorder %v8182_v14, %v8146_v9  ;;  %vm449_vm2 = vcmp.eq.s32.totalorder %v8185_v15, %v8146_v9  ;;  %vm414_vm5 = vcmp.eq.s32.totalorder %v8182_v14, %v8150_v10  ;;  %vm448_vm6 = vcmp.eq.s32.totalorder %v8185_v15, %v8150_v10 }
  0x31   :  { %6914 = vmatprep.subr.msk.bf16.mxu0 %vm6913_vm12, %v8082_v13  ;;  %vm6915_vm13 = vmpackc.low %vm312_vm8, %vm278_vm7  ;;  %vm483_vm7 = vcmp.eq.s32.totalorder %v8198_v16, %v8146_v9  ;;  %vm517_vm8 = vcmp.eq.s32.totalorder %v8201_v17, %v8146_v9  ;;  %vm516_vm12 = vcmp.eq.s32.totalorder %v8201_v17, %v8150_v10  ;;  %v8233_v21 = vadd.s32 104, %v8123_v1 }
  0x32   :  { %vm6917_vm14 = vmpackc.low %vm381_vm11, %vm347_vm10  ;;  %vm482_vm11 = vcmp.eq.s32.totalorder %v8198_v16, %v8150_v10  ;;  %v8246_v22 = vadd.s32 112, %v8123_v1  ;;  %v8249_v23 = vadd.s32 120, %v8123_v1  ;;  %v8258_v24 = vadd.s32 128, %v8123_v1 }
  0x33   :  { %vm6919_vm3 = vmpackc.low %vm380_vm0, %vm346_vm15  ;;  %v8265_v25 = vadd.s32 136, %v8123_v1  ;;  %v8268_v26 = vsub.s32 3, %v8123_v1  ;;  %v8272_v27 = vsub.s32 2, %v8123_v1  ;;  %v8280_v28 = vadd.s32 144, %v8123_v1 }
  0x34   :  { %6916 = vmatpush1.bf16.msk.msra.mxu0 %vm6915_vm13, %v8082_v13  ;;  %vm6921_vm4 = vmpackc.low %vm449_vm2, %vm415_vm1  ;;  %vm551_vm13 = vcmp.eq.s32.totalorder %v8214_v18, %v8146_v9  ;;  %vm550_vm1 = vcmp.eq.s32.totalorder %v8214_v18, %v8150_v10  ;;  %vm584_vm2 = vcmp.eq.s32.totalorder %v8217_v19, %v8150_v10  ;;  %v8283_v29 = vadd.s32 152, %v8123_v1 }
  0x35   :  { %6918 = vmatprep.subr.msk.bf16.mxu0 %vm6917_vm14, %v8082_v13  ;;  %vm6923_vm9 = vmpackc.low %vm448_vm6, %vm414_vm5  ;;  %vm585_vm14 = vcmp.eq.s32.totalorder %v8217_v19, %v8146_v9  ;;  %v8291_v30 = vrot.slane %v8134_v5, %v8268_v26  ;;  %v8296_v31 = vrot.slane %v8134_v5, %v8272_v27  ;;  %v8308_v32 = vadd.s32 160, %v8123_v1 }
  0x36   :  { %vm6925_vm10 = vmpackc.low %vm517_vm8, %vm483_vm7  ;;  %vm618_vm7 = vcmp.eq.s32.totalorder %v8230_v20, %v8150_v10  ;;  %vm652_vm8 = vcmp.eq.s32.totalorder %v8233_v21, %v8150_v10  ;;  %v8311_v33 = vadd.s32 168, %v8123_v1  ;;  %v8340_v36 = vadd.s32 176, %v8123_v1 }
  0x37   :  { %vm6927_vm15 = vmpackc.low %vm516_vm12, %vm482_vm11  ;;  %v8343_v37 = vadd.s32 184, %v8123_v1  ;;  %v8381_v40 = vadd.s32 192, %v8123_v1  ;;  %v8384_v41 = vadd.s32 200, %v8123_v1  ;;  %v8425_v44 = vadd.s32 208, %v8123_v1 }
  0x38   :  { %6920 = vmatpush1.bf16.msk.msra.mxu0 %vm6919_vm3, %v8082_v13  ;;  %vm6929_vm0 = vmpackc.low %vm585_vm14, %vm551_vm13  ;;  %vm619_vm3 = vcmp.eq.s32.totalorder %v8230_v20, %v8146_v9  ;;  %vm686_vm13 = vcmp.eq.s32.totalorder %v8246_v22, %v8150_v10  ;;  %vm720_vm14 = vcmp.eq.s32.totalorder %v8249_v23, %v8150_v10  ;;  %v8428_v45 = vadd.s32 216, %v8123_v1 }
  0x39   :  { %6922 = vmatprep.subr.msk.bf16.mxu0 %vm6921_vm4, %v8082_v13  ;;  %vm653_vm4 = vcmp.eq.s32.totalorder %v8233_v21, %v8146_v9  ;;  %vm6931_vm5 = vmpackc.low %vm584_vm2, %vm550_vm1  ;;  %vm754_vm2 = vcmp.eq.s32.totalorder %v8258_v24, %v8150_v10  ;;  %v8469_v48 = vadd.s32 224, %v8123_v1  ;;  %v8472_v49 = vadd.s32 232, %v8123_v1 }
  0x3a   :  { %vm6933_vm6 = vmpackc.low %vm653_vm4, %vm619_vm3  ;;  %vm788_vm3 = vcmp.eq.s32.totalorder %v8265_v25, %v8150_v10  ;;  %v8509_v52 = vadd.s32 240, %v8123_v1  ;;  %v8516_v53 = vadd.s32 248, %v8123_v1  ;;  %v8519_v54 = vsub.s32 5, %v8123_v1 }
  0x3b   :  { %vm6935_vm11 = vmpackc.low %vm652_vm8, %vm618_vm7  ;;  %vm213_vm7 = vcmp.eq.s32.totalorder %v8123_v1, %v8291_v30  ;;  %vm247_vm8 = vcmp.eq.s32.totalorder %v8132_v4, %v8291_v30  ;;  %v8559_v57 = vsub.s32 4, %v8123_v1  ;;  %v8800_v39 = vsub.s32 7, %v8123_v1 }
  0x3c   :  { %6924 = vmatpush1.bf16.msk.msra.mxu0 %vm6923_vm9, %v8082_v13  ;;  %vm687_vm9 = vcmp.eq.s32.totalorder %v8246_v22, %v8146_v9  ;;  %vm6939_vm1 = vmpackc.low %vm720_vm14, %vm686_vm13  ;;  %vm822_vm13 = vcmp.eq.s32.totalorder %v8280_v28, %v8150_v10  ;;  %vm856_vm14 = vcmp.eq.s32.totalorder %v8283_v29, %v8150_v10  ;;  %v8567_v58 = vrot.slane %v8134_v5, %v8519_v54 }
  0x3d   :  { %6926 = vmatprep.subr.msk.bf16.mxu0 %vm6925_vm10, %v8082_v13  ;;  %vm721_vm10 = vcmp.eq.s32.totalorder %v8249_v23, %v8146_v9  ;;  %v8602_v61 = vrot.slane %v8134_v5, %v8559_v57  ;;  %v8815_v43 = vsub.s32 6, %v8123_v1  ;;  %v8845_v47 = vrot.slane %v8134_v5, %v8800_v39 }
  0x3e   :  { %vm6937_vm12 = vmpackc.low %vm721_vm10, %vm687_vm9  ;;  %vm212_vm10 = vcmp.eq.s32.totalorder %v8123_v1, %v8296_v31  ;;  %v9052_v0 = vrot.slane %v9016_v59, %v8126_v2  ;;  %v9493_v60 = vrot.slane %v9016_v59, %v8519_v54  ;;  %v9741_v50 = vrot.slane %v9016_v59, %v8800_v39 }
  0x3f   :  { %vm8318_vm9 = vmpackc.low %vm788_vm3, %vm754_vm2  ;;  %vm281_vm3 = vcmp.eq.s32.totalorder %v8137_v6, %v8291_v30  ;;  %v8861_v51 = vrot.slane %v8134_v5, %v8815_v43  ;;  %v9300_v5 = vrot.slane %v9016_v59, %v8268_v26  ;;  %v11363_v55 = vrot.slane %v10856_v46, %v8519_v54 }
  0x40   :  { %6928 = vmatpush1.bf16.msk.msra.mxu0 %vm6927_vm15, %v8082_v13  ;;  %vm755_vm15 = vcmp.eq.s32.totalorder %v8258_v24, %v8146_v9  ;;  %v11404_v56 = vrot.slane %v10856_v46, %v8559_v57 }
  0x41   :  { %6930 = vmatprep.subr.msk.bf16.mxu0 %vm6929_vm0, %v8082_v13  ;;  %vm789_vm0 = vcmp.eq.s32.totalorder %v8265_v25, %v8146_v9 }
  0x42   :  { %vm6941_vm4 = vmpackc.low %vm789_vm0, %vm755_vm15  ;;  %vm891_vm15 = vcmp.eq.s32.totalorder %v8308_v32, %v8146_v9  ;;  %vm925_vm0 = vcmp.eq.s32.totalorder %v8311_v33, %v8146_v9 }
  0x44   :  { %6932 = vmatpush1.bf16.msk.msra.mxu0 %vm6931_vm5, %v8082_v13  ;;  %vm823_vm5 = vcmp.eq.s32.totalorder %v8280_v28, %v8146_v9 }
  0x45   :  { %6934 = vmatprep.subr.msk.bf16.mxu0 %vm6933_vm6, %v8082_v13  ;;  %vm857_vm6 = vcmp.eq.s32.totalorder %v8283_v29, %v8146_v9 }
  0x48   :  { %6936 = vmatpush1.bf16.msk.msra.mxu0 %vm6935_vm11, %v8082_v13  ;;  %vm246_vm11 = vcmp.eq.s32.totalorder %v8132_v4, %v8296_v31 }
  0x49   :  { %6938 = vmatprep.subr.msk.bf16.mxu0 %vm6937_vm12, %v8082_v13  ;;  %vm8327_vm12 = vmpackc.low %vm857_vm6, %vm823_vm5  ;;  %vm280_vm6 = vcmp.eq.s32.totalorder %v8137_v6, %v8296_v31 }
  0x4a   :  { %vm6975_vm2 = vmpackc.low %vm246_vm11, %vm212_vm10  ;;  %vm924_vm10 = vcmp.eq.s32.totalorder %v8311_v33, %v8150_v10  ;;  %vm959_vm11 = vcmp.eq.s32.totalorder %v8340_v36, %v8146_v9 }
  0x4b   :  { %vm8353_vm5 = vmpackc.low %vm856_vm14, %vm822_vm13  ;;  %vm993_vm13 = vcmp.eq.s32.totalorder %v8343_v37, %v8146_v9 }
  0x4c   :  { %6940 = vmatpush1.bf16.msk.msra.mxu0 %vm6939_vm1, %v8082_v13  ;;  %vm6973_vm1 = vmpackc.low %vm247_vm8, %vm213_vm7  ;;  %vm314_vm7 = vcmp.eq.s32.totalorder %v8140_v7, %v8296_v31 }
  0x4d   :  { %6942 = vmatprep.subr.msk.bf16.mxu0 %vm6941_vm4, %v8082_v13  ;;  %6974 = vmatprep.subr.msk.bf16.mxu1 %vm6973_vm1, %v8082_v13  ;;  %vm315_vm4 = vcmp.eq.s32.totalorder %v8140_v7, %v8291_v30  ;;  %vm8368_vm8 = vmpackc.low %vm925_vm0, %vm891_vm15  ;;  %vm349_vm15 = vcmp.eq.s32.totalorder %v8153_v11, %v8291_v30  ;;  %vm383_vm0 = vcmp.eq.s32.totalorder %v8156_v12, %v8291_v30 }
  0x4e   :  { %6976 = vmatpush1.bf16.msk.msra.mxu1 %vm6975_vm2, %v8082_v13  ;;  %vm6979_vm14 = vmpackc.low %vm314_vm7, %vm280_vm6  ;;  %vm348_vm2 = vcmp.eq.s32.totalorder %v8153_v11, %v8296_v31  ;;  %vm992_vm6 = vcmp.eq.s32.totalorder %v8343_v37, %v8150_v10  ;;  %vm1027_vm7 = vcmp.eq.s32.totalorder %v8381_v40, %v8146_v9 }
  0x50   :  { %6944 = vmatpush1.bf16.msk.msra.mxu0 %vm8318_vm9, %v8082_v13  ;;  %vm890_vm9 = vcmp.eq.s32.totalorder %v8308_v32, %v8150_v10 }
  0x51   :  { %6946 = vmatprep.subr.msk.bf16.mxu0 %vm8327_vm12, %v8082_v13  ;;  %vm6977_vm12 = vmpackc.low %vm315_vm4, %vm281_vm3  ;;  %vm382_vm3 = vcmp.eq.s32.totalorder %v8156_v12, %v8296_v31 }
  0x52   :  { %6978 = vmatprep.subr.msk.bf16.mxu1 %vm6977_vm12, %v8082_v13  ;;  %vm8397_vm1 = vmpackc.low %vm924_vm10, %vm890_vm9  ;;  %vm1061_vm9 = vcmp.eq.s32.totalorder %v8384_v41, %v8146_v9 }
  0x53   :  { %6980 = vmatpush1.bf16.msk.msra.mxu1 %vm6979_vm14, %v8082_v13  ;;  %vm8412_vm4 = vmpackc.low %vm993_vm13, %vm959_vm11  ;;  %vm417_vm11 = vcmp.eq.s32.totalorder %v8182_v14, %v8291_v30  ;;  %vm451_vm13 = vcmp.eq.s32.totalorder %v8185_v15, %v8291_v30  ;;  %vm416_vm14 = vcmp.eq.s32.totalorder %v8182_v14, %v8296_v31 }
  0x54   :  { %6948 = vmatpush1.bf16.msk.msra.mxu0 %vm8353_vm5, %v8082_v13  ;;  %vm958_vm5 = vcmp.eq.s32.totalorder %v8340_v36, %v8150_v10  ;;  %vm6983_vm10 = vmpackc.low %vm382_vm3, %vm348_vm2  ;;  %vm1060_vm2 = vcmp.eq.s32.totalorder %v8384_v41, %v8150_v10  ;;  %vm1095_vm3 = vcmp.eq.s32.totalorder %v8425_v44, %v8146_v9 }
  0x55   :  { %6950 = vmatprep.subr.msk.bf16.mxu0 %vm8368_vm8, %v8082_v13  ;;  %vm6981_vm8 = vmpackc.low %vm383_vm0, %vm349_vm15  ;;  %vm450_vm15 = vcmp.eq.s32.totalorder %v8185_v15, %v8296_v31 }
  0x56   :  { %6982 = vmatprep.subr.msk.bf16.mxu1 %vm6981_vm8, %v8082_v13  ;;  %vm8441_vm12 = vmpackc.low %vm992_vm6, %vm958_vm5  ;;  %vm1129_vm5 = vcmp.eq.s32.totalorder %v8428_v45, %v8146_v9 }
  0x57   :  { %6984 = vmatpush1.bf16.msk.msra.mxu1 %vm6983_vm10, %v8082_v13  ;;  %vm8456_vm0 = vmpackc.low %vm1061_vm9, %vm1027_vm7  ;;  %vm485_vm7 = vcmp.eq.s32.totalorder %v8198_v16, %v8291_v30  ;;  %vm519_vm9 = vcmp.eq.s32.totalorder %v8201_v17, %v8291_v30  ;;  %vm484_vm10 = vcmp.eq.s32.totalorder %v8198_v16, %v8296_v31 }
  0x58   :  { %6952 = vmatpush1.bf16.msk.msra.mxu0 %vm8397_vm1, %v8082_v13  ;;  %vm1026_vm1 = vcmp.eq.s32.totalorder %v8381_v40, %v8150_v10  ;;  %vm6987_vm6 = vmpackc.low %vm450_vm15, %vm416_vm14  ;;  %vm1128_vm14 = vcmp.eq.s32.totalorder %v8428_v45, %v8150_v10  ;;  %vm1163_vm15 = vcmp.eq.s32.totalorder %v8469_v48, %v8146_v9 }
  0x59   :  { %6954 = vmatprep.subr.msk.bf16.mxu0 %vm8412_vm4, %v8082_v13  ;;  %vm6985_vm4 = vmpackc.low %vm451_vm13, %vm417_vm11  ;;  %vm518_vm11 = vcmp.eq.s32.totalorder %v8201_v17, %v8296_v31 }
  0x5a   :  { %6986 = vmatprep.subr.msk.bf16.mxu1 %vm6985_vm4, %v8082_v13  ;;  %vm8485_vm8 = vmpackc.low %vm1060_vm2, %vm1026_vm1 }
  0x5b   :  { %6988 = vmatpush1.bf16.msk.msra.mxu1 %vm6987_vm6, %v8082_v13  ;;  %vm8500_vm13 = vmpackc.low %vm1129_vm5, %vm1095_vm3  ;;  %vm553_vm3 = vcmp.eq.s32.totalorder %v8214_v18, %v8291_v30  ;;  %vm587_vm5 = vcmp.eq.s32.totalorder %v8217_v19, %v8291_v30  ;;  %vm552_vm6 = vcmp.eq.s32.totalorder %v8214_v18, %v8296_v31 }
  0x5c   :  { %6956 = vmatpush1.bf16.msk.msra.mxu0 %vm8441_vm12, %v8082_v13  ;;  %vm1094_vm12 = vcmp.eq.s32.totalorder %v8425_v44, %v8150_v10  ;;  %vm6989_vm1 = vmpackc.low %vm519_vm9, %vm485_vm7  ;;  %vm586_vm7 = vcmp.eq.s32.totalorder %v8217_v19, %v8296_v31 }
  0x5d   :  { %6958 = vmatprep.subr.msk.bf16.mxu0 %vm8456_vm0, %v8082_v13  ;;  %vm1197_vm0 = vcmp.eq.s32.totalorder %v8472_v49, %v8146_v9  ;;  %6990 = vmatprep.subr.msk.bf16.mxu1 %vm6989_vm1, %v8082_v13  ;;  %vm6991_vm2 = vmpackc.low %vm518_vm11, %vm484_vm10  ;;  %vm1196_vm10 = vcmp.eq.s32.totalorder %v8472_v49, %v8150_v10  ;;  %vm1231_vm11 = vcmp.eq.s32.totalorder %v8509_v52, %v8146_v9 }
  0x5e   :  { %vm8535_vm4 = vmpackc.low %vm1128_vm14, %vm1094_vm12 }
  0x5f   :  { %6992 = vmatpush1.bf16.msk.msra.mxu1 %vm6991_vm2, %v8082_v13  ;;  %vm8550_vm9 = vmpackc.low %vm1197_vm0, %vm1163_vm15  ;;  %vm621_vm15 = vcmp.eq.s32.totalorder %v8230_v20, %v8291_v30  ;;  %vm655_vm0 = vcmp.eq.s32.totalorder %v8233_v21, %v8291_v30  ;;  %vm620_vm2 = vcmp.eq.s32.totalorder %v8230_v20, %v8296_v31 }
  0x60   :  { %6960 = vmatpush1.bf16.msk.msra.mxu0 %vm8485_vm8, %v8082_v13  ;;  %vm1162_vm8 = vcmp.eq.s32.totalorder %v8469_v48, %v8150_v10  ;;  %vm6993_vm12 = vmpackc.low %vm587_vm5, %vm553_vm3  ;;  %vm654_vm3 = vcmp.eq.s32.totalorder %v8233_v21, %v8296_v31 }
  0x61   :  { %6962 = vmatprep.subr.msk.bf16.mxu0 %vm8500_vm13, %v8082_v13  ;;  %vm1265_vm13 = vcmp.eq.s32.totalorder %v8516_v53, %v8146_v9  ;;  %6994 = vmatprep.subr.msk.bf16.mxu1 %vm6993_vm12, %v8082_v13  ;;  %vm6995_vm14 = vmpackc.low %vm586_vm7, %vm552_vm6  ;;  %vm1264_vm6 = vcmp.eq.s32.totalorder %v8516_v53, %v8150_v10  ;;  %vm215_vm7 = vcmp.eq.s32.totalorder %v8123_v1, %v8567_v58 }
  0x62   :  { %vm8580_vm1 = vmpackc.low %vm1196_vm10, %vm1162_vm8 }
  0x63   :  { %6996 = vmatpush1.bf16.msk.msra.mxu1 %vm6995_vm14, %v8082_v13  ;;  %vm8592_vm5 = vmpackc.low %vm1265_vm13, %vm1231_vm11  ;;  %vm689_vm11 = vcmp.eq.s32.totalorder %v8246_v22, %v8291_v30  ;;  %vm723_vm13 = vcmp.eq.s32.totalorder %v8249_v23, %v8291_v30  ;;  %vm688_vm14 = vcmp.eq.s32.totalorder %v8246_v22, %v8296_v31 }
  0x64   :  { %6964 = vmatpush1.bf16.msk.msra.mxu0 %vm8535_vm4, %v8082_v13  ;;  %vm1230_vm4 = vcmp.eq.s32.totalorder %v8509_v52, %v8150_v10  ;;  %vm6997_vm8 = vmpackc.low %vm655_vm0, %vm621_vm15  ;;  %vm722_vm15 = vcmp.eq.s32.totalorder %v8249_v23, %v8296_v31  ;;  %v9084_v10 = vrot.slane %v9016_v59, %v8129_v3 }
  0x65   :  { %6966 = vmatprep.subr.msk.bf16.mxu0 %vm8550_vm9, %v8082_v13  ;;  %vm249_vm9 = vcmp.eq.s32.totalorder %v8132_v4, %v8567_v58  ;;  %6998 = vmatprep.subr.msk.bf16.mxu1 %vm6997_vm8, %v8082_v13  ;;  %vm6999_vm10 = vmpackc.low %vm654_vm3, %vm620_vm2  ;;  %vm248_vm2 = vcmp.eq.s32.totalorder %v8132_v4, %v8602_v61  ;;  %vm283_vm3 = vcmp.eq.s32.totalorder %v8137_v6, %v8567_v58 }
  0x66   :  { %vm6971_vm12 = vmpackc.low %vm1264_vm6, %vm1230_vm4  ;;  %vm317_vm4 = vcmp.eq.s32.totalorder %v8140_v7, %v8567_v58 }
  0x67   :  { %7000 = vmatpush1.bf16.msk.msra.mxu1 %vm6999_vm10, %v8082_v13  ;;  %vm8624_vm0 = vmpackc.low %vm249_vm9, %vm215_vm7  ;;  %vm757_vm7 = vcmp.eq.s32.totalorder %v8258_v24, %v8291_v30  ;;  %vm791_vm9 = vcmp.eq.s32.totalorder %v8265_v25, %v8291_v30  ;;  %vm756_vm10 = vcmp.eq.s32.totalorder %v8258_v24, %v8296_v31 }
  0x68   :  { %6968 = vmatpush1.bf16.msk.msra.mxu0 %vm8580_vm1, %v8082_v13  ;;  %vm214_vm1 = vcmp.eq.s32.totalorder %v8123_v1, %v8602_v61  ;;  %vm7001_vm6 = vmpackc.low %vm723_vm13, %vm689_vm11  ;;  %vm790_vm11 = vcmp.eq.s32.totalorder %v8265_v25, %v8296_v31 }
  0x69   :  { %6970 = vmatprep.subr.msk.bf16.mxu0 %vm8592_vm5, %v8082_v13  ;;  %7002 = vmatprep.subr.msk.bf16.mxu1 %vm7001_vm6, %v8082_v13  ;;  %vm7003_vm5 = vmpackc.low %vm722_vm15, %vm688_vm14  ;;  %vm316_vm14 = vcmp.eq.s32.totalorder %v8140_v7, %v8602_v61  ;;  %vm351_vm15 = vcmp.eq.s32.totalorder %v8153_v11, %v8567_v58 }
  0x6a   :  { %vm8644_vm8 = vmpackc.low %vm248_vm2, %vm214_vm1  ;;  %vm385_vm1 = vcmp.eq.s32.totalorder %v8156_v12, %v8567_v58 }
  0x6b   :  { %7004 = vmatpush1.bf16.msk.msra.mxu1 %vm7003_vm5, %v8082_v13  ;;  %vm8656_vm13 = vmpackc.low %vm317_vm4, %vm283_vm3  ;;  %vm825_vm3 = vcmp.eq.s32.totalorder %v8280_v28, %v8291_v30  ;;  %vm859_vm4 = vcmp.eq.s32.totalorder %v8283_v29, %v8291_v30  ;;  %vm824_vm5 = vcmp.eq.s32.totalorder %v8280_v28, %v8296_v31 }
  0x6c   :  { %6972 = vmatpush1.bf16.msk.msra.mxu0 %vm6971_vm12, %v8082_v13  ;;  %vm282_vm12 = vcmp.eq.s32.totalorder %v8137_v6, %v8602_v61  ;;  %vm7005_vm2 = vmpackc.low %vm791_vm9, %vm757_vm7  ;;  %vm858_vm7 = vcmp.eq.s32.totalorder %v8283_v29, %v8296_v31 }
  0x6d   :  { %7038 = vmatprep.subr.msk.bf16.mxu0 %vm8624_vm0, %v8082_v13  ;;  %7006 = vmatprep.subr.msk.bf16.mxu1 %vm7005_vm2, %v8082_v13  ;;  %vm7007_vm0 = vmpackc.low %vm790_vm11, %vm756_vm10  ;;  %vm384_vm10 = vcmp.eq.s32.totalorder %v8156_v12, %v8602_v61  ;;  %vm419_vm11 = vcmp.eq.s32.totalorder %v8182_v14, %v8567_v58 }
  0x6e   :  { %vm8677_vm6 = vmpackc.low %vm316_vm14, %vm282_vm12  ;;  %vm453_vm12 = vcmp.eq.s32.totalorder %v8185_v15, %v8567_v58 }
  0x6f   :  { %3541 = vmatmul.mubr.f32.vlgmr.msra.gmra.mrb[0].mxu0 %v8642_v63  ;;  %7008 = vmatpush1.bf16.msk.msra.mxu1 %vm7007_vm0, %v8082_v13  ;;  %vm8689_vm9 = vmpackc.low %vm385_vm1, %vm351_vm15  ;;  %vm893_vm15 = vcmp.eq.s32.totalorder %v8308_v32, %v8291_v30  ;;  %vm927_vm1 = vcmp.eq.s32.totalorder %v8311_v33, %v8291_v30  ;;  %vm892_vm0 = vcmp.eq.s32.totalorder %v8308_v32, %v8296_v31 }
  0x70   :  { %7040 = vmatpush1.bf16.msk.msra.mxu0 %vm8644_vm8, %v8082_v13  ;;  %vm350_vm8 = vcmp.eq.s32.totalorder %v8153_v11, %v8602_v61  ;;  %3682 = vmatprep.mubr.f32.mxu0 %v8142_v8  ;;  %vm7009_vm14 = vmpackc.low %vm859_vm4, %vm825_vm3  ;;  %vm926_vm3 = vcmp.eq.s32.totalorder %v8311_v33, %v8296_v31 }
  0x71   :  { %7042 = vmatprep.subr.msk.bf16.mxu0 %vm8656_vm13, %v8082_v13  ;;  %7010 = vmatprep.subr.msk.bf16.mxu1 %vm7009_vm14, %v8082_v13  ;;  %vm7011_vm13 = vmpackc.low %vm858_vm7, %vm824_vm5  ;;  %vm418_vm5 = vcmp.eq.s32.totalorder %v8182_v14, %v8602_v61  ;;  %vm487_vm7 = vcmp.eq.s32.totalorder %v8198_v16, %v8567_v58 }
  0x72   :  { %vm7047_vm2 = vmpackc.low %vm384_vm10, %vm350_vm8  ;;  %vm521_vm8 = vcmp.eq.s32.totalorder %v8201_v17, %v8567_v58 }
  0x73   :  { %7012 = vmatpush1.bf16.msk.msra.mxu1 %vm7011_vm13, %v8082_v13  ;;  %vm7049_vm4 = vmpackc.low %vm453_vm12, %vm419_vm11  ;;  %vm995_vm11 = vcmp.eq.s32.totalorder %v8343_v37, %v8291_v30  ;;  %vm960_vm13 = vcmp.eq.s32.totalorder %v8340_v36, %v8296_v31 }
  0x74   :  { %7044 = vmatpush1.bf16.msk.msra.mxu0 %vm8677_vm6, %v8082_v13  ;;  %vm452_vm6 = vcmp.eq.s32.totalorder %v8185_v15, %v8602_v61  ;;  %vm7013_vm10 = vmpackc.low %vm927_vm1, %vm893_vm15  ;;  %vm994_vm15 = vcmp.eq.s32.totalorder %v8343_v37, %v8296_v31 }
  0x75   :  { %7046 = vmatprep.subr.msk.bf16.mxu0 %vm8689_vm9, %v8082_v13  ;;  %7014 = vmatprep.subr.msk.bf16.mxu1 %vm7013_vm10, %v8082_v13  ;;  %vm7015_vm14 = vmpackc.low %vm926_vm3, %vm892_vm0  ;;  %vm961_vm9 = vcmp.eq.s32.totalorder %v8340_v36, %v8291_v30  ;;  %vm486_vm0 = vcmp.eq.s32.totalorder %v8198_v16, %v8602_v61  ;;  %vm520_vm3 = vcmp.eq.s32.totalorder %v8201_v17, %v8602_v61 }
  0x76   :  { %vm7051_vm12 = vmpackc.low %vm452_vm6, %vm418_vm5  ;;  %vm589_vm5 = vcmp.eq.s32.totalorder %v8217_v19, %v8567_v58 }
  0x77   :  { %7016 = vmatpush1.bf16.msk.msra.mxu1 %vm7015_vm14, %v8082_v13  ;;  %vm7053_vm1 = vmpackc.low %vm521_vm8, %vm487_vm7  ;;  %vm1063_vm7 = vcmp.eq.s32.totalorder %v8384_v41, %v8291_v30  ;;  %vm1028_vm14 = vcmp.eq.s32.totalorder %v8381_v40, %v8296_v31 }
  0x78   :  { %7048 = vmatpush1.bf16.msk.msra.mxu0 %vm7047_vm2, %v8082_v13  ;;  %vm555_vm2 = vcmp.eq.s32.totalorder %v8214_v18, %v8567_v58  ;;  %vm7017_vm6 = vmpackc.low %vm995_vm11, %vm961_vm9  ;;  %vm1062_vm9 = vcmp.eq.s32.totalorder %v8384_v41, %v8296_v31 }
  0x79   :  { %7050 = vmatprep.subr.msk.bf16.mxu0 %vm7049_vm4, %v8082_v13  ;;  %7018 = vmatprep.subr.msk.bf16.mxu1 %vm7017_vm6, %v8082_v13  ;;  %vm7019_vm10 = vmpackc.low %vm994_vm15, %vm960_vm13  ;;  %vm1029_vm4 = vcmp.eq.s32.totalorder %v8381_v40, %v8291_v30  ;;  %vm554_vm13 = vcmp.eq.s32.totalorder %v8214_v18, %v8602_v61  ;;  %vm588_vm15 = vcmp.eq.s32.totalorder %v8217_v19, %v8602_v61 }
  0x7a   :  { %vm7055_vm8 = vmpackc.low %vm520_vm3, %vm486_vm0  ;;  %vm657_vm0 = vcmp.eq.s32.totalorder %v8233_v21, %v8567_v58 }
  0x7b   :  { %7020 = vmatpush1.bf16.msk.msra.mxu1 %vm7019_vm10, %v8082_v13  ;;  %vm7057_vm11 = vmpackc.low %vm589_vm5, %vm555_vm2  ;;  %vm1131_vm2 = vcmp.eq.s32.totalorder %v8428_v45, %v8291_v30  ;;  %vm1096_vm10 = vcmp.eq.s32.totalorder %v8425_v44, %v8296_v31 }
  0x7c   :  { %7052 = vmatpush1.bf16.msk.msra.mxu0 %vm7051_vm12, %v8082_v13  ;;  %vm623_vm12 = vcmp.eq.s32.totalorder %v8230_v20, %v8567_v58  ;;  %vm7021_vm3 = vmpackc.low %vm1063_vm7, %vm1029_vm4  ;;  %vm1130_vm4 = vcmp.eq.s32.totalorder %v8428_v45, %v8296_v31 }
  0x7d   :  { %7054 = vmatprep.subr.msk.bf16.mxu0 %vm7053_vm1, %v8082_v13  ;;  %7022 = vmatprep.subr.msk.bf16.mxu1 %vm7021_vm3, %v8082_v13  ;;  %vm7023_vm6 = vmpackc.low %vm1062_vm9, %vm1028_vm14  ;;  %vm1097_vm1 = vcmp.eq.s32.totalorder %v8425_v44, %v8291_v30  ;;  %vm656_vm14 = vcmp.eq.s32.totalorder %v8233_v21, %v8602_v61  ;;  %vm691_vm9 = vcmp.eq.s32.totalorder %v8246_v22, %v8567_v58 }
  0x7e   :  { %vm8772_vm5 = vmpackc.low %vm588_vm15, %vm554_vm13  ;;  %vm725_vm13 = vcmp.eq.s32.totalorder %v8249_v23, %v8567_v58 }
  0x7f   :  { %7024 = vmatpush1.bf16.msk.msra.mxu1 %vm7023_vm6, %v8082_v13  ;;  %vm8782_vm7 = vmpackc.low %vm657_vm0, %vm623_vm12  ;;  %vm1165_vm12 = vcmp.eq.s32.totalorder %v8469_v48, %v8291_v30  ;;  %vm1199_vm0 = vcmp.eq.s32.totalorder %v8472_v49, %v8291_v30  ;;  %vm1164_vm6 = vcmp.eq.s32.totalorder %v8469_v48, %v8296_v31 }
  0x80   :  { %7056 = vmatpush1.bf16.msk.msra.mxu0 %vm7055_vm8, %v8082_v13  ;;  %vm622_vm8 = vcmp.eq.s32.totalorder %v8230_v20, %v8602_v61  ;;  %vm7025_vm15 = vmpackc.low %vm1131_vm2, %vm1097_vm1  ;;  %vm1198_vm1 = vcmp.eq.s32.totalorder %v8472_v49, %v8296_v31 }
  0x81   :  { %7058 = vmatprep.subr.msk.bf16.mxu0 %vm7057_vm11, %v8082_v13  ;;  %7026 = vmatprep.subr.msk.bf16.mxu1 %vm7025_vm15, %v8082_v13  ;;  %vm7027_vm11 = vmpackc.low %vm1130_vm4, %vm1096_vm10  ;;  %vm724_vm10 = vcmp.eq.s32.totalorder %v8249_v23, %v8602_v61  ;;  %vm759_vm4 = vcmp.eq.s32.totalorder %v8258_v24, %v8567_v58 }
  0x82   :  { %vm8805_vm3 = vmpackc.low %vm656_vm14, %vm622_vm8  ;;  %vm793_vm8 = vcmp.eq.s32.totalorder %v8265_v25, %v8567_v58 }
  0x83   :  { %7028 = vmatpush1.bf16.msk.msra.mxu1 %vm7027_vm11, %v8082_v13  ;;  %vm8823_vm2 = vmpackc.low %vm725_vm13, %vm691_vm9  ;;  %vm1233_vm9 = vcmp.eq.s32.totalorder %v8509_v52, %v8291_v30  ;;  %vm1267_vm13 = vcmp.eq.s32.totalorder %v8516_v53, %v8291_v30  ;;  %vm1232_vm11 = vcmp.eq.s32.totalorder %v8509_v52, %v8296_v31 }
  0x84   :  { %7060 = vmatpush1.bf16.msk.msra.mxu0 %vm8772_vm5, %v8082_v13  ;;  %vm690_vm5 = vcmp.eq.s32.totalorder %v8246_v22, %v8602_v61  ;;  %vm7031_vm14 = vmpackc.low %vm1198_vm1, %vm1164_vm6  ;;  %vm792_vm6 = vcmp.eq.s32.totalorder %v8265_v25, %v8602_v61  ;;  %vm827_vm1 = vcmp.eq.s32.totalorder %v8280_v28, %v8567_v58 }
  0x85   :  { %7062 = vmatprep.subr.msk.bf16.mxu0 %vm8782_vm7, %v8082_v13  ;;  %vm7029_vm7 = vmpackc.low %vm1199_vm0, %vm1165_vm12  ;;  %vm1266_vm12 = vcmp.eq.s32.totalorder %v8516_v53, %v8296_v31  ;;  %v9316_v31 = vrot.slane %v9016_v59, %v8272_v27 }
  0x86   :  { %7030 = vmatprep.subr.msk.bf16.mxu1 %vm7029_vm7, %v8082_v13  ;;  %vm8850_vm15 = vmpackc.low %vm724_vm10, %vm690_vm5  ;;  %vm861_vm5 = vcmp.eq.s32.totalorder %v8283_v29, %v8567_v58 }
  0x87   :  { %7032 = vmatpush1.bf16.msk.msra.mxu1 %vm7031_vm14, %v8082_v13  ;;  %vm7069_vm0 = vmpackc.low %vm793_vm8, %vm759_vm4  ;;  %vm217_vm4 = vcmp.eq.s32.totalorder %v8123_v1, %v8845_v47  ;;  %vm251_vm8 = vcmp.eq.s32.totalorder %v8132_v4, %v8845_v47  ;;  %vm216_vm14 = vcmp.eq.s32.totalorder %v8123_v1, %v8861_v51 }
  0x88   :  { %7064 = vmatpush1.bf16.msk.msra.mxu0 %vm8805_vm3, %v8082_v13  ;;  %vm758_vm3 = vcmp.eq.s32.totalorder %v8258_v24, %v8602_v61  ;;  %vm7035_vm10 = vmpackc.low %vm1266_vm12, %vm1232_vm11  ;;  %vm860_vm11 = vcmp.eq.s32.totalorder %v8283_v29, %v8602_v61  ;;  %vm895_vm12 = vcmp.eq.s32.totalorder %v8308_v32, %v8567_v58 }
  0x89   :  { %7066 = vmatprep.subr.msk.bf16.mxu0 %vm8823_vm2, %v8082_v13  ;;  %vm7033_vm2 = vmpackc.low %vm1267_vm13, %vm1233_vm9  ;;  %vm250_vm9 = vcmp.eq.s32.totalorder %v8132_v4, %v8861_v51 }
  0x8a   :  { %7034 = vmatprep.subr.msk.bf16.mxu1 %vm7033_vm2, %v8082_v13  ;;  %vm8888_vm7 = vmpackc.low %vm792_vm6, %vm758_vm3  ;;  %vm929_vm3 = vcmp.eq.s32.totalorder %v8311_v33, %v8567_v58 }
  0x8b   :  { %7036 = vmatpush1.bf16.msk.msra.mxu1 %vm7035_vm10, %v8082_v13  ;;  %vm8898_vm13 = vmpackc.low %vm861_vm5, %vm827_vm1  ;;  %vm285_vm1 = vcmp.eq.s32.totalorder %v8137_v6, %v8845_v47  ;;  %vm319_vm5 = vcmp.eq.s32.totalorder %v8140_v7, %v8845_v47  ;;  %vm284_vm10 = vcmp.eq.s32.totalorder %v8137_v6, %v8861_v51 }
  0x8c   :  { %7068 = vmatpush1.bf16.msk.msra.mxu0 %vm8850_vm15, %v8082_v13  ;;  %vm826_vm15 = vcmp.eq.s32.totalorder %v8280_v28, %v8602_v61  ;;  %vm7101_vm6 = vmpackc.low %vm251_vm8, %vm217_vm4  ;;  %vm318_vm4 = vcmp.eq.s32.totalorder %v8140_v7, %v8861_v51 }
  0x8d   :  { %7070 = vmatprep.subr.msk.bf16.mxu0 %vm7069_vm0, %v8082_v13  ;;  %7102 = vmatprep.subr.msk.bf16.mxu1 %vm7101_vm6, %v8082_v13  ;;  %vm7103_vm0 = vmpackc.low %vm250_vm9, %vm216_vm14  ;;  %vm928_vm14 = vcmp.eq.s32.totalorder %v8311_v33, %v8602_v61  ;;  %vm963_vm9 = vcmp.eq.s32.totalorder %v8340_v36, %v8567_v58 }
  0x8e   :  { %3612 = vmatmul.mubr.f32.vlgmr.msra.gmra.mrb[0].mxu1 %v8642_v63  ;;  %vm8919_vm2 = vmpackc.low %vm860_vm11, %vm826_vm15  ;;  %vm997_vm15 = vcmp.eq.s32.totalorder %v8343_v37, %v8567_v58 }
  0x8f   :  { %7104 = vmatpush1.bf16.msk.msra.mxu1 %vm7103_vm0, %v8082_v13  ;;  %vm8931_vm8 = vmpackc.low %vm929_vm3, %vm895_vm12  ;;  %3753 = vmatprep.mubr.f32.mxu1 %v8142_v8  ;;  %vm353_vm12 = vcmp.eq.s32.totalorder %v8153_v11, %v8845_v47  ;;  %vm387_vm3 = vcmp.eq.s32.totalorder %v8156_v12, %v8845_v47  ;;  %vm352_vm0 = vcmp.eq.s32.totalorder %v8153_v11, %v8861_v51 }
  0x90   :  { %7072 = vmatpush1.bf16.msk.msra.mxu0 %vm8888_vm7, %v8082_v13  ;;  %vm894_vm7 = vcmp.eq.s32.totalorder %v8308_v32, %v8602_v61  ;;  %vm7105_vm11 = vmpackc.low %vm319_vm5, %vm285_vm1  ;;  %vm386_vm1 = vcmp.eq.s32.totalorder %v8156_v12, %v8861_v51 }
  0x91   :  { %7074 = vmatprep.subr.msk.bf16.mxu0 %vm8898_vm13, %v8082_v13  ;;  %7106 = vmatprep.subr.msk.bf16.mxu1 %vm7105_vm11, %v8082_v13  ;;  %vm7107_vm13 = vmpackc.low %vm318_vm4, %vm284_vm10  ;;  %vm962_vm10 = vcmp.eq.s32.totalorder %v8340_v36, %v8602_v61  ;;  %vm1031_vm4 = vcmp.eq.s32.totalorder %v8381_v40, %v8567_v58 }
  0x92   :  { %vm7079_vm6 = vmpackc.low %vm928_vm14, %vm894_vm7  ;;  %vm1065_vm7 = vcmp.eq.s32.totalorder %v8384_v41, %v8567_v58 }
  0x93   :  { %7108 = vmatpush1.bf16.msk.msra.mxu1 %vm7107_vm13, %v8082_v13  ;;  %vm7081_vm5 = vmpackc.low %vm997_vm15, %vm963_vm9  ;;  %vm455_vm9 = vcmp.eq.s32.totalorder %v8185_v15, %v8845_v47  ;;  %vm420_vm13 = vcmp.eq.s32.totalorder %v8182_v14, %v8861_v51 }
  0x94   :  { %7076 = vmatpush1.bf16.msk.msra.mxu0 %vm8919_vm2, %v8082_v13  ;;  %vm996_vm2 = vcmp.eq.s32.totalorder %v8343_v37, %v8602_v61  ;;  %vm7109_vm14 = vmpackc.low %vm387_vm3, %vm353_vm12  ;;  %vm454_vm12 = vcmp.eq.s32.totalorder %v8185_v15, %v8861_v51 }
  0x95   :  { %7078 = vmatprep.subr.msk.bf16.mxu0 %vm8931_vm8, %v8082_v13  ;;  %7110 = vmatprep.subr.msk.bf16.mxu1 %vm7109_vm14, %v8082_v13  ;;  %vm7111_vm11 = vmpackc.low %vm386_vm1, %vm352_vm0  ;;  %vm421_vm8 = vcmp.eq.s32.totalorder %v8182_v14, %v8845_v47  ;;  %vm1030_vm0 = vcmp.eq.s32.totalorder %v8381_v40, %v8602_v61  ;;  %vm1064_vm1 = vcmp.eq.s32.totalorder %v8384_v41, %v8602_v61 }
  0x96   :  { %vm7083_vm15 = vmpackc.low %vm996_vm2, %vm962_vm10  ;;  %vm1133_vm10 = vcmp.eq.s32.totalorder %v8428_v45, %v8567_v58 }
  0x97   :  { %7112 = vmatpush1.bf16.msk.msra.mxu1 %vm7111_vm11, %v8082_v13  ;;  %vm7085_vm3 = vmpackc.low %vm1065_vm7, %vm1031_vm4  ;;  %vm523_vm4 = vcmp.eq.s32.totalorder %v8201_v17, %v8845_v47  ;;  %vm488_vm11 = vcmp.eq.s32.totalorder %v8198_v16, %v8861_v51 }
  0x98   :  { %7080 = vmatpush1.bf16.msk.msra.mxu0 %vm7079_vm6, %v8082_v13  ;;  %vm1099_vm6 = vcmp.eq.s32.totalorder %v8425_v44, %v8567_v58  ;;  %vm7113_vm2 = vmpackc.low %vm455_vm9, %vm421_vm8  ;;  %vm522_vm8 = vcmp.eq.s32.totalorder %v8201_v17, %v8861_v51 }
  0x99   :  { %7082 = vmatprep.subr.msk.bf16.mxu0 %vm7081_vm5, %v8082_v13  ;;  %7114 = vmatprep.subr.msk.bf16.mxu1 %vm7113_vm2, %v8082_v13  ;;  %vm7115_vm14 = vmpackc.low %vm454_vm12, %vm420_vm13  ;;  %vm489_vm5 = vcmp.eq.s32.totalorder %v8198_v16, %v8845_v47  ;;  %vm1132_vm13 = vcmp.eq.s32.totalorder %v8428_v45, %v8602_v61  ;;  %vm1167_vm12 = vcmp.eq.s32.totalorder %v8469_v48, %v8567_v58 }
  0x9a   :  { %vm8994_vm7 = vmpackc.low %vm1064_vm1, %vm1030_vm0  ;;  %vm1201_vm0 = vcmp.eq.s32.totalorder %v8472_v49, %v8567_v58 }
  0x9b   :  { %7116 = vmatpush1.bf16.msk.msra.mxu1 %vm7115_vm14, %v8082_v13  ;;  %vm9004_vm9 = vmpackc.low %vm1133_vm10, %vm1099_vm6  ;;  %vm557_vm6 = vcmp.eq.s32.totalorder %v8214_v18, %v8845_v47  ;;  %vm591_vm10 = vcmp.eq.s32.totalorder %v8217_v19, %v8845_v47  ;;  %vm556_vm14 = vcmp.eq.s32.totalorder %v8214_v18, %v8861_v51 }
  0x9c   :  { %7084 = vmatpush1.bf16.msk.msra.mxu0 %vm7083_vm15, %v8082_v13  ;;  %vm1098_vm15 = vcmp.eq.s32.totalorder %v8425_v44, %v8602_v61  ;;  %vm7117_vm1 = vmpackc.low %vm523_vm4, %vm489_vm5  ;;  %vm590_vm5 = vcmp.eq.s32.totalorder %v8217_v19, %v8861_v51 }
  0x9d   :  { %7086 = vmatprep.subr.msk.bf16.mxu0 %vm7085_vm3, %v8082_v13  ;;  %7118 = vmatprep.subr.msk.bf16.mxu1 %vm7117_vm1, %v8082_v13  ;;  %vm7119_vm3 = vmpackc.low %vm522_vm8, %vm488_vm11  ;;  %vm1200_vm11 = vcmp.eq.s32.totalorder %v8472_v49, %v8602_v61  ;;  %vm1235_vm8 = vcmp.eq.s32.totalorder %v8509_v52, %v8567_v58 }
  0x9e   :  { %vm9026_vm2 = vmpackc.low %vm1132_vm13, %vm1098_vm15  ;;  %vm1269_vm15 = vcmp.eq.s32.totalorder %v8516_v53, %v8567_v58  ;;  %v9525_v58 = vrot.slane %v9016_v59, %v8559_v57 }
  0x9f   :  { %7120 = vmatpush1.bf16.msk.msra.mxu1 %vm7119_vm3, %v8082_v13  ;;  %vm9038_vm4 = vmpackc.low %vm1201_vm0, %vm1167_vm12  ;;  %vm625_vm12 = vcmp.eq.s32.totalorder %v8230_v20, %v8845_v47  ;;  %vm659_vm0 = vcmp.eq.s32.totalorder %v8233_v21, %v8845_v47  ;;  %vm624_vm3 = vcmp.eq.s32.totalorder %v8230_v20, %v8861_v51 }
  0xa0   :  { %7088 = vmatpush1.bf16.msk.msra.mxu0 %vm8994_vm7, %v8082_v13  ;;  %vm1166_vm7 = vcmp.eq.s32.totalorder %v8469_v48, %v8602_v61  ;;  %vm7123_vm13 = vmpackc.low %vm590_vm5, %vm556_vm14  ;;  %vm1268_vm14 = vcmp.eq.s32.totalorder %v8516_v53, %v8602_v61  ;;  %vm219_vm5 = vcmp.eq.s32.totalorder %v8123_v1, %v9052_v0 }
  0xa1   :  { %7090 = vmatprep.subr.msk.bf16.mxu0 %vm9004_vm9, %v8082_v13  ;;  %vm7121_vm9 = vmpackc.low %vm591_vm10, %vm557_vm6  ;;  %vm658_vm6 = vcmp.eq.s32.totalorder %v8233_v21, %v8861_v51 }
  0xa2   :  { %7122 = vmatprep.subr.msk.bf16.mxu1 %vm7121_vm9, %v8082_v13  ;;  %vm9062_vm1 = vmpackc.low %vm1200_vm11, %vm1166_vm7 }
  0xa3   :  { %7124 = vmatpush1.bf16.msk.msra.mxu1 %vm7123_vm13, %v8082_v13  ;;  %vm9074_vm10 = vmpackc.low %vm1269_vm15, %vm1235_vm8  ;;  %vm693_vm8 = vcmp.eq.s32.totalorder %v8246_v22, %v8845_v47  ;;  %vm727_vm15 = vcmp.eq.s32.totalorder %v8249_v23, %v8845_v47  ;;  %vm692_vm13 = vcmp.eq.s32.totalorder %v8246_v22, %v8861_v51 }
  0xa4   :  { %7092 = vmatpush1.bf16.msk.msra.mxu0 %vm9026_vm2, %v8082_v13  ;;  %vm1234_vm2 = vcmp.eq.s32.totalorder %v8509_v52, %v8602_v61  ;;  %vm7125_vm7 = vmpackc.low %vm659_vm0, %vm625_vm12  ;;  %vm726_vm12 = vcmp.eq.s32.totalorder %v8249_v23, %v8861_v51  ;;  %v9583_v61 = vld [vmem:[#allocation5] sm:$0xff] }
  0xa5   :  { %7094 = vmatprep.subr.msk.bf16.mxu0 %vm9038_vm4, %v8082_v13  ;;  %vm253_vm4 = vcmp.eq.s32.totalorder %v8132_v4, %v9052_v0  ;;  %7126 = vmatprep.subr.msk.bf16.mxu1 %vm7125_vm7, %v8082_v13  ;;  %vm7127_vm11 = vmpackc.low %vm658_vm6, %vm624_vm3  ;;  %vm218_vm3 = vcmp.eq.s32.totalorder %v8123_v1, %v9084_v10  ;;  %vm287_vm6 = vcmp.eq.s32.totalorder %v8137_v6, %v9052_v0 }
  0xa6   :  { %vm7099_vm9 = vmpackc.low %vm1268_vm14, %vm1234_vm2  ;;  %vm321_vm2 = vcmp.eq.s32.totalorder %v8140_v7, %v9052_v0 }
  0xa7   :  { %7128 = vmatpush1.bf16.msk.msra.mxu1 %vm7127_vm11, %v8082_v13  ;;  %vm7165_vm0 = vmpackc.low %vm253_vm4, %vm219_vm5  ;;  %vm795_vm5 = vcmp.eq.s32.totalorder %v8265_v25, %v8845_v47  ;;  %vm760_vm11 = vcmp.eq.s32.totalorder %v8258_v24, %v8861_v51 }
  0xa8   :  { %7096 = vmatpush1.bf16.msk.msra.mxu0 %vm9062_vm1, %v8082_v13  ;;  %vm252_vm1 = vcmp.eq.s32.totalorder %v8132_v4, %v9084_v10  ;;  %vm7129_vm14 = vmpackc.low %vm727_vm15, %vm693_vm8  ;;  %vm794_vm8 = vcmp.eq.s32.totalorder %v8265_v25, %v8861_v51 }
  0xa9   :  { %7098 = vmatprep.subr.msk.bf16.mxu0 %vm9074_vm10, %v8082_v13  ;;  %7130 = vmatprep.subr.msk.bf16.mxu1 %vm7129_vm14, %v8082_v13  ;;  %vm7131_vm7 = vmpackc.low %vm726_vm12, %vm692_vm13  ;;  %vm761_vm10 = vcmp.eq.s32.totalorder %v8258_v24, %v8845_v47  ;;  %vm320_vm13 = vcmp.eq.s32.totalorder %v8140_v7, %v9084_v10  ;;  %vm355_vm12 = vcmp.eq.s32.totalorder %v8153_v11, %v9052_v0 }
  0xaa   :  { %vm9120_vm4 = vmpackc.low %vm252_vm1, %vm218_vm3  ;;  %vm389_vm3 = vcmp.eq.s32.totalorder %v8156_v12, %v9052_v0 }
  0xab   :  { %7132 = vmatpush1.bf16.msk.msra.mxu1 %vm7131_vm7, %v8082_v13  ;;  %vm9130_vm15 = vmpackc.low %vm321_vm2, %vm287_vm6  ;;  %vm829_vm6 = vcmp.eq.s32.totalorder %v8280_v28, %v8845_v47  ;;  %vm863_vm2 = vcmp.eq.s32.totalorder %v8283_v29, %v8845_v47  ;;  %vm828_vm7 = vcmp.eq.s32.totalorder %v8280_v28, %v8861_v51 }
  0xac   :  { %7100 = vmatpush1.bf16.msk.msra.mxu0 %vm7099_vm9, %v8082_v13  ;;  %vm286_vm9 = vcmp.eq.s32.totalorder %v8137_v6, %v9084_v10  ;;  %vm7133_vm1 = vmpackc.low %vm795_vm5, %vm761_vm10  ;;  %vm862_vm10 = vcmp.eq.s32.totalorder %v8283_v29, %v8861_v51 }
  0xad   :  { %7166 = vmatprep.subr.msk.bf16.mxu0 %vm7165_vm0, %v8082_v13  ;;  %7134 = vmatprep.subr.msk.bf16.mxu1 %vm7133_vm1, %v8082_v13  ;;  %vm7135_vm0 = vmpackc.low %vm794_vm8, %vm760_vm11  ;;  %vm388_vm11 = vcmp.eq.s32.totalorder %v8156_v12, %v9084_v10  ;;  %vm423_vm8 = vcmp.eq.s32.totalorder %v8182_v14, %v9052_v0 }
  0xae   :  { %vm9151_vm14 = vmpackc.low %vm320_vm13, %vm286_vm9 }
  0xaf   :  { %3683 = vmatmul.mubr.f32.vlgmr.msra.gmra.mrb[2].mxu0 %v8642_v63  ;;  %7136 = vmatpush1.bf16.msk.msra.mxu1 %vm7135_vm0, %v8082_v13  ;;  %vm9163_vm5 = vmpackc.low %vm389_vm3, %vm355_vm12  ;;  %vm897_vm12 = vcmp.eq.s32.totalorder %v8308_v32, %v8845_v47  ;;  %vm931_vm3 = vcmp.eq.s32.totalorder %v8311_v33, %v8845_v47  ;;  %vm896_vm0 = vcmp.eq.s32.totalorder %v8308_v32, %v8861_v51 }
  0xb0   :  { %7168 = vmatpush1.bf16.msk.msra.mxu0 %vm9120_vm4, %v8082_v13  ;;  %vm354_vm4 = vcmp.eq.s32.totalorder %v8153_v11, %v9084_v10  ;;  %3824 = vmatprep.mubr.f32.mxu0 %v9171_v42  ;;  %vm7137_vm9 = vmpackc.low %vm863_vm2, %vm829_vm6  ;;  %vm930_vm6 = vcmp.eq.s32.totalorder %v8311_v33, %v8861_v51 }
  0xb1   :  { %7170 = vmatprep.subr.msk.bf16.mxu0 %vm9130_vm15, %v8082_v13  ;;  %vm457_vm15 = vcmp.eq.s32.totalorder %v8185_v15, %v9052_v0  ;;  %7138 = vmatprep.subr.msk.bf16.mxu1 %vm7137_vm9, %v8082_v13  ;;  %vm7139_vm13 = vmpackc.low %vm862_vm10, %vm828_vm7  ;;  %vm422_vm7 = vcmp.eq.s32.totalorder %v8182_v14, %v9084_v10  ;;  %vm491_vm10 = vcmp.eq.s32.totalorder %v8198_v16, %v9052_v0 }
  0xb2   :  { %vm7175_vm1 = vmpackc.low %vm388_vm11, %vm354_vm4  ;;  %vm525_vm4 = vcmp.eq.s32.totalorder %v8201_v17, %v9052_v0 }
  0xb3   :  { %7140 = vmatpush1.bf16.msk.msra.mxu1 %vm7139_vm13, %v8082_v13  ;;  %vm7177_vm2 = vmpackc.low %vm457_vm15, %vm423_vm8  ;;  %vm999_vm8 = vcmp.eq.s32.totalorder %v8343_v37, %v8845_v47  ;;  %vm964_vm13 = vcmp.eq.s32.totalorder %v8340_v36, %v8861_v51 }
  0xb4   :  { %7172 = vmatpush1.bf16.msk.msra.mxu0 %vm9151_vm14, %v8082_v13  ;;  %vm456_vm14 = vcmp.eq.s32.totalorder %v8185_v15, %v9084_v10  ;;  %vm7141_vm11 = vmpackc.low %vm931_vm3, %vm897_vm12  ;;  %vm998_vm12 = vcmp.eq.s32.totalorder %v8343_v37, %v8861_v51 }
  0xb5   :  { %7174 = vmatprep.subr.msk.bf16.mxu0 %vm9163_vm5, %v8082_v13  ;;  %7142 = vmatprep.subr.msk.bf16.mxu1 %vm7141_vm11, %v8082_v13  ;;  %vm7143_vm9 = vmpackc.low %vm930_vm6, %vm896_vm0  ;;  %vm965_vm5 = vcmp.eq.s32.totalorder %v8340_v36, %v8845_v47  ;;  %vm490_vm0 = vcmp.eq.s32.totalorder %v8198_v16, %v9084_v10  ;;  %vm524_vm6 = vcmp.eq.s32.totalorder %v8201_v17, %v9084_v10 }
  0xb6   :  { %vm7179_vm15 = vmpackc.low %vm456_vm14, %vm422_vm7  ;;  %vm593_vm7 = vcmp.eq.s32.totalorder %v8217_v19, %v9052_v0 }
  0xb7   :  { %7144 = vmatpush1.bf16.msk.msra.mxu1 %vm7143_vm9, %v8082_v13  ;;  %vm7181_vm3 = vmpackc.low %vm525_vm4, %vm491_vm10  ;;  %vm1067_vm10 = vcmp.eq.s32.totalorder %v8384_v41, %v8845_v47  ;;  %vm1032_vm9 = vcmp.eq.s32.totalorder %v8381_v40, %v8861_v51 }
  0xb8   :  { %7176 = vmatpush1.bf16.msk.msra.mxu0 %vm7175_vm1, %v8082_v13  ;;  %vm559_vm1 = vcmp.eq.s32.totalorder %v8214_v18, %v9052_v0  ;;  %vm7145_vm14 = vmpackc.low %vm999_vm8, %vm965_vm5  ;;  %vm1066_vm5 = vcmp.eq.s32.totalorder %v8384_v41, %v8861_v51 }
  0xb9   :  { %7178 = vmatprep.subr.msk.bf16.mxu0 %vm7177_vm2, %v8082_v13  ;;  %7146 = vmatprep.subr.msk.bf16.mxu1 %vm7145_vm14, %v8082_v13  ;;  %vm7147_vm11 = vmpackc.low %vm998_vm12, %vm964_vm13  ;;  %vm1033_vm2 = vcmp.eq.s32.totalorder %v8381_v40, %v8845_v47  ;;  %vm558_vm13 = vcmp.eq.s32.totalorder %v8214_v18, %v9084_v10  ;;  %vm592_vm12 = vcmp.eq.s32.totalorder %v8217_v19, %v9084_v10 }
  0xba   :  { %vm7183_vm4 = vmpackc.low %vm524_vm6, %vm490_vm0  ;;  %vm661_vm0 = vcmp.eq.s32.totalorder %v8233_v21, %v9052_v0 }
  0xbb   :  { %7148 = vmatpush1.bf16.msk.msra.mxu1 %vm7147_vm11, %v8082_v13  ;;  %vm7185_vm8 = vmpackc.low %vm593_vm7, %vm559_vm1  ;;  %vm1135_vm1 = vcmp.eq.s32.totalorder %v8428_v45, %v8845_v47  ;;  %vm1100_vm11 = vcmp.eq.s32.totalorder %v8425_v44, %v8861_v51 }
  0xbc   :  { %7180 = vmatpush1.bf16.msk.msra.mxu0 %vm7179_vm15, %v8082_v13  ;;  %vm627_vm15 = vcmp.eq.s32.totalorder %v8230_v20, %v9052_v0  ;;  %vm7149_vm6 = vmpackc.low %vm1067_vm10, %vm1033_vm2  ;;  %vm1134_vm2 = vcmp.eq.s32.totalorder %v8428_v45, %v8861_v51 }
  0xbd   :  { %7182 = vmatprep.subr.msk.bf16.mxu0 %vm7181_vm3, %v8082_v13  ;;  %7150 = vmatprep.subr.msk.bf16.mxu1 %vm7149_vm6, %v8082_v13  ;;  %vm7151_vm14 = vmpackc.low %vm1066_vm5, %vm1032_vm9  ;;  %vm1101_vm3 = vcmp.eq.s32.totalorder %v8425_v44, %v8845_v47  ;;  %vm626_vm9 = vcmp.eq.s32.totalorder %v8230_v20, %v9084_v10  ;;  %vm660_vm5 = vcmp.eq.s32.totalorder %v8233_v21, %v9084_v10 }
  0xbe   :  { %vm7187_vm7 = vmpackc.low %vm592_vm12, %vm558_vm13  ;;  %vm729_vm13 = vcmp.eq.s32.totalorder %v8249_v23, %v9052_v0 }
  0xbf   :  { %7152 = vmatpush1.bf16.msk.msra.mxu1 %vm7151_vm14, %v8082_v13  ;;  %vm7189_vm10 = vmpackc.low %vm661_vm0, %vm627_vm15  ;;  %vm1203_vm15 = vcmp.eq.s32.totalorder %v8472_v49, %v8845_v47  ;;  %vm1168_vm14 = vcmp.eq.s32.totalorder %v8469_v48, %v8861_v51 }
  0xc0   :  { %7184 = vmatpush1.bf16.msk.msra.mxu0 %vm7183_vm4, %v8082_v13  ;;  %vm695_vm4 = vcmp.eq.s32.totalorder %v8246_v22, %v9052_v0  ;;  %vm7153_vm12 = vmpackc.low %vm1135_vm1, %vm1101_vm3  ;;  %vm1202_vm3 = vcmp.eq.s32.totalorder %v8472_v49, %v8861_v51 }
  0xc1   :  { %7186 = vmatprep.subr.msk.bf16.mxu0 %vm7185_vm8, %v8082_v13  ;;  %7154 = vmatprep.subr.msk.bf16.mxu1 %vm7153_vm12, %v8082_v13  ;;  %vm7155_vm6 = vmpackc.low %vm1134_vm2, %vm1100_vm11  ;;  %vm1169_vm8 = vcmp.eq.s32.totalorder %v8469_v48, %v8845_v47  ;;  %vm728_vm11 = vcmp.eq.s32.totalorder %v8249_v23, %v9084_v10  ;;  %vm763_vm2 = vcmp.eq.s32.totalorder %v8258_v24, %v9052_v0 }
  0xc2   :  { %vm9271_vm0 = vmpackc.low %vm660_vm5, %vm626_vm9  ;;  %vm797_vm9 = vcmp.eq.s32.totalorder %v8265_v25, %v9052_v0 }
  0xc3   :  { %7156 = vmatpush1.bf16.msk.msra.mxu1 %vm7155_vm6, %v8082_v13  ;;  %vm9281_vm1 = vmpackc.low %vm729_vm13, %vm695_vm4  ;;  %vm1237_vm4 = vcmp.eq.s32.totalorder %v8509_v52, %v8845_v47  ;;  %vm1271_vm13 = vcmp.eq.s32.totalorder %v8516_v53, %v8845_v47  ;;  %vm1236_vm6 = vcmp.eq.s32.totalorder %v8509_v52, %v8861_v51 }
  0xc4   :  { %7188 = vmatpush1.bf16.msk.msra.mxu0 %vm7187_vm7, %v8082_v13  ;;  %vm694_vm7 = vcmp.eq.s32.totalorder %v8246_v22, %v9084_v10  ;;  %vm7157_vm5 = vmpackc.low %vm1203_vm15, %vm1169_vm8  ;;  %vm1270_vm8 = vcmp.eq.s32.totalorder %v8516_v53, %v8861_v51  ;;  %v9757_v51 = vrot.slane %v9016_v59, %v8815_v43 }
  0xc5   :  { %7190 = vmatprep.subr.msk.bf16.mxu0 %vm7189_vm10, %v8082_v13  ;;  %7158 = vmatprep.subr.msk.bf16.mxu1 %vm7157_vm5, %v8082_v13  ;;  %vm7159_vm10 = vmpackc.low %vm1202_vm3, %vm1168_vm14  ;;  %vm796_vm14 = vcmp.eq.s32.totalorder %v8265_v25, %v9084_v10  ;;  %vm831_vm3 = vcmp.eq.s32.totalorder %v8280_v28, %v9052_v0 }
  0xc6   :  { %vm9305_vm12 = vmpackc.low %vm728_vm11, %vm694_vm7  ;;  %vm865_vm7 = vcmp.eq.s32.totalorder %v8283_v29, %v9052_v0 }
  0xc7   :  { %7160 = vmatpush1.bf16.msk.msra.mxu1 %vm7159_vm10, %v8082_v13  ;;  %vm7197_vm15 = vmpackc.low %vm797_vm9, %vm763_vm2  ;;  %vm221_vm2 = vcmp.eq.s32.totalorder %v8123_v1, %v9300_v5  ;;  %vm255_vm9 = vcmp.eq.s32.totalorder %v8132_v4, %v9300_v5  ;;  %vm220_vm10 = vcmp.eq.s32.totalorder %v8123_v1, %v9316_v31 }
  0xc8   :  { %7192 = vmatpush1.bf16.msk.msra.mxu0 %vm9271_vm0, %v8082_v13  ;;  %vm762_vm0 = vcmp.eq.s32.totalorder %v8258_v24, %v9084_v10  ;;  %vm7163_vm11 = vmpackc.low %vm1270_vm8, %vm1236_vm6  ;;  %vm864_vm6 = vcmp.eq.s32.totalorder %v8283_v29, %v9084_v10  ;;  %vm899_vm8 = vcmp.eq.s32.totalorder %v8308_v32, %v9052_v0 }
  0xc9   :  { %7194 = vmatprep.subr.msk.bf16.mxu0 %vm9281_vm1, %v8082_v13  ;;  %vm7161_vm1 = vmpackc.low %vm1271_vm13, %vm1237_vm4  ;;  %vm254_vm4 = vcmp.eq.s32.totalorder %v8132_v4, %v9316_v31 }
  0xca   :  { %7162 = vmatprep.subr.msk.bf16.mxu1 %vm7161_vm1, %v8082_v13  ;;  %vm9343_vm5 = vmpackc.low %vm796_vm14, %vm762_vm0  ;;  %vm933_vm0 = vcmp.eq.s32.totalorder %v8311_v33, %v9052_v0 }
  0xcb   :  { %7164 = vmatpush1.bf16.msk.msra.mxu1 %vm7163_vm11, %v8082_v13  ;;  %vm9353_vm13 = vmpackc.low %vm865_vm7, %vm831_vm3  ;;  %vm289_vm3 = vcmp.eq.s32.totalorder %v8137_v6, %v9300_v5  ;;  %vm323_vm7 = vcmp.eq.s32.totalorder %v8140_v7, %v9300_v5  ;;  %vm288_vm11 = vcmp.eq.s32.totalorder %v8137_v6, %v9316_v31 }
  0xcc   :  { %7196 = vmatpush1.bf16.msk.msra.mxu0 %vm9305_vm12, %v8082_v13  ;;  %vm830_vm12 = vcmp.eq.s32.totalorder %v8280_v28, %v9084_v10  ;;  %vm7229_vm14 = vmpackc.low %vm255_vm9, %vm221_vm2  ;;  %vm322_vm2 = vcmp.eq.s32.totalorder %v8140_v7, %v9316_v31 }
  0xcd   :  { %7198 = vmatprep.subr.msk.bf16.mxu0 %vm7197_vm15, %v8082_v13  ;;  %7230 = vmatprep.subr.msk.bf16.mxu1 %vm7229_vm14, %v8082_v13  ;;  %vm7231_vm15 = vmpackc.low %vm254_vm4, %vm220_vm10  ;;  %vm932_vm10 = vcmp.eq.s32.totalorder %v8311_v33, %v9084_v10  ;;  %vm967_vm4 = vcmp.eq.s32.totalorder %v8340_v36, %v9052_v0 }
  0xce   :  { %3754 = vmatmul.mubr.f32.vlgmr.msra.gmra.mrb[2].mxu1 %v8642_v63  ;;  %vm9374_vm1 = vmpackc.low %vm864_vm6, %vm830_vm12  ;;  %vm1001_vm12 = vcmp.eq.s32.totalorder %v8343_v37, %v9052_v0  ;;  %v9912_v63 = vld [vmem:[#allocation2 + $0x10] sm:$0xff] }
  0xcf   :  { %7232 = vmatpush1.bf16.msk.msra.mxu1 %vm7231_vm15, %v8082_v13  ;;  %vm9386_vm9 = vmpackc.low %vm933_vm0, %vm899_vm8  ;;  %3895 = vmatprep.mubr.f32.mxu1 %v9171_v42  ;;  %vm357_vm8 = vcmp.eq.s32.totalorder %v8153_v11, %v9300_v5  ;;  %vm391_vm0 = vcmp.eq.s32.totalorder %v8156_v12, %v9300_v5  ;;  %vm356_vm15 = vcmp.eq.s32.totalorder %v8153_v11, %v9316_v31 }
  0xd0   :  { %7200 = vmatpush1.bf16.msk.msra.mxu0 %vm9343_vm5, %v8082_v13  ;;  %vm898_vm5 = vcmp.eq.s32.totalorder %v8308_v32, %v9084_v10  ;;  %vm7233_vm6 = vmpackc.low %vm323_vm7, %vm289_vm3  ;;  %vm390_vm3 = vcmp.eq.s32.totalorder %v8156_v12, %v9316_v31  ;;  %v9948_v62 = vrot.slane %v9912_v63, %v8126_v2  ;;  %v9980_v9 = vrot.slane %v9912_v63, %v8129_v3 }
  0xd1   :  { %7202 = vmatprep.subr.msk.bf16.mxu0 %vm9353_vm13, %v8082_v13  ;;  %7234 = vmatprep.subr.msk.bf16.mxu1 %vm7233_vm6, %v8082_v13  ;;  %vm7235_vm13 = vmpackc.low %vm322_vm2, %vm288_vm11  ;;  %vm966_vm11 = vcmp.eq.s32.totalorder %v8340_v36, %v9084_v10  ;;  %vm1035_vm2 = vcmp.eq.s32.totalorder %v8381_v40, %v9052_v0  ;;  %v10230_v8 = vrot.slane %v9912_v63, %v8272_v27 }
  0xd2   :  { %vm7207_vm14 = vmpackc.low %vm932_vm10, %vm898_vm5  ;;  %vm1069_vm5 = vcmp.eq.s32.totalorder %v8384_v41, %v9052_v0  ;;  %v10448_v30 = vrot.slane %v9912_v63, %v8559_v57 }
  0xd3   :  { %7236 = vmatpush1.bf16.msk.msra.mxu1 %vm7235_vm13, %v8082_v13  ;;  %vm7209_vm7 = vmpackc.low %vm1001_vm12, %vm967_vm4  ;;  %vm459_vm4 = vcmp.eq.s32.totalorder %v8185_v15, %v9300_v5  ;;  %vm424_vm13 = vcmp.eq.s32.totalorder %v8182_v14, %v9316_v31 }
  0xd4   :  { %7204 = vmatpush1.bf16.msk.msra.mxu0 %vm9374_vm1, %v8082_v13  ;;  %vm1000_vm1 = vcmp.eq.s32.totalorder %v8343_v37, %v9084_v10  ;;  %vm7237_vm10 = vmpackc.low %vm391_vm0, %vm357_vm8  ;;  %vm458_vm8 = vcmp.eq.s32.totalorder %v8185_v15, %v9316_v31 }
  0xd5   :  { %7206 = vmatprep.subr.msk.bf16.mxu0 %vm9386_vm9, %v8082_v13  ;;  %7238 = vmatprep.subr.msk.bf16.mxu1 %vm7237_vm10, %v8082_v13  ;;  %vm7239_vm6 = vmpackc.low %vm390_vm3, %vm356_vm15  ;;  %vm425_vm9 = vcmp.eq.s32.totalorder %v8182_v14, %v9300_v5  ;;  %vm1034_vm15 = vcmp.eq.s32.totalorder %v8381_v40, %v9084_v10  ;;  %vm1068_vm3 = vcmp.eq.s32.totalorder %v8384_v41, %v9084_v10 }
  0xd6   :  { %vm7211_vm12 = vmpackc.low %vm1000_vm1, %vm966_vm11  ;;  %vm1137_vm11 = vcmp.eq.s32.totalorder %v8428_v45, %v9052_v0 }
  0xd7   :  { %7240 = vmatpush1.bf16.msk.msra.mxu1 %vm7239_vm6, %v8082_v13  ;;  %vm7213_vm0 = vmpackc.low %vm1069_vm5, %vm1035_vm2  ;;  %vm527_vm2 = vcmp.eq.s32.totalorder %v8201_v17, %v9300_v5  ;;  %vm492_vm6 = vcmp.eq.s32.totalorder %v8198_v16, %v9316_v31 }
  0xd8   :  { %7208 = vmatpush1.bf16.msk.msra.mxu0 %vm7207_vm14, %v8082_v13  ;;  %vm1103_vm14 = vcmp.eq.s32.totalorder %v8425_v44, %v9052_v0  ;;  %vm7241_vm1 = vmpackc.low %vm459_vm4, %vm425_vm9  ;;  %vm526_vm9 = vcmp.eq.s32.totalorder %v8201_v17, %v9316_v31 }
  0xd9   :  { %7210 = vmatprep.subr.msk.bf16.mxu0 %vm7209_vm7, %v8082_v13  ;;  %7242 = vmatprep.subr.msk.bf16.mxu1 %vm7241_vm1, %v8082_v13  ;;  %vm7243_vm10 = vmpackc.low %vm458_vm8, %vm424_vm13  ;;  %vm493_vm7 = vcmp.eq.s32.totalorder %v8198_v16, %v9300_v5  ;;  %vm1102_vm13 = vcmp.eq.s32.totalorder %v8425_v44, %v9084_v10  ;;  %vm1136_vm8 = vcmp.eq.s32.totalorder %v8428_v45, %v9084_v10 }
  0xda   :  { %vm7215_vm5 = vmpackc.low %vm1068_vm3, %vm1034_vm15  ;;  %vm1205_vm15 = vcmp.eq.s32.totalorder %v8472_v49, %v9052_v0 }
  0xdb   :  { %7244 = vmatpush1.bf16.msk.msra.mxu1 %vm7243_vm10, %v8082_v13  ;;  %vm7217_vm4 = vmpackc.low %vm1137_vm11, %vm1103_vm14  ;;  %vm595_vm14 = vcmp.eq.s32.totalorder %v8217_v19, %v9300_v5  ;;  %vm560_vm10 = vcmp.eq.s32.totalorder %v8214_v18, %v9316_v31 }
  0xdc   :  { %7212 = vmatpush1.bf16.msk.msra.mxu0 %vm7211_vm12, %v8082_v13  ;;  %vm1171_vm12 = vcmp.eq.s32.totalorder %v8469_v48, %v9052_v0  ;;  %vm7245_vm3 = vmpackc.low %vm527_vm2, %vm493_vm7  ;;  %vm594_vm7 = vcmp.eq.s32.totalorder %v8217_v19, %v9316_v31 }
  0xdd   :  { %7214 = vmatprep.subr.msk.bf16.mxu0 %vm7213_vm0, %v8082_v13  ;;  %7246 = vmatprep.subr.msk.bf16.mxu1 %vm7245_vm3, %v8082_v13  ;;  %vm7247_vm1 = vmpackc.low %vm526_vm9, %vm492_vm6  ;;  %vm561_vm0 = vcmp.eq.s32.totalorder %v8214_v18, %v9300_v5  ;;  %vm1204_vm6 = vcmp.eq.s32.totalorder %v8472_v49, %v9084_v10  ;;  %vm1239_vm9 = vcmp.eq.s32.totalorder %v8509_v52, %v9052_v0 }
  0xde   :  { %vm9469_vm11 = vmpackc.low %vm1136_vm8, %vm1102_vm13  ;;  %vm1273_vm13 = vcmp.eq.s32.totalorder %v8516_v53, %v9052_v0  ;;  %v11023_v0 = vld [vmem:[#allocation5 + $0x8] sm:$0xff] }
  0xdf   :  { %7248 = vmatpush1.bf16.msk.msra.mxu1 %vm7247_vm1, %v8082_v13  ;;  %vm9479_vm2 = vmpackc.low %vm1205_vm15, %vm1171_vm12  ;;  %vm629_vm12 = vcmp.eq.s32.totalorder %v8230_v20, %v9300_v5  ;;  %vm663_vm15 = vcmp.eq.s32.totalorder %v8233_v21, %v9300_v5  ;;  %vm628_vm1 = vcmp.eq.s32.totalorder %v8230_v20, %v9316_v31 }
  0xe0   :  { %7216 = vmatpush1.bf16.msk.msra.mxu0 %vm7215_vm5, %v8082_v13  ;;  %vm1170_vm5 = vcmp.eq.s32.totalorder %v8469_v48, %v9084_v10  ;;  %vm7251_vm8 = vmpackc.low %vm594_vm7, %vm560_vm10  ;;  %vm1272_vm10 = vcmp.eq.s32.totalorder %v8516_v53, %v9084_v10  ;;  %vm223_vm7 = vcmp.eq.s32.totalorder %v8123_v1, %v9493_v60 }
  0xe1   :  { %7218 = vmatprep.subr.msk.bf16.mxu0 %vm7217_vm4, %v8082_v13  ;;  %vm7249_vm4 = vmpackc.low %vm595_vm14, %vm561_vm0  ;;  %vm662_vm0 = vcmp.eq.s32.totalorder %v8233_v21, %v9316_v31 }
  0xe2   :  { %7250 = vmatprep.subr.msk.bf16.mxu1 %vm7249_vm4, %v8082_v13  ;;  %vm9503_vm3 = vmpackc.low %vm1204_vm6, %vm1170_vm5 }
  0xe3   :  { %7252 = vmatpush1.bf16.msk.msra.mxu1 %vm7251_vm8, %v8082_v13  ;;  %vm9515_vm14 = vmpackc.low %vm1273_vm13, %vm1239_vm9  ;;  %vm697_vm9 = vcmp.eq.s32.totalorder %v8246_v22, %v9300_v5  ;;  %vm731_vm13 = vcmp.eq.s32.totalorder %v8249_v23, %v9300_v5  ;;  %vm696_vm8 = vcmp.eq.s32.totalorder %v8246_v22, %v9316_v31 }
  0xe4   :  { %7220 = vmatpush1.bf16.msk.msra.mxu0 %vm9469_vm11, %v8082_v13  ;;  %vm1238_vm11 = vcmp.eq.s32.totalorder %v8509_v52, %v9084_v10  ;;  %vm7253_vm5 = vmpackc.low %vm663_vm15, %vm629_vm12  ;;  %vm730_vm12 = vcmp.eq.s32.totalorder %v8249_v23, %v9316_v31 }
  0xe5   :  { %7222 = vmatprep.subr.msk.bf16.mxu0 %vm9479_vm2, %v8082_v13  ;;  %vm257_vm2 = vcmp.eq.s32.totalorder %v8132_v4, %v9493_v60  ;;  %7254 = vmatprep.subr.msk.bf16.mxu1 %vm7253_vm5, %v8082_v13  ;;  %vm7255_vm6 = vmpackc.low %vm662_vm0, %vm628_vm1  ;;  %vm222_vm1 = vcmp.eq.s32.totalorder %v8123_v1, %v9525_v58  ;;  %vm291_vm0 = vcmp.eq.s32.totalorder %v8137_v6, %v9493_v60 }
  0xe6   :  { %vm7227_vm4 = vmpackc.low %vm1272_vm10, %vm1238_vm11  ;;  %vm325_vm11 = vcmp.eq.s32.totalorder %v8140_v7, %v9493_v60 }
  0xe7   :  { %7256 = vmatpush1.bf16.msk.msra.mxu1 %vm7255_vm6, %v8082_v13  ;;  %vm7293_vm15 = vmpackc.low %vm257_vm2, %vm223_vm7  ;;  %vm799_vm7 = vcmp.eq.s32.totalorder %v8265_v25, %v9300_v5  ;;  %vm764_vm6 = vcmp.eq.s32.totalorder %v8258_v24, %v9316_v31 }
  0xe8   :  { %7224 = vmatpush1.bf16.msk.msra.mxu0 %vm9503_vm3, %v8082_v13  ;;  %vm256_vm3 = vcmp.eq.s32.totalorder %v8132_v4, %v9525_v58  ;;  %vm7257_vm10 = vmpackc.low %vm731_vm13, %vm697_vm9  ;;  %vm798_vm9 = vcmp.eq.s32.totalorder %v8265_v25, %v9316_v31 }
  0xe9   :  { %7226 = vmatprep.subr.msk.bf16.mxu0 %vm9515_vm14, %v8082_v13  ;;  %7258 = vmatprep.subr.msk.bf16.mxu1 %vm7257_vm10, %v8082_v13  ;;  %vm7259_vm5 = vmpackc.low %vm730_vm12, %vm696_vm8  ;;  %vm765_vm14 = vcmp.eq.s32.totalorder %v8258_v24, %v9300_v5  ;;  %vm324_vm8 = vcmp.eq.s32.totalorder %v8140_v7, %v9525_v58  ;;  %vm359_vm12 = vcmp.eq.s32.totalorder %v8153_v11, %v9493_v60 }
  0xea   :  { %vm9561_vm2 = vmpackc.low %vm256_vm3, %vm222_vm1  ;;  %vm393_vm1 = vcmp.eq.s32.totalorder %v8156_v12, %v9493_v60 }
  0xeb   :  { %7260 = vmatpush1.bf16.msk.msra.mxu1 %vm7259_vm5, %v8082_v13  ;;  %vm9571_vm13 = vmpackc.low %vm325_vm11, %vm291_vm0  ;;  %vm833_vm0 = vcmp.eq.s32.totalorder %v8280_v28, %v9300_v5  ;;  %vm867_vm11 = vcmp.eq.s32.totalorder %v8283_v29, %v9300_v5  ;;  %vm832_vm5 = vcmp.eq.s32.totalorder %v8280_v28, %v9316_v31 }
  0xec   :  { %7228 = vmatpush1.bf16.msk.msra.mxu0 %vm7227_vm4, %v8082_v13  ;;  %vm290_vm4 = vcmp.eq.s32.totalorder %v8137_v6, %v9525_v58  ;;  %vm7261_vm3 = vmpackc.low %vm799_vm7, %vm765_vm14  ;;  %vm866_vm14 = vcmp.eq.s32.totalorder %v8283_v29, %v9316_v31 }
  0xed   :  { %7294 = vmatprep.subr.msk.bf16.mxu0 %vm7293_vm15, %v8082_v13  ;;  %7262 = vmatprep.subr.msk.bf16.mxu1 %vm7261_vm3, %v8082_v13  ;;  %vm7263_vm15 = vmpackc.low %vm798_vm9, %vm764_vm6  ;;  %vm392_vm6 = vcmp.eq.s32.totalorder %v8156_v12, %v9525_v58  ;;  %vm427_vm9 = vcmp.eq.s32.totalorder %v8182_v14, %v9493_v60 }
  0xee   :  { %vm9594_vm10 = vmpackc.low %vm324_vm8, %vm290_vm4 }
  0xef   :  { %3825 = vmatmul.mubr.f32.vlgmr.msra.gmra.mrb[4].mxu0 %v9583_v61  ;;  %7264 = vmatpush1.bf16.msk.msra.mxu1 %vm7263_vm15, %v8082_v13  ;;  %vm9609_vm7 = vmpackc.low %vm393_vm1, %vm359_vm12  ;;  %vm901_vm12 = vcmp.eq.s32.totalorder %v8308_v32, %v9300_v5  ;;  %vm935_vm1 = vcmp.eq.s32.totalorder %v8311_v33, %v9300_v5  ;;  %vm900_vm15 = vcmp.eq.s32.totalorder %v8308_v32, %v9316_v31 }
  0xf0   :  { %7296 = vmatpush1.bf16.msk.msra.mxu0 %vm9561_vm2, %v8082_v13  ;;  %vm358_vm2 = vcmp.eq.s32.totalorder %v8153_v11, %v9525_v58  ;;  %3966 = vmatprep.mubr.f32.mxu0 %v9171_v42  ;;  %vm7265_vm4 = vmpackc.low %vm867_vm11, %vm833_vm0  ;;  %vm934_vm0 = vcmp.eq.s32.totalorder %v8311_v33, %v9316_v31 }
  0xf1   :  { %7298 = vmatprep.subr.msk.bf16.mxu0 %vm9571_vm13, %v8082_v13  ;;  %vm461_vm13 = vcmp.eq.s32.totalorder %v8185_v15, %v9493_v60  ;;  %7266 = vmatprep.subr.msk.bf16.mxu1 %vm7265_vm4, %v8082_v13  ;;  %vm7267_vm8 = vmpackc.low %vm866_vm14, %vm832_vm5  ;;  %vm426_vm5 = vcmp.eq.s32.totalorder %v8182_v14, %v9525_v58  ;;  %vm495_vm14 = vcmp.eq.s32.totalorder %v8198_v16, %v9493_v60 }
  0xf2   :  { %vm7303_vm3 = vmpackc.low %vm392_vm6, %vm358_vm2  ;;  %vm529_vm2 = vcmp.eq.s32.totalorder %v8201_v17, %v9493_v60 }
  0xf3   :  { %7268 = vmatpush1.bf16.msk.msra.mxu1 %vm7267_vm8, %v8082_v13  ;;  %vm7305_vm11 = vmpackc.low %vm461_vm13, %vm427_vm9  ;;  %vm1003_vm9 = vcmp.eq.s32.totalorder %v8343_v37, %v9300_v5  ;;  %vm968_vm8 = vcmp.eq.s32.totalorder %v8340_v36, %v9316_v31 }
  0xf4   :  { %7300 = vmatpush1.bf16.msk.msra.mxu0 %vm9594_vm10, %v8082_v13  ;;  %vm460_vm10 = vcmp.eq.s32.totalorder %v8185_v15, %v9525_v58  ;;  %vm7269_vm6 = vmpackc.low %vm935_vm1, %vm901_vm12  ;;  %vm1002_vm12 = vcmp.eq.s32.totalorder %v8343_v37, %v9316_v31 }
  0xf5   :  { %7302 = vmatprep.subr.msk.bf16.mxu0 %vm9609_vm7, %v8082_v13  ;;  %7270 = vmatprep.subr.msk.bf16.mxu1 %vm7269_vm6, %v8082_v13  ;;  %vm7271_vm4 = vmpackc.low %vm934_vm0, %vm900_vm15  ;;  %vm969_vm7 = vcmp.eq.s32.totalorder %v8340_v36, %v9300_v5  ;;  %vm494_vm15 = vcmp.eq.s32.totalorder %v8198_v16, %v9525_v58  ;;  %vm528_vm0 = vcmp.eq.s32.totalorder %v8201_v17, %v9525_v58 }
  0xf6   :  { %vm7307_vm13 = vmpackc.low %vm460_vm10, %vm426_vm5  ;;  %vm597_vm5 = vcmp.eq.s32.totalorder %v8217_v19, %v9493_v60 }
  0xf7   :  { %7272 = vmatpush1.bf16.msk.msra.mxu1 %vm7271_vm4, %v8082_v13  ;;  %vm7309_vm1 = vmpackc.low %vm529_vm2, %vm495_vm14  ;;  %vm1071_vm14 = vcmp.eq.s32.totalorder %v8384_v41, %v9300_v5  ;;  %vm1036_vm4 = vcmp.eq.s32.totalorder %v8381_v40, %v9316_v31 }
  0xf8   :  { %7304 = vmatpush1.bf16.msk.msra.mxu0 %vm7303_vm3, %v8082_v13  ;;  %vm563_vm3 = vcmp.eq.s32.totalorder %v8214_v18, %v9493_v60  ;;  %vm7273_vm10 = vmpackc.low %vm1003_vm9, %vm969_vm7  ;;  %vm1070_vm7 = vcmp.eq.s32.totalorder %v8384_v41, %v9316_v31 }
  0xf9   :  { %7306 = vmatprep.subr.msk.bf16.mxu0 %vm7305_vm11, %v8082_v13  ;;  %7274 = vmatprep.subr.msk.bf16.mxu1 %vm7273_vm10, %v8082_v13  ;;  %vm7275_vm6 = vmpackc.low %vm1002_vm12, %vm968_vm8  ;;  %vm1037_vm11 = vcmp.eq.s32.totalorder %v8381_v40, %v9300_v5  ;;  %vm562_vm8 = vcmp.eq.s32.totalorder %v8214_v18, %v9525_v58  ;;  %vm596_vm12 = vcmp.eq.s32.totalorder %v8217_v19, %v9525_v58 }
  0xfa   :  { %vm7311_vm2 = vmpackc.low %vm528_vm0, %vm494_vm15  ;;  %vm665_vm15 = vcmp.eq.s32.totalorder %v8233_v21, %v9493_v60 }
  0xfb   :  { %7276 = vmatpush1.bf16.msk.msra.mxu1 %vm7275_vm6, %v8082_v13  ;;  %vm7313_vm9 = vmpackc.low %vm597_vm5, %vm563_vm3  ;;  %vm1139_vm3 = vcmp.eq.s32.totalorder %v8428_v45, %v9300_v5  ;;  %vm1104_vm6 = vcmp.eq.s32.totalorder %v8425_v44, %v9316_v31 }
  0xfc   :  { %7308 = vmatpush1.bf16.msk.msra.mxu0 %vm7307_vm13, %v8082_v13  ;;  %vm631_vm13 = vcmp.eq.s32.totalorder %v8230_v20, %v9493_v60  ;;  %vm7277_vm0 = vmpackc.low %vm1071_vm14, %vm1037_vm11  ;;  %vm1138_vm11 = vcmp.eq.s32.totalorder %v8428_v45, %v9316_v31 }
  0xfd   :  { %7310 = vmatprep.subr.msk.bf16.mxu0 %vm7309_vm1, %v8082_v13  ;;  %7278 = vmatprep.subr.msk.bf16.mxu1 %vm7277_vm0, %v8082_v13  ;;  %vm7279_vm10 = vmpackc.low %vm1070_vm7, %vm1036_vm4  ;;  %vm1105_vm1 = vcmp.eq.s32.totalorder %v8425_v44, %v9300_v5  ;;  %vm630_vm4 = vcmp.eq.s32.totalorder %v8230_v20, %v9525_v58  ;;  %vm664_vm7 = vcmp.eq.s32.totalorder %v8233_v21, %v9525_v58 }
  0xfe   :  { %vm7315_vm5 = vmpackc.low %vm596_vm12, %vm562_vm8  ;;  %vm733_vm8 = vcmp.eq.s32.totalorder %v8249_v23, %v9493_v60 }
  0xff   :  { %7280 = vmatpush1.bf16.msk.msra.mxu1 %vm7279_vm10, %v8082_v13  ;;  %vm7317_vm14 = vmpackc.low %vm665_vm15, %vm631_vm13  ;;  %vm1207_vm13 = vcmp.eq.s32.totalorder %v8472_v49, %v9300_v5  ;;  %vm1172_vm10 = vcmp.eq.s32.totalorder %v8469_v48, %v9316_v31 }
 0x100   :  { %7312 = vmatpush1.bf16.msk.msra.mxu0 %vm7311_vm2, %v8082_v13  ;;  %vm699_vm2 = vcmp.eq.s32.totalorder %v8246_v22, %v9493_v60  ;;  %vm7281_vm12 = vmpackc.low %vm1139_vm3, %vm1105_vm1  ;;  %vm1206_vm1 = vcmp.eq.s32.totalorder %v8472_v49, %v9316_v31 }
 0x101   :  { %7314 = vmatprep.subr.msk.bf16.mxu0 %vm7313_vm9, %v8082_v13  ;;  %7282 = vmatprep.subr.msk.bf16.mxu1 %vm7281_vm12, %v8082_v13  ;;  %vm7283_vm0 = vmpackc.low %vm1138_vm11, %vm1104_vm6  ;;  %vm1173_vm9 = vcmp.eq.s32.totalorder %v8469_v48, %v9300_v5  ;;  %vm732_vm6 = vcmp.eq.s32.totalorder %v8249_v23, %v9525_v58  ;;  %vm767_vm11 = vcmp.eq.s32.totalorder %v8258_v24, %v9493_v60 }
 0x102   :  { %vm9712_vm15 = vmpackc.low %vm664_vm7, %vm630_vm4  ;;  %vm801_vm4 = vcmp.eq.s32.totalorder %v8265_v25, %v9493_v60 }
 0x103   :  { %7284 = vmatpush1.bf16.msk.msra.mxu1 %vm7283_vm0, %v8082_v13  ;;  %vm9722_vm3 = vmpackc.low %vm733_vm8, %vm699_vm2  ;;  %vm1241_vm2 = vcmp.eq.s32.totalorder %v8509_v52, %v9300_v5  ;;  %vm1275_vm8 = vcmp.eq.s32.totalorder %v8516_v53, %v9300_v5  ;;  %vm1240_vm0 = vcmp.eq.s32.totalorder %v8509_v52, %v9316_v31 }
 0x104   :  { %7316 = vmatpush1.bf16.msk.msra.mxu0 %vm7315_vm5, %v8082_v13  ;;  %vm698_vm5 = vcmp.eq.s32.totalorder %v8246_v22, %v9525_v58  ;;  %vm7285_vm7 = vmpackc.low %vm1207_vm13, %vm1173_vm9  ;;  %vm1274_vm9 = vcmp.eq.s32.totalorder %v8516_v53, %v9316_v31 }
 0x105   :  { %7318 = vmatprep.subr.msk.bf16.mxu0 %vm7317_vm14, %v8082_v13  ;;  %7286 = vmatprep.subr.msk.bf16.mxu1 %vm7285_vm7, %v8082_v13  ;;  %vm7287_vm14 = vmpackc.low %vm1206_vm1, %vm1172_vm10  ;;  %vm800_vm10 = vcmp.eq.s32.totalorder %v8265_v25, %v9525_v58  ;;  %vm835_vm1 = vcmp.eq.s32.totalorder %v8280_v28, %v9493_v60 }
 0x106   :  { %vm9746_vm12 = vmpackc.low %vm732_vm6, %vm698_vm5  ;;  %vm869_vm5 = vcmp.eq.s32.totalorder %v8283_v29, %v9493_v60 }
 0x107   :  { %7288 = vmatpush1.bf16.msk.msra.mxu1 %vm7287_vm14, %v8082_v13  ;;  %vm7325_vm13 = vmpackc.low %vm801_vm4, %vm767_vm11  ;;  %vm225_vm11 = vcmp.eq.s32.totalorder %v8123_v1, %v9741_v50  ;;  %vm259_vm4 = vcmp.eq.s32.totalorder %v8132_v4, %v9741_v50  ;;  %vm224_vm14 = vcmp.eq.s32.totalorder %v8123_v1, %v9757_v51 }
 0x108   :  { %7320 = vmatpush1.bf16.msk.msra.mxu0 %vm9712_vm15, %v8082_v13  ;;  %vm766_vm15 = vcmp.eq.s32.totalorder %v8258_v24, %v9525_v58  ;;  %vm7291_vm6 = vmpackc.low %vm1274_vm9, %vm1240_vm0  ;;  %vm868_vm0 = vcmp.eq.s32.totalorder %v8283_v29, %v9525_v58  ;;  %vm903_vm9 = vcmp.eq.s32.totalorder %v8308_v32, %v9493_v60 }
 0x109   :  { %7322 = vmatprep.subr.msk.bf16.mxu0 %vm9722_vm3, %v8082_v13  ;;  %vm7289_vm3 = vmpackc.low %vm1275_vm8, %vm1241_vm2  ;;  %vm258_vm2 = vcmp.eq.s32.totalorder %v8132_v4, %v9757_v51 }
 0x10a   :  { %7290 = vmatprep.subr.msk.bf16.mxu1 %vm7289_vm3, %v8082_v13  ;;  %vm9784_vm7 = vmpackc.low %vm800_vm10, %vm766_vm15  ;;  %vm937_vm15 = vcmp.eq.s32.totalorder %v8311_v33, %v9493_v60 }
 0x10b   :  { %7292 = vmatpush1.bf16.msk.msra.mxu1 %vm7291_vm6, %v8082_v13  ;;  %vm9794_vm8 = vmpackc.low %vm869_vm5, %vm835_vm1  ;;  %vm293_vm1 = vcmp.eq.s32.totalorder %v8137_v6, %v9741_v50  ;;  %vm327_vm5 = vcmp.eq.s32.totalorder %v8140_v7, %v9741_v50  ;;  %vm292_vm6 = vcmp.eq.s32.totalorder %v8137_v6, %v9757_v51 }
 0x10c   :  { %7324 = vmatpush1.bf16.msk.msra.mxu0 %vm9746_vm12, %v8082_v13  ;;  %vm834_vm12 = vcmp.eq.s32.totalorder %v8280_v28, %v9525_v58  ;;  %vm7357_vm10 = vmpackc.low %vm259_vm4, %vm225_vm11  ;;  %vm326_vm11 = vcmp.eq.s32.totalorder %v8140_v7, %v9757_v51 }
 0x10d   :  { %7326 = vmatprep.subr.msk.bf16.mxu0 %vm7325_vm13, %v8082_v13  ;;  %7358 = vmatprep.subr.msk.bf16.mxu1 %vm7357_vm10, %v8082_v13  ;;  %vm7359_vm13 = vmpackc.low %vm258_vm2, %vm224_vm14  ;;  %vm936_vm14 = vcmp.eq.s32.totalorder %v8311_v33, %v9525_v58  ;;  %vm971_vm2 = vcmp.eq.s32.totalorder %v8340_v36, %v9493_v60 }
 0x10e   :  { %3896 = vmatmul.mubr.f32.vlgmr.msra.gmra.mrb[4].mxu1 %v9583_v61  ;;  %vm9815_vm3 = vmpackc.low %vm868_vm0, %vm834_vm12  ;;  %vm1005_vm12 = vcmp.eq.s32.totalorder %v8343_v37, %v9493_v60 }
 0x10f   :  { %7360 = vmatpush1.bf16.msk.msra.mxu1 %vm7359_vm13, %v8082_v13  ;;  %vm9827_vm4 = vmpackc.low %vm937_vm15, %vm903_vm9  ;;  %4037 = vmatprep.mubr.f32.mxu1 %v9171_v42  ;;  %vm361_vm9 = vcmp.eq.s32.totalorder %v8153_v11, %v9741_v50  ;;  %vm395_vm15 = vcmp.eq.s32.totalorder %v8156_v12, %v9741_v50  ;;  %vm360_vm13 = vcmp.eq.s32.totalorder %v8153_v11, %v9757_v51 }
 0x110   :  { %7328 = vmatpush1.bf16.msk.msra.mxu0 %vm9784_vm7, %v8082_v13  ;;  %vm902_vm7 = vcmp.eq.s32.totalorder %v8308_v32, %v9525_v58  ;;  %vm7361_vm0 = vmpackc.low %vm327_vm5, %vm293_vm1  ;;  %vm394_vm1 = vcmp.eq.s32.totalorder %v8156_v12, %v9757_v51  ;;  %v10214_v42 = vrot.slane %v9912_v63, %v8268_v26 }
 0x111   :  { %7330 = vmatprep.subr.msk.bf16.mxu0 %vm9794_vm8, %v8082_v13  ;;  %7362 = vmatprep.subr.msk.bf16.mxu1 %vm7361_vm0, %v8082_v13  ;;  %vm7363_vm8 = vmpackc.low %vm326_vm11, %vm292_vm6  ;;  %vm970_vm6 = vcmp.eq.s32.totalorder %v8340_v36, %v9525_v58  ;;  %vm1039_vm11 = vcmp.eq.s32.totalorder %v8381_v40, %v9493_v60 }
 0x112   :  { %vm7335_vm10 = vmpackc.low %vm936_vm14, %vm902_vm7  ;;  %vm1073_vm7 = vcmp.eq.s32.totalorder %v8384_v41, %v9493_v60 }
 0x113   :  { %7364 = vmatpush1.bf16.msk.msra.mxu1 %vm7363_vm8, %v8082_v13  ;;  %vm7337_vm5 = vmpackc.low %vm1005_vm12, %vm971_vm2  ;;  %vm463_vm2 = vcmp.eq.s32.totalorder %v8185_v15, %v9741_v50  ;;  %vm428_vm8 = vcmp.eq.s32.totalorder %v8182_v14, %v9757_v51 }
 0x114   :  { %7332 = vmatpush1.bf16.msk.msra.mxu0 %vm9815_vm3, %v8082_v13  ;;  %vm1004_vm3 = vcmp.eq.s32.totalorder %v8343_v37, %v9525_v58  ;;  %vm7365_vm14 = vmpackc.low %vm395_vm15, %vm361_vm9  ;;  %vm462_vm9 = vcmp.eq.s32.totalorder %v8185_v15, %v9757_v51 }
 0x115   :  { %7334 = vmatprep.subr.msk.bf16.mxu0 %vm9827_vm4, %v8082_v13  ;;  %7366 = vmatprep.subr.msk.bf16.mxu1 %vm7365_vm14, %v8082_v13  ;;  %vm7367_vm0 = vmpackc.low %vm394_vm1, %vm360_vm13  ;;  %vm429_vm4 = vcmp.eq.s32.totalorder %v8182_v14, %v9741_v50  ;;  %vm1038_vm13 = vcmp.eq.s32.totalorder %v8381_v40, %v9525_v58  ;;  %vm1072_vm1 = vcmp.eq.s32.totalorder %v8384_v41, %v9525_v58 }
 0x116   :  { %vm7339_vm12 = vmpackc.low %vm1004_vm3, %vm970_vm6  ;;  %vm1141_vm6 = vcmp.eq.s32.totalorder %v8428_v45, %v9493_v60 }
 0x117   :  { %7368 = vmatpush1.bf16.msk.msra.mxu1 %vm7367_vm0, %v8082_v13  ;;  %vm7341_vm15 = vmpackc.low %vm1073_vm7, %vm1039_vm11  ;;  %vm531_vm11 = vcmp.eq.s32.totalorder %v8201_v17, %v9741_v50  ;;  %vm496_vm0 = vcmp.eq.s32.totalorder %v8198_v16, %v9757_v51 }
 0x118   :  { %7336 = vmatpush1.bf16.msk.msra.mxu0 %vm7335_vm10, %v8082_v13  ;;  %vm1107_vm10 = vcmp.eq.s32.totalorder %v8425_v44, %v9493_v60  ;;  %vm7369_vm3 = vmpackc.low %vm463_vm2, %vm429_vm4  ;;  %vm530_vm4 = vcmp.eq.s32.totalorder %v8201_v17, %v9757_v51 }
 0x119   :  { %7338 = vmatprep.subr.msk.bf16.mxu0 %vm7337_vm5, %v8082_v13  ;;  %7370 = vmatprep.subr.msk.bf16.mxu1 %vm7369_vm3, %v8082_v13  ;;  %vm7371_vm14 = vmpackc.low %vm462_vm9, %vm428_vm8  ;;  %vm497_vm5 = vcmp.eq.s32.totalorder %v8198_v16, %v9741_v50  ;;  %vm1140_vm8 = vcmp.eq.s32.totalorder %v8428_v45, %v9525_v58  ;;  %vm1175_vm9 = vcmp.eq.s32.totalorder %v8469_v48, %v9493_v60 }
 0x11a   :  { %vm9890_vm7 = vmpackc.low %vm1072_vm1, %vm1038_vm13  ;;  %vm1209_vm13 = vcmp.eq.s32.totalorder %v8472_v49, %v9493_v60 }
 0x11b   :  { %7372 = vmatpush1.bf16.msk.msra.mxu1 %vm7371_vm14, %v8082_v13  ;;  %vm9900_vm2 = vmpackc.low %vm1141_vm6, %vm1107_vm10  ;;  %vm565_vm10 = vcmp.eq.s32.totalorder %v8214_v18, %v9741_v50  ;;  %vm599_vm6 = vcmp.eq.s32.totalorder %v8217_v19, %v9741_v50  ;;  %vm564_vm14 = vcmp.eq.s32.totalorder %v8214_v18, %v9757_v51 }
 0x11c   :  { %7340 = vmatpush1.bf16.msk.msra.mxu0 %vm7339_vm12, %v8082_v13  ;;  %vm1106_vm12 = vcmp.eq.s32.totalorder %v8425_v44, %v9525_v58  ;;  %vm7373_vm1 = vmpackc.low %vm531_vm11, %vm497_vm5  ;;  %vm598_vm5 = vcmp.eq.s32.totalorder %v8217_v19, %v9757_v51 }
 0x11d   :  { %7342 = vmatprep.subr.msk.bf16.mxu0 %vm7341_vm15, %v8082_v13  ;;  %7374 = vmatprep.subr.msk.bf16.mxu1 %vm7373_vm1, %v8082_v13  ;;  %vm7375_vm15 = vmpackc.low %vm530_vm4, %vm496_vm0  ;;  %vm1208_vm0 = vcmp.eq.s32.totalorder %v8472_v49, %v9525_v58  ;;  %vm1243_vm4 = vcmp.eq.s32.totalorder %v8509_v52, %v9493_v60 }
 0x11e   :  { %vm9922_vm3 = vmpackc.low %vm1140_vm8, %vm1106_vm12  ;;  %vm1277_vm12 = vcmp.eq.s32.totalorder %v8516_v53, %v9493_v60  ;;  %v10685_v60 = vrot.slane %v9912_v63, %v8800_v39 }
 0x11f   :  { %7376 = vmatpush1.bf16.msk.msra.mxu1 %vm7375_vm15, %v8082_v13  ;;  %vm9934_vm11 = vmpackc.low %vm1209_vm13, %vm1175_vm9  ;;  %vm633_vm9 = vcmp.eq.s32.totalorder %v8230_v20, %v9741_v50  ;;  %vm667_vm13 = vcmp.eq.s32.totalorder %v8233_v21, %v9741_v50  ;;  %vm632_vm15 = vcmp.eq.s32.totalorder %v8230_v20, %v9757_v51 }
 0x120   :  { %7344 = vmatpush1.bf16.msk.msra.mxu0 %vm9890_vm7, %v8082_v13  ;;  %vm1174_vm7 = vcmp.eq.s32.totalorder %v8469_v48, %v9525_v58  ;;  %vm7379_vm8 = vmpackc.low %vm598_vm5, %vm564_vm14  ;;  %vm1276_vm14 = vcmp.eq.s32.totalorder %v8516_v53, %v9525_v58  ;;  %vm227_vm5 = vcmp.eq.s32.totalorder %v8123_v1, %v9948_v62 }
 0x121   :  { %7346 = vmatprep.subr.msk.bf16.mxu0 %vm9900_vm2, %v8082_v13  ;;  %vm7377_vm2 = vmpackc.low %vm599_vm6, %vm565_vm10  ;;  %vm666_vm10 = vcmp.eq.s32.totalorder %v8233_v21, %v9757_v51 }
 0x122   :  { %7378 = vmatprep.subr.msk.bf16.mxu1 %vm7377_vm2, %v8082_v13  ;;  %vm9958_vm1 = vmpackc.low %vm1208_vm0, %vm1174_vm7 }
 0x123   :  { %7380 = vmatpush1.bf16.msk.msra.mxu1 %vm7379_vm8, %v8082_v13  ;;  %vm9970_vm6 = vmpackc.low %vm1277_vm12, %vm1243_vm4  ;;  %vm701_vm4 = vcmp.eq.s32.totalorder %v8246_v22, %v9741_v50  ;;  %vm735_vm12 = vcmp.eq.s32.totalorder %v8249_v23, %v9741_v50  ;;  %vm700_vm8 = vcmp.eq.s32.totalorder %v8246_v22, %v9757_v51 }
 0x124   :  { %7348 = vmatpush1.bf16.msk.msra.mxu0 %vm9922_vm3, %v8082_v13  ;;  %vm1242_vm3 = vcmp.eq.s32.totalorder %v8509_v52, %v9525_v58  ;;  %vm7381_vm7 = vmpackc.low %vm667_vm13, %vm633_vm9  ;;  %vm734_vm9 = vcmp.eq.s32.totalorder %v8249_v23, %v9757_v51  ;;  %v10407_v58 = vrot.slane %v9912_v63, %v8519_v54 }
 0x125   :  { %7350 = vmatprep.subr.msk.bf16.mxu0 %vm9934_vm11, %v8082_v13  ;;  %vm261_vm11 = vcmp.eq.s32.totalorder %v8132_v4, %v9948_v62  ;;  %7382 = vmatprep.subr.msk.bf16.mxu1 %vm7381_vm7, %v8082_v13  ;;  %vm7383_vm0 = vmpackc.low %vm666_vm10, %vm632_vm15  ;;  %vm226_vm15 = vcmp.eq.s32.totalorder %v8123_v1, %v9980_v9  ;;  %vm295_vm10 = vcmp.eq.s32.totalorder %v8137_v6, %v9948_v62 }
 0x126   :  { %vm7355_vm2 = vmpackc.low %vm1276_vm14, %vm1242_vm3  ;;  %vm329_vm3 = vcmp.eq.s32.totalorder %v8140_v7, %v9948_v62 }
 0x127   :  { %7384 = vmatpush1.bf16.msk.msra.mxu1 %vm7383_vm0, %v8082_v13  ;;  %vm7421_vm13 = vmpackc.low %vm261_vm11, %vm227_vm5  ;;  %vm803_vm5 = vcmp.eq.s32.totalorder %v8265_v25, %v9741_v50  ;;  %vm768_vm0 = vcmp.eq.s32.totalorder %v8258_v24, %v9757_v51 }
 0x128   :  { %7352 = vmatpush1.bf16.msk.msra.mxu0 %vm9958_vm1, %v8082_v13  ;;  %vm260_vm1 = vcmp.eq.s32.totalorder %v8132_v4, %v9980_v9  ;;  %vm7385_vm14 = vmpackc.low %vm735_vm12, %vm701_vm4  ;;  %vm802_vm4 = vcmp.eq.s32.totalorder %v8265_v25, %v9757_v51 }
 0x129   :  { %7354 = vmatprep.subr.msk.bf16.mxu0 %vm9970_vm6, %v8082_v13  ;;  %7386 = vmatprep.subr.msk.bf16.mxu1 %vm7385_vm14, %v8082_v13  ;;  %vm7387_vm7 = vmpackc.low %vm734_vm9, %vm700_vm8  ;;  %vm769_vm6 = vcmp.eq.s32.totalorder %v8258_v24, %v9741_v50  ;;  %vm328_vm8 = vcmp.eq.s32.totalorder %v8140_v7, %v9980_v9  ;;  %vm363_vm9 = vcmp.eq.s32.totalorder %v8153_v11, %v9948_v62 }
 0x12a   :  { %vm10016_vm11 = vmpackc.low %vm260_vm1, %vm226_vm15  ;;  %vm397_vm15 = vcmp.eq.s32.totalorder %v8156_v12, %v9948_v62 }
 0x12b   :  { %7388 = vmatpush1.bf16.msk.msra.mxu1 %vm7387_vm7, %v8082_v13  ;;  %vm10026_vm12 = vmpackc.low %vm329_vm3, %vm295_vm10  ;;  %vm837_vm10 = vcmp.eq.s32.totalorder %v8280_v28, %v9741_v50  ;;  %vm871_vm3 = vcmp.eq.s32.totalorder %v8283_v29, %v9741_v50  ;;  %vm836_vm7 = vcmp.eq.s32.totalorder %v8280_v28, %v9757_v51 }
 0x12c   :  { %7356 = vmatpush1.bf16.msk.msra.mxu0 %vm7355_vm2, %v8082_v13  ;;  %vm294_vm2 = vcmp.eq.s32.totalorder %v8137_v6, %v9980_v9  ;;  %vm7389_vm1 = vmpackc.low %vm803_vm5, %vm769_vm6  ;;  %vm870_vm6 = vcmp.eq.s32.totalorder %v8283_v29, %v9757_v51 }
 0x12d   :  { %7422 = vmatprep.subr.msk.bf16.mxu0 %vm7421_vm13, %v8082_v13  ;;  %7390 = vmatprep.subr.msk.bf16.mxu1 %vm7389_vm1, %v8082_v13  ;;  %vm7391_vm13 = vmpackc.low %vm802_vm4, %vm768_vm0  ;;  %vm396_vm0 = vcmp.eq.s32.totalorder %v8156_v12, %v9980_v9  ;;  %vm431_vm4 = vcmp.eq.s32.totalorder %v8182_v14, %v9948_v62 }
 0x12e   :  { %vm10047_vm14 = vmpackc.low %vm328_vm8, %vm294_vm2 }
 0x12f   :  { %3967 = vmatmul.mubr.f32.vlgmr.msra.gmra.mrb[6].mxu0 %v9583_v61  ;;  %7392 = vmatpush1.bf16.msk.msra.mxu1 %vm7391_vm13, %v8082_v13  ;;  %vm10059_vm5 = vmpackc.low %vm397_vm15, %vm363_vm9  ;;  %vm905_vm9 = vcmp.eq.s32.totalorder %v8308_v32, %v9741_v50  ;;  %vm939_vm15 = vcmp.eq.s32.totalorder %v8311_v33, %v9741_v50  ;;  %vm904_vm13 = vcmp.eq.s32.totalorder %v8308_v32, %v9757_v51 }
 0x130   :  { %7424 = vmatpush1.bf16.msk.msra.mxu0 %vm10016_vm11, %v8082_v13  ;;  %vm362_vm11 = vcmp.eq.s32.totalorder %v8153_v11, %v9980_v9  ;;  %4108 = vmatprep.mubr.f32.mxu0 %v10067_v38  ;;  %vm7393_vm2 = vmpackc.low %vm871_vm3, %vm837_vm10  ;;  %vm938_vm10 = vcmp.eq.s32.totalorder %v8311_v33, %v9757_v51 }
 0x131   :  { %7426 = vmatprep.subr.msk.bf16.mxu0 %vm10026_vm12, %v8082_v13  ;;  %vm465_vm12 = vcmp.eq.s32.totalorder %v8185_v15, %v9948_v62  ;;  %7394 = vmatprep.subr.msk.bf16.mxu1 %vm7393_vm2, %v8082_v13  ;;  %vm7395_vm8 = vmpackc.low %vm870_vm6, %vm836_vm7  ;;  %vm430_vm7 = vcmp.eq.s32.totalorder %v8182_v14, %v9980_v9  ;;  %vm499_vm6 = vcmp.eq.s32.totalorder %v8198_v16, %v9948_v62 }
 0x132   :  { %vm7431_vm1 = vmpackc.low %vm396_vm0, %vm362_vm11  ;;  %vm533_vm11 = vcmp.eq.s32.totalorder %v8201_v17, %v9948_v62 }
 0x133   :  { %7396 = vmatpush1.bf16.msk.msra.mxu1 %vm7395_vm8, %v8082_v13  ;;  %vm7433_vm3 = vmpackc.low %vm465_vm12, %vm431_vm4  ;;  %vm1007_vm4 = vcmp.eq.s32.totalorder %v8343_v37, %v9741_v50  ;;  %vm972_vm8 = vcmp.eq.s32.totalorder %v8340_v36, %v9757_v51 }
 0x134   :  { %7428 = vmatpush1.bf16.msk.msra.mxu0 %vm10047_vm14, %v8082_v13  ;;  %vm464_vm14 = vcmp.eq.s32.totalorder %v8185_v15, %v9980_v9  ;;  %vm7397_vm0 = vmpackc.low %vm939_vm15, %vm905_vm9  ;;  %vm1006_vm9 = vcmp.eq.s32.totalorder %v8343_v37, %v9757_v51 }
 0x135   :  { %7430 = vmatprep.subr.msk.bf16.mxu0 %vm10059_vm5, %v8082_v13  ;;  %7398 = vmatprep.subr.msk.bf16.mxu1 %vm7397_vm0, %v8082_v13  ;;  %vm7399_vm2 = vmpackc.low %vm938_vm10, %vm904_vm13  ;;  %vm973_vm5 = vcmp.eq.s32.totalorder %v8340_v36, %v9741_v50  ;;  %vm498_vm13 = vcmp.eq.s32.totalorder %v8198_v16, %v9980_v9  ;;  %vm532_vm10 = vcmp.eq.s32.totalorder %v8201_v17, %v9980_v9 }
 0x136   :  { %vm7435_vm12 = vmpackc.low %vm464_vm14, %vm430_vm7  ;;  %vm601_vm7 = vcmp.eq.s32.totalorder %v8217_v19, %v9948_v62 }
 0x137   :  { %7400 = vmatpush1.bf16.msk.msra.mxu1 %vm7399_vm2, %v8082_v13  ;;  %vm7437_vm15 = vmpackc.low %vm533_vm11, %vm499_vm6  ;;  %vm1075_vm6 = vcmp.eq.s32.totalorder %v8384_v41, %v9741_v50  ;;  %vm1040_vm2 = vcmp.eq.s32.totalorder %v8381_v40, %v9757_v51 }
 0x138   :  { %7432 = vmatpush1.bf16.msk.msra.mxu0 %vm7431_vm1, %v8082_v13  ;;  %vm567_vm1 = vcmp.eq.s32.totalorder %v8214_v18, %v9948_v62  ;;  %vm7401_vm14 = vmpackc.low %vm1007_vm4, %vm973_vm5  ;;  %vm1074_vm5 = vcmp.eq.s32.totalorder %v8384_v41, %v9757_v51 }
 0x139   :  { %7434 = vmatprep.subr.msk.bf16.mxu0 %vm7433_vm3, %v8082_v13  ;;  %7402 = vmatprep.subr.msk.bf16.mxu1 %vm7401_vm14, %v8082_v13  ;;  %vm7403_vm0 = vmpackc.low %vm1006_vm9, %vm972_vm8  ;;  %vm1041_vm3 = vcmp.eq.s32.totalorder %v8381_v40, %v9741_v50  ;;  %vm566_vm8 = vcmp.eq.s32.totalorder %v8214_v18, %v9980_v9  ;;  %vm600_vm9 = vcmp.eq.s32.totalorder %v8217_v19, %v9980_v9 }
 0x13a   :  { %vm7439_vm11 = vmpackc.low %vm532_vm10, %vm498_vm13  ;;  %vm669_vm13 = vcmp.eq.s32.totalorder %v8233_v21, %v9948_v62 }
 0x13b   :  { %7404 = vmatpush1.bf16.msk.msra.mxu1 %vm7403_vm0, %v8082_v13  ;;  %vm7441_vm4 = vmpackc.low %vm601_vm7, %vm567_vm1  ;;  %vm1143_vm1 = vcmp.eq.s32.totalorder %v8428_v45, %v9741_v50  ;;  %vm1108_vm0 = vcmp.eq.s32.totalorder %v8425_v44, %v9757_v51 }
 0x13c   :  { %7436 = vmatpush1.bf16.msk.msra.mxu0 %vm7435_vm12, %v8082_v13  ;;  %vm635_vm12 = vcmp.eq.s32.totalorder %v8230_v20, %v9948_v62  ;;  %vm7405_vm10 = vmpackc.low %vm1075_vm6, %vm1041_vm3  ;;  %vm1142_vm3 = vcmp.eq.s32.totalorder %v8428_v45, %v9757_v51 }
 0x13d   :  { %7438 = vmatprep.subr.msk.bf16.mxu0 %vm7437_vm15, %v8082_v13  ;;  %7406 = vmatprep.subr.msk.bf16.mxu1 %vm7405_vm10, %v8082_v13  ;;  %vm7407_vm14 = vmpackc.low %vm1074_vm5, %vm1040_vm2  ;;  %vm1109_vm15 = vcmp.eq.s32.totalorder %v8425_v44, %v9741_v50  ;;  %vm668_vm2 = vcmp.eq.s32.totalorder %v8233_v21, %v9980_v9  ;;  %vm703_vm5 = vcmp.eq.s32.totalorder %v8246_v22, %v9948_v62 }
 0x13e   :  { %vm10147_vm7 = vmpackc.low %vm600_vm9, %vm566_vm8  ;;  %vm737_vm8 = vcmp.eq.s32.totalorder %v8249_v23, %v9948_v62 }
 0x13f   :  { %7408 = vmatpush1.bf16.msk.msra.mxu1 %vm7407_vm14, %v8082_v13  ;;  %vm10157_vm6 = vmpackc.low %vm669_vm13, %vm635_vm12  ;;  %vm1177_vm12 = vcmp.eq.s32.totalorder %v8469_v48, %v9741_v50  ;;  %vm1211_vm13 = vcmp.eq.s32.totalorder %v8472_v49, %v9741_v50  ;;  %vm1176_vm14 = vcmp.eq.s32.totalorder %v8469_v48, %v9757_v51 }
 0x140   :  { %7440 = vmatpush1.bf16.msk.msra.mxu0 %vm7439_vm11, %v8082_v13  ;;  %vm634_vm11 = vcmp.eq.s32.totalorder %v8230_v20, %v9980_v9  ;;  %vm7409_vm9 = vmpackc.low %vm1143_vm1, %vm1109_vm15  ;;  %vm1210_vm15 = vcmp.eq.s32.totalorder %v8472_v49, %v9757_v51 }
 0x141   :  { %7442 = vmatprep.subr.msk.bf16.mxu0 %vm7441_vm4, %v8082_v13  ;;  %7410 = vmatprep.subr.msk.bf16.mxu1 %vm7409_vm9, %v8082_v13  ;;  %vm7411_vm4 = vmpackc.low %vm1142_vm3, %vm1108_vm0  ;;  %vm736_vm0 = vcmp.eq.s32.totalorder %v8249_v23, %v9980_v9  ;;  %vm771_vm3 = vcmp.eq.s32.totalorder %v8258_v24, %v9948_v62 }
 0x142   :  { %v3542_v59 = vpop.f32.mrb[0].mxu0  ;;  %vm10177_vm10 = vmpackc.low %vm668_vm2, %vm634_vm11 }
 0x143   :  { %4683 = vst [vmem:[#allocation7] sm:$0xff] %v3542_v59  ;;  %v3544_v5 = vpop.f32.mrb[1].mxu0  ;;  %7412 = vmatpush1.bf16.msk.msra.mxu1 %vm7411_vm4, %v8082_v13  ;;  %vm10195_vm1 = vmpackc.low %vm737_vm8, %vm703_vm5  ;;  %vm1245_vm5 = vcmp.eq.s32.totalorder %v8509_v52, %v9741_v50  ;;  %vm1279_vm8 = vcmp.eq.s32.totalorder %v8516_v53, %v9741_v50  ;;  %vm1244_vm4 = vcmp.eq.s32.totalorder %v8509_v52, %v9757_v51  ;;  %v10509_v59 = vld [vmem:[#allocation5] sm:$0xff] }
 0x144   :  { %4684 = vst [vmem:[#allocation7 + $0x8] sm:$0xff] %v3544_v5  ;;  %7444 = vmatpush1.bf16.msk.msra.mxu0 %vm10147_vm7, %v8082_v13  ;;  %vm702_vm7 = vcmp.eq.s32.totalorder %v8246_v22, %v9980_v9  ;;  %vm7413_vm11 = vmpackc.low %vm1211_vm13, %vm1177_vm12  ;;  %vm1278_vm12 = vcmp.eq.s32.totalorder %v8516_v53, %v9757_v51  ;;  %v10892_v5 = vrot.slane %v10856_v46, %v8126_v2 }
 0x145   :  { %7446 = vmatprep.subr.msk.bf16.mxu0 %vm10157_vm6, %v8082_v13  ;;  %vm805_vm6 = vcmp.eq.s32.totalorder %v8265_v25, %v9948_v62  ;;  %7414 = vmatprep.subr.msk.bf16.mxu1 %vm7413_vm11, %v8082_v13  ;;  %vm7415_vm2 = vmpackc.low %vm1210_vm15, %vm1176_vm14  ;;  %vm804_vm14 = vcmp.eq.s32.totalorder %v8265_v25, %v9980_v9  ;;  %vm839_vm15 = vcmp.eq.s32.totalorder %v8280_v28, %v9948_v62 }
 0x146   :  { %vm10219_vm9 = vmpackc.low %vm736_vm0, %vm702_vm7  ;;  %vm873_vm7 = vcmp.eq.s32.totalorder %v8283_v29, %v9948_v62 }
 0x147   :  { %7416 = vmatpush1.bf16.msk.msra.mxu1 %vm7415_vm2, %v8082_v13  ;;  %vm7453_vm13 = vmpackc.low %vm805_vm6, %vm771_vm3  ;;  %vm229_vm3 = vcmp.eq.s32.totalorder %v8123_v1, %v10214_v42  ;;  %vm263_vm6 = vcmp.eq.s32.totalorder %v8132_v4, %v10214_v42  ;;  %vm228_vm2 = vcmp.eq.s32.totalorder %v8123_v1, %v10230_v8 }
 0x148   :  { %7448 = vmatpush1.bf16.msk.msra.mxu0 %vm10177_vm10, %v8082_v13  ;;  %vm770_vm10 = vcmp.eq.s32.totalorder %v8258_v24, %v9980_v9  ;;  %vm7419_vm0 = vmpackc.low %vm1278_vm12, %vm1244_vm4  ;;  %vm872_vm4 = vcmp.eq.s32.totalorder %v8283_v29, %v9980_v9  ;;  %vm907_vm12 = vcmp.eq.s32.totalorder %v8308_v32, %v9948_v62 }
 0x149   :  { %7450 = vmatprep.subr.msk.bf16.mxu0 %vm10195_vm1, %v8082_v13  ;;  %vm7417_vm1 = vmpackc.low %vm1279_vm8, %vm1245_vm5  ;;  %vm262_vm5 = vcmp.eq.s32.totalorder %v8132_v4, %v10230_v8 }
 0x14a   :  { %7418 = vmatprep.subr.msk.bf16.mxu1 %vm7417_vm1, %v8082_v13  ;;  %vm10257_vm11 = vmpackc.low %vm804_vm14, %vm770_vm10  ;;  %vm941_vm10 = vcmp.eq.s32.totalorder %v8311_v33, %v9948_v62 }
 0x14b   :  { %7420 = vmatpush1.bf16.msk.msra.mxu1 %vm7419_vm0, %v8082_v13  ;;  %vm10267_vm8 = vmpackc.low %vm873_vm7, %vm839_vm15  ;;  %vm297_vm15 = vcmp.eq.s32.totalorder %v8137_v6, %v10214_v42  ;;  %vm331_vm7 = vcmp.eq.s32.totalorder %v8140_v7, %v10214_v42  ;;  %vm296_vm0 = vcmp.eq.s32.totalorder %v8137_v6, %v10230_v8 }
 0x14c   :  { %7452 = vmatpush1.bf16.msk.msra.mxu0 %vm10219_vm9, %v8082_v13  ;;  %vm838_vm9 = vcmp.eq.s32.totalorder %v8280_v28, %v9980_v9  ;;  %vm7485_vm14 = vmpackc.low %vm263_vm6, %vm229_vm3  ;;  %vm330_vm3 = vcmp.eq.s32.totalorder %v8140_v7, %v10230_v8 }
 0x14d   :  { %7454 = vmatprep.subr.msk.bf16.mxu0 %vm7453_vm13, %v8082_v13  ;;  %7486 = vmatprep.subr.msk.bf16.mxu1 %vm7485_vm14, %v8082_v13  ;;  %vm7487_vm13 = vmpackc.low %vm262_vm5, %vm228_vm2  ;;  %vm940_vm2 = vcmp.eq.s32.totalorder %v8311_v33, %v9980_v9  ;;  %vm975_vm5 = vcmp.eq.s32.totalorder %v8340_v36, %v9948_v62 }
 0x14e   :  { %4038 = vmatmul.mubr.f32.vlgmr.msra.gmra.mrb[6].mxu1 %v9583_v61  ;;  %vm10288_vm1 = vmpackc.low %vm872_vm4, %vm838_vm9  ;;  %vm1009_vm9 = vcmp.eq.s32.totalorder %v8343_v37, %v9948_v62 }
 0x14f   :  { %7488 = vmatpush1.bf16.msk.msra.mxu1 %vm7487_vm13, %v8082_v13  ;;  %vm10300_vm6 = vmpackc.low %vm941_vm10, %vm907_vm12  ;;  %4179 = vmatprep.mubr.f32.mxu1 %v10067_v38  ;;  %vm365_vm12 = vcmp.eq.s32.totalorder %v8153_v11, %v10214_v42  ;;  %vm399_vm10 = vcmp.eq.s32.totalorder %v8156_v12, %v10214_v42  ;;  %vm364_vm13 = vcmp.eq.s32.totalorder %v8153_v11, %v10230_v8 }
 0x150   :  { %7456 = vmatpush1.bf16.msk.msra.mxu0 %vm10257_vm11, %v8082_v13  ;;  %vm906_vm11 = vcmp.eq.s32.totalorder %v8308_v32, %v9980_v9  ;;  %vm7489_vm4 = vmpackc.low %vm331_vm7, %vm297_vm15  ;;  %vm398_vm15 = vcmp.eq.s32.totalorder %v8156_v12, %v10230_v8 }
 0x151   :  { %7458 = vmatprep.subr.msk.bf16.mxu0 %vm10267_vm8, %v8082_v13  ;;  %7490 = vmatprep.subr.msk.bf16.mxu1 %vm7489_vm4, %v8082_v13  ;;  %vm7491_vm8 = vmpackc.low %vm330_vm3, %vm296_vm0  ;;  %vm974_vm0 = vcmp.eq.s32.totalorder %v8340_v36, %v9980_v9  ;;  %vm1043_vm3 = vcmp.eq.s32.totalorder %v8381_v40, %v9948_v62 }
 0x152   :  { %vm7463_vm14 = vmpackc.low %vm940_vm2, %vm906_vm11  ;;  %vm1077_vm11 = vcmp.eq.s32.totalorder %v8384_v41, %v9948_v62 }
 0x153   :  { %7492 = vmatpush1.bf16.msk.msra.mxu1 %vm7491_vm8, %v8082_v13  ;;  %vm7465_vm7 = vmpackc.low %vm1009_vm9, %vm975_vm5  ;;  %vm467_vm5 = vcmp.eq.s32.totalorder %v8185_v15, %v10214_v42  ;;  %vm432_vm8 = vcmp.eq.s32.totalorder %v8182_v14, %v10230_v8 }
 0x154   :  { %7460 = vmatpush1.bf16.msk.msra.mxu0 %vm10288_vm1, %v8082_v13  ;;  %vm1008_vm1 = vcmp.eq.s32.totalorder %v8343_v37, %v9980_v9  ;;  %vm7493_vm2 = vmpackc.low %vm399_vm10, %vm365_vm12  ;;  %vm466_vm12 = vcmp.eq.s32.totalorder %v8185_v15, %v10230_v8 }
 0x155   :  { %7462 = vmatprep.subr.msk.bf16.mxu0 %vm10300_vm6, %v8082_v13  ;;  %7494 = vmatprep.subr.msk.bf16.mxu1 %vm7493_vm2, %v8082_v13  ;;  %vm7495_vm4 = vmpackc.low %vm398_vm15, %vm364_vm13  ;;  %vm433_vm6 = vcmp.eq.s32.totalorder %v8182_v14, %v10214_v42  ;;  %vm1042_vm13 = vcmp.eq.s32.totalorder %v8381_v40, %v9980_v9  ;;  %vm1076_vm15 = vcmp.eq.s32.totalorder %v8384_v41, %v9980_v9 }
 0x156   :  { %vm7467_vm9 = vmpackc.low %vm1008_vm1, %vm974_vm0  ;;  %vm1145_vm0 = vcmp.eq.s32.totalorder %v8428_v45, %v9948_v62 }
 0x157   :  { %7496 = vmatpush1.bf16.msk.msra.mxu1 %vm7495_vm4, %v8082_v13  ;;  %vm7469_vm10 = vmpackc.low %vm1077_vm11, %vm1043_vm3  ;;  %vm535_vm3 = vcmp.eq.s32.totalorder %v8201_v17, %v10214_v42  ;;  %vm500_vm4 = vcmp.eq.s32.totalorder %v8198_v16, %v10230_v8 }
 0x158   :  { %7464 = vmatpush1.bf16.msk.msra.mxu0 %vm7463_vm14, %v8082_v13  ;;  %vm1111_vm14 = vcmp.eq.s32.totalorder %v8425_v44, %v9948_v62  ;;  %vm7497_vm1 = vmpackc.low %vm467_vm5, %vm433_vm6  ;;  %vm534_vm6 = vcmp.eq.s32.totalorder %v8201_v17, %v10230_v8 }
 0x159   :  { %7466 = vmatprep.subr.msk.bf16.mxu0 %vm7465_vm7, %v8082_v13  ;;  %7498 = vmatprep.subr.msk.bf16.mxu1 %vm7497_vm1, %v8082_v13  ;;  %vm7499_vm2 = vmpackc.low %vm466_vm12, %vm432_vm8  ;;  %vm501_vm7 = vcmp.eq.s32.totalorder %v8198_v16, %v10214_v42  ;;  %vm1110_vm8 = vcmp.eq.s32.totalorder %v8425_v44, %v9980_v9  ;;  %vm1144_vm12 = vcmp.eq.s32.totalorder %v8428_v45, %v9980_v9 }
 0x15a   :  { %vm7471_vm11 = vmpackc.low %vm1076_vm15, %vm1042_vm13  ;;  %vm1213_vm13 = vcmp.eq.s32.totalorder %v8472_v49, %v9948_v62 }
 0x15b   :  { %7500 = vmatpush1.bf16.msk.msra.mxu1 %vm7499_vm2, %v8082_v13  ;;  %vm7473_vm5 = vmpackc.low %vm1145_vm0, %vm1111_vm14  ;;  %vm603_vm14 = vcmp.eq.s32.totalorder %v8217_v19, %v10214_v42  ;;  %vm568_vm2 = vcmp.eq.s32.totalorder %v8214_v18, %v10230_v8 }
 0x15c   :  { %7468 = vmatpush1.bf16.msk.msra.mxu0 %vm7467_vm9, %v8082_v13  ;;  %vm1179_vm9 = vcmp.eq.s32.totalorder %v8469_v48, %v9948_v62  ;;  %vm7501_vm15 = vmpackc.low %vm535_vm3, %vm501_vm7  ;;  %vm602_vm7 = vcmp.eq.s32.totalorder %v8217_v19, %v10230_v8 }
 0x15d   :  { %7470 = vmatprep.subr.msk.bf16.mxu0 %vm7469_vm10, %v8082_v13  ;;  %7502 = vmatprep.subr.msk.bf16.mxu1 %vm7501_vm15, %v8082_v13  ;;  %vm7503_vm1 = vmpackc.low %vm534_vm6, %vm500_vm4  ;;  %vm569_vm10 = vcmp.eq.s32.totalorder %v8214_v18, %v10214_v42  ;;  %vm1212_vm4 = vcmp.eq.s32.totalorder %v8472_v49, %v9980_v9  ;;  %vm1247_vm6 = vcmp.eq.s32.totalorder %v8509_v52, %v9948_v62 }
 0x15e   :  { %vm10383_vm0 = vmpackc.low %vm1144_vm12, %vm1110_vm8  ;;  %vm1281_vm8 = vcmp.eq.s32.totalorder %v8516_v53, %v9948_v62  ;;  %v11170_v62 = vrot.slane %v10856_v46, %v8268_v26  ;;  %v11186_v26 = vrot.slane %v10856_v46, %v8272_v27  ;;  %v11641_v27 = vrot.slane %v10856_v46, %v8800_v39 }
 0x15f   :  { %7504 = vmatpush1.bf16.msk.msra.mxu1 %vm7503_vm1, %v8082_v13  ;;  %vm10393_vm3 = vmpackc.low %vm1213_vm13, %vm1179_vm9  ;;  %vm637_vm9 = vcmp.eq.s32.totalorder %v8230_v20, %v10214_v42  ;;  %vm671_vm13 = vcmp.eq.s32.totalorder %v8233_v21, %v10214_v42  ;;  %vm636_vm1 = vcmp.eq.s32.totalorder %v8230_v20, %v10230_v8  ;;  %v11657_v39 = vrot.slane %v10856_v46, %v8815_v43 }
 0x160   :  { %7472 = vmatpush1.bf16.msk.msra.mxu0 %vm7471_vm11, %v8082_v13  ;;  %vm1178_vm11 = vcmp.eq.s32.totalorder %v8469_v48, %v9980_v9  ;;  %vm7507_vm12 = vmpackc.low %vm602_vm7, %vm568_vm2  ;;  %vm1280_vm2 = vcmp.eq.s32.totalorder %v8516_v53, %v9980_v9  ;;  %vm231_vm7 = vcmp.eq.s32.totalorder %v8123_v1, %v10407_v58 }
 0x161   :  { %7474 = vmatprep.subr.msk.bf16.mxu0 %vm7473_vm5, %v8082_v13  ;;  %v3613_v10 = vpop.f32.mrb[0].mxu1  ;;  %vm7505_vm5 = vmpackc.low %vm603_vm14, %vm569_vm10  ;;  %vm670_vm10 = vcmp.eq.s32.totalorder %v8233_v21, %v10230_v8 }
 0x162   :  { %4685 = vst [vmem:[#allocation7 + $0x10] sm:$0xff] %v3613_v10  ;;  %7506 = vmatprep.subr.msk.bf16.mxu1 %vm7505_vm5, %v8082_v13  ;;  %v3615_v34 = vpop.f32.mrb[1].mxu1  ;;  %vm10420_vm15 = vmpackc.low %vm1212_vm4, %vm1178_vm11  ;;  %v10701_v10 = vrot.slane %v9912_v63, %v8815_v43 }
 0x163   :  { %4686 = vst [vmem:[#allocation7 + $0x18] sm:$0xff] %v3615_v34  ;;  %7508 = vmatpush1.bf16.msk.msra.mxu1 %vm7507_vm12, %v8082_v13  ;;  %vm10438_vm14 = vmpackc.low %vm1281_vm8, %vm1247_vm6  ;;  %vm705_vm6 = vcmp.eq.s32.totalorder %v8246_v22, %v10214_v42  ;;  %vm739_vm8 = vcmp.eq.s32.totalorder %v8249_v23, %v10214_v42  ;;  %vm704_vm12 = vcmp.eq.s32.totalorder %v8246_v22, %v10230_v8 }
 0x164   :  { %7476 = vmatpush1.bf16.msk.msra.mxu0 %vm10383_vm0, %v8082_v13  ;;  %vm1246_vm0 = vcmp.eq.s32.totalorder %v8509_v52, %v9980_v9  ;;  %vm7509_vm11 = vmpackc.low %vm671_vm13, %vm637_vm9  ;;  %vm738_vm9 = vcmp.eq.s32.totalorder %v8249_v23, %v10230_v8 }
 0x165   :  { %7478 = vmatprep.subr.msk.bf16.mxu0 %vm10393_vm3, %v8082_v13  ;;  %vm265_vm3 = vcmp.eq.s32.totalorder %v8132_v4, %v10407_v58  ;;  %7510 = vmatprep.subr.msk.bf16.mxu1 %vm7509_vm11, %v8082_v13  ;;  %vm7511_vm4 = vmpackc.low %vm670_vm10, %vm636_vm1  ;;  %vm230_vm1 = vcmp.eq.s32.totalorder %v8123_v1, %v10448_v30  ;;  %vm299_vm10 = vcmp.eq.s32.totalorder %v8137_v6, %v10407_v58 }
 0x166   :  { %vm7483_vm5 = vmpackc.low %vm1280_vm2, %vm1246_vm0  ;;  %vm333_vm0 = vcmp.eq.s32.totalorder %v8140_v7, %v10407_v58 }
 0x167   :  { %7512 = vmatpush1.bf16.msk.msra.mxu1 %vm7511_vm4, %v8082_v13  ;;  %vm7549_vm13 = vmpackc.low %vm265_vm3, %vm231_vm7  ;;  %vm807_vm7 = vcmp.eq.s32.totalorder %v8265_v25, %v10214_v42  ;;  %vm772_vm4 = vcmp.eq.s32.totalorder %v8258_v24, %v10230_v8 }
 0x168   :  { %7480 = vmatpush1.bf16.msk.msra.mxu0 %vm10420_vm15, %v8082_v13  ;;  %vm264_vm15 = vcmp.eq.s32.totalorder %v8132_v4, %v10448_v30  ;;  %vm7513_vm2 = vmpackc.low %vm739_vm8, %vm705_vm6  ;;  %vm806_vm6 = vcmp.eq.s32.totalorder %v8265_v25, %v10230_v8 }
 0x169   :  { %7482 = vmatprep.subr.msk.bf16.mxu0 %vm10438_vm14, %v8082_v13  ;;  %7514 = vmatprep.subr.msk.bf16.mxu1 %vm7513_vm2, %v8082_v13  ;;  %vm7515_vm11 = vmpackc.low %vm738_vm9, %vm704_vm12  ;;  %vm773_vm14 = vcmp.eq.s32.totalorder %v8258_v24, %v10214_v42  ;;  %vm332_vm12 = vcmp.eq.s32.totalorder %v8140_v7, %v10448_v30  ;;  %vm367_vm9 = vcmp.eq.s32.totalorder %v8153_v11, %v10407_v58 }
 0x16a   :  { %vm10487_vm3 = vmpackc.low %vm264_vm15, %vm230_vm1  ;;  %vm401_vm1 = vcmp.eq.s32.totalorder %v8156_v12, %v10407_v58 }
 0x16b   :  { %7516 = vmatpush1.bf16.msk.msra.mxu1 %vm7515_vm11, %v8082_v13  ;;  %vm10497_vm8 = vmpackc.low %vm333_vm0, %vm299_vm10  ;;  %vm841_vm10 = vcmp.eq.s32.totalorder %v8280_v28, %v10214_v42  ;;  %vm875_vm0 = vcmp.eq.s32.totalorder %v8283_v29, %v10214_v42  ;;  %vm840_vm11 = vcmp.eq.s32.totalorder %v8280_v28, %v10230_v8 }
 0x16c   :  { %7484 = vmatpush1.bf16.msk.msra.mxu0 %vm7483_vm5, %v8082_v13  ;;  %vm298_vm5 = vcmp.eq.s32.totalorder %v8137_v6, %v10448_v30  ;;  %vm7517_vm15 = vmpackc.low %vm807_vm7, %vm773_vm14  ;;  %vm874_vm14 = vcmp.eq.s32.totalorder %v8283_v29, %v10230_v8 }
 0x16d   :  { %7550 = vmatprep.subr.msk.bf16.mxu0 %vm7549_vm13, %v8082_v13  ;;  %7518 = vmatprep.subr.msk.bf16.mxu1 %vm7517_vm15, %v8082_v13  ;;  %vm7519_vm13 = vmpackc.low %vm806_vm6, %vm772_vm4  ;;  %vm400_vm4 = vcmp.eq.s32.totalorder %v8156_v12, %v10448_v30  ;;  %vm435_vm6 = vcmp.eq.s32.totalorder %v8182_v14, %v10407_v58 }
 0x16e   :  { %vm10520_vm2 = vmpackc.low %vm332_vm12, %vm298_vm5 }
 0x16f   :  { %4109 = vmatmul.mubr.f32.vlgmr.msra.gmra.mrb[8].mxu0 %v10509_v59  ;;  %7520 = vmatpush1.bf16.msk.msra.mxu1 %vm7519_vm13, %v8082_v13  ;;  %vm10535_vm7 = vmpackc.low %vm401_vm1, %vm367_vm9  ;;  %vm909_vm9 = vcmp.eq.s32.totalorder %v8308_v32, %v10214_v42  ;;  %vm943_vm1 = vcmp.eq.s32.totalorder %v8311_v33, %v10214_v42  ;;  %vm908_vm13 = vcmp.eq.s32.totalorder %v8308_v32, %v10230_v8 }
 0x170   :  { %7552 = vmatpush1.bf16.msk.msra.mxu0 %vm10487_vm3, %v8082_v13  ;;  %vm366_vm3 = vcmp.eq.s32.totalorder %v8153_v11, %v10448_v30  ;;  %4250 = vmatprep.mubr.f32.mxu0 %v10067_v38  ;;  %vm7521_vm5 = vmpackc.low %vm875_vm0, %vm841_vm10  ;;  %vm942_vm10 = vcmp.eq.s32.totalorder %v8311_v33, %v10230_v8 }
 0x171   :  { %7554 = vmatprep.subr.msk.bf16.mxu0 %vm10497_vm8, %v8082_v13  ;;  %vm469_vm8 = vcmp.eq.s32.totalorder %v8185_v15, %v10407_v58  ;;  %7522 = vmatprep.subr.msk.bf16.mxu1 %vm7521_vm5, %v8082_v13  ;;  %vm7523_vm12 = vmpackc.low %vm874_vm14, %vm840_vm11  ;;  %vm434_vm11 = vcmp.eq.s32.totalorder %v8182_v14, %v10448_v30  ;;  %vm503_vm14 = vcmp.eq.s32.totalorder %v8198_v16, %v10407_v58 }
 0x172   :  { %vm7559_vm15 = vmpackc.low %vm400_vm4, %vm366_vm3  ;;  %vm537_vm3 = vcmp.eq.s32.totalorder %v8201_v17, %v10407_v58 }
 0x173   :  { %7524 = vmatpush1.bf16.msk.msra.mxu1 %vm7523_vm12, %v8082_v13  ;;  %vm7561_vm0 = vmpackc.low %vm469_vm8, %vm435_vm6  ;;  %vm1011_vm6 = vcmp.eq.s32.totalorder %v8343_v37, %v10214_v42  ;;  %vm976_vm12 = vcmp.eq.s32.totalorder %v8340_v36, %v10230_v8 }
 0x174   :  { %7556 = vmatpush1.bf16.msk.msra.mxu0 %vm10520_vm2, %v8082_v13  ;;  %vm468_vm2 = vcmp.eq.s32.totalorder %v8185_v15, %v10448_v30  ;;  %vm7525_vm4 = vmpackc.low %vm943_vm1, %vm909_vm9  ;;  %vm1010_vm9 = vcmp.eq.s32.totalorder %v8343_v37, %v10230_v8 }
 0x175   :  { %7558 = vmatprep.subr.msk.bf16.mxu0 %vm10535_vm7, %v8082_v13  ;;  %7526 = vmatprep.subr.msk.bf16.mxu1 %vm7525_vm4, %v8082_v13  ;;  %vm7527_vm5 = vmpackc.low %vm942_vm10, %vm908_vm13  ;;  %vm977_vm7 = vcmp.eq.s32.totalorder %v8340_v36, %v10214_v42  ;;  %vm502_vm13 = vcmp.eq.s32.totalorder %v8198_v16, %v10448_v30  ;;  %vm536_vm10 = vcmp.eq.s32.totalorder %v8201_v17, %v10448_v30 }
 0x176   :  { %vm7563_vm8 = vmpackc.low %vm468_vm2, %vm434_vm11  ;;  %vm605_vm11 = vcmp.eq.s32.totalorder %v8217_v19, %v10407_v58 }
 0x177   :  { %7528 = vmatpush1.bf16.msk.msra.mxu1 %vm7527_vm5, %v8082_v13  ;;  %vm7565_vm1 = vmpackc.low %vm537_vm3, %vm503_vm14  ;;  %vm1079_vm14 = vcmp.eq.s32.totalorder %v8384_v41, %v10214_v42  ;;  %vm1044_vm5 = vcmp.eq.s32.totalorder %v8381_v40, %v10230_v8 }
 0x178   :  { %7560 = vmatpush1.bf16.msk.msra.mxu0 %vm7559_vm15, %v8082_v13  ;;  %vm571_vm15 = vcmp.eq.s32.totalorder %v8214_v18, %v10407_v58  ;;  %vm7529_vm2 = vmpackc.low %vm1011_vm6, %vm977_vm7  ;;  %vm1078_vm7 = vcmp.eq.s32.totalorder %v8384_v41, %v10230_v8 }
 0x179   :  { %7562 = vmatprep.subr.msk.bf16.mxu0 %vm7561_vm0, %v8082_v13  ;;  %7530 = vmatprep.subr.msk.bf16.mxu1 %vm7529_vm2, %v8082_v13  ;;  %vm7531_vm4 = vmpackc.low %vm1010_vm9, %vm976_vm12  ;;  %vm1045_vm0 = vcmp.eq.s32.totalorder %v8381_v40, %v10214_v42  ;;  %vm570_vm12 = vcmp.eq.s32.totalorder %v8214_v18, %v10448_v30  ;;  %vm604_vm9 = vcmp.eq.s32.totalorder %v8217_v19, %v10448_v30 }
 0x17a   :  { %vm7567_vm3 = vmpackc.low %vm536_vm10, %vm502_vm13  ;;  %vm673_vm13 = vcmp.eq.s32.totalorder %v8233_v21, %v10407_v58 }
 0x17b   :  { %7532 = vmatpush1.bf16.msk.msra.mxu1 %vm7531_vm4, %v8082_v13  ;;  %vm7569_vm6 = vmpackc.low %vm605_vm11, %vm571_vm15  ;;  %vm1147_vm15 = vcmp.eq.s32.totalorder %v8428_v45, %v10214_v42  ;;  %vm1112_vm4 = vcmp.eq.s32.totalorder %v8425_v44, %v10230_v8 }
 0x17c   :  { %7564 = vmatpush1.bf16.msk.msra.mxu0 %vm7563_vm8, %v8082_v13  ;;  %vm639_vm8 = vcmp.eq.s32.totalorder %v8230_v20, %v10407_v58  ;;  %vm7533_vm10 = vmpackc.low %vm1079_vm14, %vm1045_vm0  ;;  %vm1146_vm0 = vcmp.eq.s32.totalorder %v8428_v45, %v10230_v8 }
 0x17d   :  { %7566 = vmatprep.subr.msk.bf16.mxu0 %vm7565_vm1, %v8082_v13  ;;  %7534 = vmatprep.subr.msk.bf16.mxu1 %vm7533_vm10, %v8082_v13  ;;  %vm7535_vm2 = vmpackc.low %vm1078_vm7, %vm1044_vm5  ;;  %vm1113_vm1 = vcmp.eq.s32.totalorder %v8425_v44, %v10214_v42  ;;  %vm672_vm5 = vcmp.eq.s32.totalorder %v8233_v21, %v10448_v30  ;;  %vm707_vm7 = vcmp.eq.s32.totalorder %v8246_v22, %v10407_v58 }
 0x17e   :  { %vm10618_vm11 = vmpackc.low %vm604_vm9, %vm570_vm12  ;;  %vm741_vm12 = vcmp.eq.s32.totalorder %v8249_v23, %v10407_v58 }
 0x17f   :  { %7536 = vmatpush1.bf16.msk.msra.mxu1 %vm7535_vm2, %v8082_v13  ;;  %vm10628_vm14 = vmpackc.low %vm673_vm13, %vm639_vm8  ;;  %vm1181_vm8 = vcmp.eq.s32.totalorder %v8469_v48, %v10214_v42  ;;  %vm1215_vm13 = vcmp.eq.s32.totalorder %v8472_v49, %v10214_v42  ;;  %vm1180_vm2 = vcmp.eq.s32.totalorder %v8469_v48, %v10230_v8 }
 0x180   :  { %7568 = vmatpush1.bf16.msk.msra.mxu0 %vm7567_vm3, %v8082_v13  ;;  %vm638_vm3 = vcmp.eq.s32.totalorder %v8230_v20, %v10448_v30  ;;  %vm7537_vm9 = vmpackc.low %vm1147_vm15, %vm1113_vm1  ;;  %vm1214_vm1 = vcmp.eq.s32.totalorder %v8472_v49, %v10230_v8 }
 0x181   :  { %7570 = vmatprep.subr.msk.bf16.mxu0 %vm7569_vm6, %v8082_v13  ;;  %7538 = vmatprep.subr.msk.bf16.mxu1 %vm7537_vm9, %v8082_v13  ;;  %vm7539_vm6 = vmpackc.low %vm1146_vm0, %vm1112_vm4  ;;  %vm740_vm4 = vcmp.eq.s32.totalorder %v8249_v23, %v10448_v30  ;;  %vm775_vm0 = vcmp.eq.s32.totalorder %v8258_v24, %v10407_v58 }
 0x182   :  { %v3684_v51 = vpop.f32.mrb[2].mxu0  ;;  %vm10648_vm10 = vmpackc.low %vm672_vm5, %vm638_vm3 }
 0x183   :  { %4687 = vst [vmem:[#allocation7 + $0x20] sm:$0xff] %v3684_v51  ;;  %v3686_v50 = vpop.f32.mrb[3].mxu0  ;;  %7540 = vmatpush1.bf16.msk.msra.mxu1 %vm7539_vm6, %v8082_v13  ;;  %vm10666_vm15 = vmpackc.low %vm741_vm12, %vm707_vm7  ;;  %vm1249_vm7 = vcmp.eq.s32.totalorder %v8509_v52, %v10214_v42  ;;  %vm1283_vm12 = vcmp.eq.s32.totalorder %v8516_v53, %v10214_v42  ;;  %vm1248_vm6 = vcmp.eq.s32.totalorder %v8509_v52, %v10230_v8 }
 0x184   :  { %4688 = vst [vmem:[#allocation7 + $0x28] sm:$0xff] %v3686_v50  ;;  %7572 = vmatpush1.bf16.msk.msra.mxu0 %vm10618_vm11, %v8082_v13  ;;  %vm706_vm11 = vcmp.eq.s32.totalorder %v8246_v22, %v10448_v30  ;;  %vm7541_vm3 = vmpackc.low %vm1215_vm13, %vm1181_vm8  ;;  %vm1282_vm8 = vcmp.eq.s32.totalorder %v8516_v53, %v10230_v8  ;;  %v10933_v50 = vrot.slane %v10856_v46, %v8129_v3 }
 0x185   :  { %7574 = vmatprep.subr.msk.bf16.mxu0 %vm10628_vm14, %v8082_v13  ;;  %vm809_vm14 = vcmp.eq.s32.totalorder %v8265_v25, %v10407_v58  ;;  %7542 = vmatprep.subr.msk.bf16.mxu1 %vm7541_vm3, %v8082_v13  ;;  %vm7543_vm5 = vmpackc.low %vm1214_vm1, %vm1180_vm2  ;;  %vm808_vm2 = vcmp.eq.s32.totalorder %v8265_v25, %v10448_v30  ;;  %vm843_vm1 = vcmp.eq.s32.totalorder %v8280_v28, %v10407_v58 }
 0x186   :  { %vm10690_vm9 = vmpackc.low %vm740_vm4, %vm706_vm11  ;;  %vm877_vm11 = vcmp.eq.s32.totalorder %v8283_v29, %v10407_v58 }
 0x187   :  { %7544 = vmatpush1.bf16.msk.msra.mxu1 %vm7543_vm5, %v8082_v13  ;;  %vm7581_vm13 = vmpackc.low %vm809_vm14, %vm775_vm0  ;;  %vm233_vm0 = vcmp.eq.s32.totalorder %v8123_v1, %v10685_v60  ;;  %vm267_vm14 = vcmp.eq.s32.totalorder %v8132_v4, %v10685_v60  ;;  %vm232_vm5 = vcmp.eq.s32.totalorder %v8123_v1, %v10701_v10 }
 0x188   :  { %7576 = vmatpush1.bf16.msk.msra.mxu0 %vm10648_vm10, %v8082_v13  ;;  %vm774_vm10 = vcmp.eq.s32.totalorder %v8258_v24, %v10448_v30  ;;  %vm7547_vm4 = vmpackc.low %vm1282_vm8, %vm1248_vm6  ;;  %vm876_vm6 = vcmp.eq.s32.totalorder %v8283_v29, %v10448_v30  ;;  %vm911_vm8 = vcmp.eq.s32.totalorder %v8308_v32, %v10407_v58 }
 0x189   :  { %7578 = vmatprep.subr.msk.bf16.mxu0 %vm10666_vm15, %v8082_v13  ;;  %vm7545_vm15 = vmpackc.low %vm1283_vm12, %vm1249_vm7  ;;  %vm266_vm7 = vcmp.eq.s32.totalorder %v8132_v4, %v10701_v10 }
 0x18a   :  { %7546 = vmatprep.subr.msk.bf16.mxu1 %vm7545_vm15, %v8082_v13  ;;  %vm10728_vm3 = vmpackc.low %vm808_vm2, %vm774_vm10  ;;  %vm945_vm10 = vcmp.eq.s32.totalorder %v8311_v33, %v10407_v58 }
 0x18b   :  { %7548 = vmatpush1.bf16.msk.msra.mxu1 %vm7547_vm4, %v8082_v13  ;;  %vm10738_vm12 = vmpackc.low %vm877_vm11, %vm843_vm1  ;;  %vm301_vm1 = vcmp.eq.s32.totalorder %v8137_v6, %v10685_v60  ;;  %vm335_vm11 = vcmp.eq.s32.totalorder %v8140_v7, %v10685_v60  ;;  %vm300_vm4 = vcmp.eq.s32.totalorder %v8137_v6, %v10701_v10 }
 0x18c   :  { %7580 = vmatpush1.bf16.msk.msra.mxu0 %vm10690_vm9, %v8082_v13  ;;  %vm842_vm9 = vcmp.eq.s32.totalorder %v8280_v28, %v10448_v30  ;;  %vm7613_vm2 = vmpackc.low %vm267_vm14, %vm233_vm0  ;;  %vm334_vm0 = vcmp.eq.s32.totalorder %v8140_v7, %v10701_v10 }
 0x18d   :  { %7582 = vmatprep.subr.msk.bf16.mxu0 %vm7581_vm13, %v8082_v13  ;;  %7614 = vmatprep.subr.msk.bf16.mxu1 %vm7613_vm2, %v8082_v13  ;;  %vm7615_vm13 = vmpackc.low %vm266_vm7, %vm232_vm5  ;;  %vm944_vm5 = vcmp.eq.s32.totalorder %v8311_v33, %v10448_v30  ;;  %vm979_vm7 = vcmp.eq.s32.totalorder %v8340_v36, %v10407_v58 }
 0x18e   :  { %4180 = vmatmul.mubr.f32.vlgmr.msra.gmra.mrb[8].mxu1 %v10509_v59  ;;  %vm10759_vm15 = vmpackc.low %vm876_vm6, %vm842_vm9  ;;  %vm1013_vm9 = vcmp.eq.s32.totalorder %v8343_v37, %v10407_v58 }
 0x18f   :  { %7616 = vmatpush1.bf16.msk.msra.mxu1 %vm7615_vm13, %v8082_v13  ;;  %vm10771_vm14 = vmpackc.low %vm945_vm10, %vm911_vm8  ;;  %4321 = vmatprep.mubr.f32.mxu1 %v10067_v38  ;;  %vm369_vm8 = vcmp.eq.s32.totalorder %v8153_v11, %v10685_v60  ;;  %vm403_vm10 = vcmp.eq.s32.totalorder %v8156_v12, %v10685_v60  ;;  %vm368_vm13 = vcmp.eq.s32.totalorder %v8153_v11, %v10701_v10 }
 0x190   :  { %7584 = vmatpush1.bf16.msk.msra.mxu0 %vm10728_vm3, %v8082_v13  ;;  %vm910_vm3 = vcmp.eq.s32.totalorder %v8308_v32, %v10448_v30  ;;  %vm7617_vm6 = vmpackc.low %vm335_vm11, %vm301_vm1  ;;  %vm402_vm1 = vcmp.eq.s32.totalorder %v8156_v12, %v10701_v10 }
 0x191   :  { %7586 = vmatprep.subr.msk.bf16.mxu0 %vm10738_vm12, %v8082_v13  ;;  %7618 = vmatprep.subr.msk.bf16.mxu1 %vm7617_vm6, %v8082_v13  ;;  %vm7619_vm12 = vmpackc.low %vm334_vm0, %vm300_vm4  ;;  %vm978_vm4 = vcmp.eq.s32.totalorder %v8340_v36, %v10448_v30  ;;  %vm1047_vm0 = vcmp.eq.s32.totalorder %v8381_v40, %v10407_v58 }
 0x192   :  { %vm7591_vm2 = vmpackc.low %vm944_vm5, %vm910_vm3  ;;  %vm1081_vm3 = vcmp.eq.s32.totalorder %v8384_v41, %v10407_v58 }
 0x193   :  { %7620 = vmatpush1.bf16.msk.msra.mxu1 %vm7619_vm12, %v8082_v13  ;;  %vm7593_vm11 = vmpackc.low %vm1013_vm9, %vm979_vm7  ;;  %vm471_vm7 = vcmp.eq.s32.totalorder %v8185_v15, %v10685_v60  ;;  %vm436_vm12 = vcmp.eq.s32.totalorder %v8182_v14, %v10701_v10 }
 0x194   :  { %7588 = vmatpush1.bf16.msk.msra.mxu0 %vm10759_vm15, %v8082_v13  ;;  %vm1012_vm15 = vcmp.eq.s32.totalorder %v8343_v37, %v10448_v30  ;;  %vm7621_vm5 = vmpackc.low %vm403_vm10, %vm369_vm8  ;;  %vm470_vm8 = vcmp.eq.s32.totalorder %v8185_v15, %v10701_v10 }
 0x195   :  { %7590 = vmatprep.subr.msk.bf16.mxu0 %vm10771_vm14, %v8082_v13  ;;  %7622 = vmatprep.subr.msk.bf16.mxu1 %vm7621_vm5, %v8082_v13  ;;  %vm7623_vm6 = vmpackc.low %vm402_vm1, %vm368_vm13  ;;  %vm437_vm14 = vcmp.eq.s32.totalorder %v8182_v14, %v10685_v60  ;;  %vm1046_vm13 = vcmp.eq.s32.totalorder %v8381_v40, %v10448_v30  ;;  %vm1080_vm1 = vcmp.eq.s32.totalorder %v8384_v41, %v10448_v30 }
 0x196   :  { %vm7595_vm9 = vmpackc.low %vm1012_vm15, %vm978_vm4  ;;  %vm1149_vm4 = vcmp.eq.s32.totalorder %v8428_v45, %v10407_v58 }
 0x197   :  { %7624 = vmatpush1.bf16.msk.msra.mxu1 %vm7623_vm6, %v8082_v13  ;;  %vm7597_vm10 = vmpackc.low %vm1081_vm3, %vm1047_vm0  ;;  %vm539_vm0 = vcmp.eq.s32.totalorder %v8201_v17, %v10685_v60  ;;  %vm504_vm6 = vcmp.eq.s32.totalorder %v8198_v16, %v10701_v10 }
 0x198   :  { %7592 = vmatpush1.bf16.msk.msra.mxu0 %vm7591_vm2, %v8082_v13  ;;  %vm1115_vm2 = vcmp.eq.s32.totalorder %v8425_v44, %v10407_v58  ;;  %vm7625_vm15 = vmpackc.low %vm471_vm7, %vm437_vm14  ;;  %vm538_vm14 = vcmp.eq.s32.totalorder %v8201_v17, %v10701_v10 }
 0x199   :  { %7594 = vmatprep.subr.msk.bf16.mxu0 %vm7593_vm11, %v8082_v13  ;;  %7626 = vmatprep.subr.msk.bf16.mxu1 %vm7625_vm15, %v8082_v13  ;;  %vm7627_vm5 = vmpackc.low %vm470_vm8, %vm436_vm12  ;;  %vm505_vm11 = vcmp.eq.s32.totalorder %v8198_v16, %v10685_v60  ;;  %vm1148_vm12 = vcmp.eq.s32.totalorder %v8428_v45, %v10448_v30  ;;  %vm1183_vm8 = vcmp.eq.s32.totalorder %v8469_v48, %v10407_v58 }
 0x19a   :  { %vm10834_vm3 = vmpackc.low %vm1080_vm1, %vm1046_vm13  ;;  %vm1217_vm13 = vcmp.eq.s32.totalorder %v8472_v49, %v10407_v58 }
 0x19b   :  { %7628 = vmatpush1.bf16.msk.msra.mxu1 %vm7627_vm5, %v8082_v13  ;;  %vm10844_vm7 = vmpackc.low %vm1149_vm4, %vm1115_vm2  ;;  %vm573_vm2 = vcmp.eq.s32.totalorder %v8214_v18, %v10685_v60  ;;  %vm607_vm4 = vcmp.eq.s32.totalorder %v8217_v19, %v10685_v60  ;;  %vm572_vm5 = vcmp.eq.s32.totalorder %v8214_v18, %v10701_v10 }
 0x19c   :  { %7596 = vmatpush1.bf16.msk.msra.mxu0 %vm7595_vm9, %v8082_v13  ;;  %vm1114_vm9 = vcmp.eq.s32.totalorder %v8425_v44, %v10448_v30  ;;  %vm7629_vm1 = vmpackc.low %vm539_vm0, %vm505_vm11  ;;  %vm606_vm11 = vcmp.eq.s32.totalorder %v8217_v19, %v10701_v10 }
 0x19d   :  { %7598 = vmatprep.subr.msk.bf16.mxu0 %vm7597_vm10, %v8082_v13  ;;  %7630 = vmatprep.subr.msk.bf16.mxu1 %vm7629_vm1, %v8082_v13  ;;  %vm7631_vm10 = vmpackc.low %vm538_vm14, %vm504_vm6  ;;  %vm1216_vm6 = vcmp.eq.s32.totalorder %v8472_v49, %v10448_v30  ;;  %vm1251_vm14 = vcmp.eq.s32.totalorder %v8509_v52, %v10407_v58 }
 0x19e   :  { %vm10866_vm15 = vmpackc.low %vm1148_vm12, %vm1114_vm9  ;;  %vm1285_vm9 = vcmp.eq.s32.totalorder %v8516_v53, %v10407_v58 }
 0x19f   :  { %7632 = vmatpush1.bf16.msk.msra.mxu1 %vm7631_vm10, %v8082_v13  ;;  %vm10878_vm0 = vmpackc.low %vm1217_vm13, %vm1183_vm8  ;;  %vm641_vm8 = vcmp.eq.s32.totalorder %v8230_v20, %v10685_v60  ;;  %vm675_vm13 = vcmp.eq.s32.totalorder %v8233_v21, %v10685_v60  ;;  %vm640_vm10 = vcmp.eq.s32.totalorder %v8230_v20, %v10701_v10 }
 0x1a0   :  { %7600 = vmatpush1.bf16.msk.msra.mxu0 %vm10834_vm3, %v8082_v13  ;;  %vm1182_vm3 = vcmp.eq.s32.totalorder %v8469_v48, %v10448_v30  ;;  %vm7635_vm12 = vmpackc.low %vm606_vm11, %vm572_vm5  ;;  %vm1284_vm5 = vcmp.eq.s32.totalorder %v8516_v53, %v10448_v30  ;;  %vm235_vm11 = vcmp.eq.s32.totalorder %v8123_v1, %v10892_v5 }
 0x1a1   :  { %7602 = vmatprep.subr.msk.bf16.mxu0 %vm10844_vm7, %v8082_v13  ;;  %v3755_v31 = vpop.f32.mrb[2].mxu1  ;;  %vm7633_vm7 = vmpackc.low %vm607_vm4, %vm573_vm2  ;;  %vm674_vm2 = vcmp.eq.s32.totalorder %v8233_v21, %v10701_v10 }
 0x1a2   :  { %4689 = vst [vmem:[#allocation7 + $0x30] sm:$0xff] %v3755_v31  ;;  %7634 = vmatprep.subr.msk.bf16.mxu1 %vm7633_vm7, %v8082_v13  ;;  %v3757_v47 = vpop.f32.mrb[3].mxu1  ;;  %vm10905_vm1 = vmpackc.low %vm1216_vm6, %vm1182_vm3 }
 0x1a3   :  { %4690 = vst [vmem:[#allocation7 + $0x38] sm:$0xff] %v3757_v47  ;;  %7636 = vmatpush1.bf16.msk.msra.mxu1 %vm7635_vm12, %v8082_v13  ;;  %vm10923_vm4 = vmpackc.low %vm1285_vm9, %vm1251_vm14  ;;  %vm709_vm14 = vcmp.eq.s32.totalorder %v8246_v22, %v10685_v60  ;;  %vm743_vm9 = vcmp.eq.s32.totalorder %v8249_v23, %v10685_v60  ;;  %vm708_vm12 = vcmp.eq.s32.totalorder %v8246_v22, %v10701_v10 }
 0x1a4   :  { %7604 = vmatpush1.bf16.msk.msra.mxu0 %vm10866_vm15, %v8082_v13  ;;  %vm1250_vm15 = vcmp.eq.s32.totalorder %v8509_v52, %v10448_v30  ;;  %vm7637_vm3 = vmpackc.low %vm675_vm13, %vm641_vm8  ;;  %vm742_vm8 = vcmp.eq.s32.totalorder %v8249_v23, %v10701_v10 }
 0x1a5   :  { %7606 = vmatprep.subr.msk.bf16.mxu0 %vm10878_vm0, %v8082_v13  ;;  %vm269_vm0 = vcmp.eq.s32.totalorder %v8132_v4, %v10892_v5  ;;  %7638 = vmatprep.subr.msk.bf16.mxu1 %vm7637_vm3, %v8082_v13  ;;  %vm7639_vm6 = vmpackc.low %vm674_vm2, %vm640_vm10  ;;  %vm234_vm10 = vcmp.eq.s32.totalorder %v8123_v1, %v10933_v50  ;;  %vm303_vm2 = vcmp.eq.s32.totalorder %v8137_v6, %v10892_v5 }
 0x1a6   :  { %vm7611_vm7 = vmpackc.low %vm1284_vm5, %vm1250_vm15  ;;  %vm337_vm15 = vcmp.eq.s32.totalorder %v8140_v7, %v10892_v5 }
 0x1a7   :  { %7640 = vmatpush1.bf16.msk.msra.mxu1 %vm7639_vm6, %v8082_v13  ;;  %vm7677_vm13 = vmpackc.low %vm269_vm0, %vm235_vm11  ;;  %vm811_vm11 = vcmp.eq.s32.totalorder %v8265_v25, %v10685_v60  ;;  %vm776_vm6 = vcmp.eq.s32.totalorder %v8258_v24, %v10701_v10 }
 0x1a8   :  { %7608 = vmatpush1.bf16.msk.msra.mxu0 %vm10905_vm1, %v8082_v13  ;;  %vm268_vm1 = vcmp.eq.s32.totalorder %v8132_v4, %v10933_v50  ;;  %vm7641_vm5 = vmpackc.low %vm743_vm9, %vm709_vm14  ;;  %vm810_vm14 = vcmp.eq.s32.totalorder %v8265_v25, %v10701_v10 }
 0x1a9   :  { %7610 = vmatprep.subr.msk.bf16.mxu0 %vm10923_vm4, %v8082_v13  ;;  %7642 = vmatprep.subr.msk.bf16.mxu1 %vm7641_vm5, %v8082_v13  ;;  %vm7643_vm3 = vmpackc.low %vm742_vm8, %vm708_vm12  ;;  %vm777_vm4 = vcmp.eq.s32.totalorder %v8258_v24, %v10685_v60  ;;  %vm336_vm12 = vcmp.eq.s32.totalorder %v8140_v7, %v10933_v50  ;;  %vm371_vm8 = vcmp.eq.s32.totalorder %v8153_v11, %v10892_v5 }
 0x1aa   :  { %vm10972_vm0 = vmpackc.low %vm268_vm1, %vm234_vm10  ;;  %vm405_vm10 = vcmp.eq.s32.totalorder %v8156_v12, %v10892_v5 }
 0x1ab   :  { %7644 = vmatpush1.bf16.msk.msra.mxu1 %vm7643_vm3, %v8082_v13  ;;  %vm10982_vm9 = vmpackc.low %vm337_vm15, %vm303_vm2  ;;  %vm845_vm2 = vcmp.eq.s32.totalorder %v8280_v28, %v10685_v60  ;;  %vm879_vm15 = vcmp.eq.s32.totalorder %v8283_v29, %v10685_v60  ;;  %vm844_vm3 = vcmp.eq.s32.totalorder %v8280_v28, %v10701_v10 }
 0x1ac   :  { %7612 = vmatpush1.bf16.msk.msra.mxu0 %vm7611_vm7, %v8082_v13  ;;  %vm302_vm7 = vcmp.eq.s32.totalorder %v8137_v6, %v10933_v50  ;;  %vm7645_vm1 = vmpackc.low %vm811_vm11, %vm777_vm4  ;;  %vm878_vm4 = vcmp.eq.s32.totalorder %v8283_v29, %v10701_v10 }
 0x1ad   :  { %7678 = vmatprep.subr.msk.bf16.mxu0 %vm7677_vm13, %v8082_v13  ;;  %7646 = vmatprep.subr.msk.bf16.mxu1 %vm7645_vm1, %v8082_v13  ;;  %vm7647_vm13 = vmpackc.low %vm810_vm14, %vm776_vm6  ;;  %vm404_vm6 = vcmp.eq.s32.totalorder %v8156_v12, %v10933_v50  ;;  %vm439_vm14 = vcmp.eq.s32.totalorder %v8182_v14, %v10892_v5 }
 0x1ae   :  { %vm11003_vm5 = vmpackc.low %vm336_vm12, %vm302_vm7 }
 0x1af   :  { %4251 = vmatmul.mubr.f32.vlgmr.msra.gmra.mrb[10].mxu0 %v10509_v59  ;;  %7648 = vmatpush1.bf16.msk.msra.mxu1 %vm7647_vm13, %v8082_v13  ;;  %vm11015_vm11 = vmpackc.low %vm405_vm10, %vm371_vm8  ;;  %vm913_vm8 = vcmp.eq.s32.totalorder %v8308_v32, %v10685_v60  ;;  %vm947_vm10 = vcmp.eq.s32.totalorder %v8311_v33, %v10685_v60  ;;  %vm912_vm13 = vcmp.eq.s32.totalorder %v8308_v32, %v10701_v10 }
 0x1b0   :  { %7680 = vmatpush1.bf16.msk.msra.mxu0 %vm10972_vm0, %v8082_v13  ;;  %vm370_vm0 = vcmp.eq.s32.totalorder %v8153_v11, %v10933_v50  ;;  %4392 = vmatprep.mubr.f32.mxu0 %v11023_v0  ;;  %vm7649_vm7 = vmpackc.low %vm879_vm15, %vm845_vm2  ;;  %vm946_vm2 = vcmp.eq.s32.totalorder %v8311_v33, %v10701_v10 }
 0x1b1   :  { %7682 = vmatprep.subr.msk.bf16.mxu0 %vm10982_vm9, %v8082_v13  ;;  %vm473_vm9 = vcmp.eq.s32.totalorder %v8185_v15, %v10892_v5  ;;  %7650 = vmatprep.subr.msk.bf16.mxu1 %vm7649_vm7, %v8082_v13  ;;  %vm7651_vm12 = vmpackc.low %vm878_vm4, %vm844_vm3  ;;  %vm438_vm3 = vcmp.eq.s32.totalorder %v8182_v14, %v10933_v50  ;;  %vm507_vm4 = vcmp.eq.s32.totalorder %v8198_v16, %v10892_v5 }
 0x1b2   :  { %vm7687_vm1 = vmpackc.low %vm404_vm6, %vm370_vm0  ;;  %vm541_vm0 = vcmp.eq.s32.totalorder %v8201_v17, %v10892_v5 }
 0x1b3   :  { %7652 = vmatpush1.bf16.msk.msra.mxu1 %vm7651_vm12, %v8082_v13  ;;  %vm7689_vm15 = vmpackc.low %vm473_vm9, %vm439_vm14  ;;  %vm1015_vm14 = vcmp.eq.s32.totalorder %v8343_v37, %v10685_v60  ;;  %vm980_vm12 = vcmp.eq.s32.totalorder %v8340_v36, %v10701_v10 }
 0x1b4   :  { %7684 = vmatpush1.bf16.msk.msra.mxu0 %vm11003_vm5, %v8082_v13  ;;  %vm472_vm5 = vcmp.eq.s32.totalorder %v8185_v15, %v10933_v50  ;;  %vm7653_vm6 = vmpackc.low %vm947_vm10, %vm913_vm8  ;;  %vm1014_vm8 = vcmp.eq.s32.totalorder %v8343_v37, %v10701_v10 }
 0x1b5   :  { %7686 = vmatprep.subr.msk.bf16.mxu0 %vm11015_vm11, %v8082_v13  ;;  %7654 = vmatprep.subr.msk.bf16.mxu1 %vm7653_vm6, %v8082_v13  ;;  %vm7655_vm7 = vmpackc.low %vm946_vm2, %vm912_vm13  ;;  %vm981_vm11 = vcmp.eq.s32.totalorder %v8340_v36, %v10685_v60  ;;  %vm506_vm13 = vcmp.eq.s32.totalorder %v8198_v16, %v10933_v50  ;;  %vm540_vm2 = vcmp.eq.s32.totalorder %v8201_v17, %v10933_v50 }
 0x1b6   :  { %vm7691_vm9 = vmpackc.low %vm472_vm5, %vm438_vm3  ;;  %vm609_vm3 = vcmp.eq.s32.totalorder %v8217_v19, %v10892_v5 }
 0x1b7   :  { %7656 = vmatpush1.bf16.msk.msra.mxu1 %vm7655_vm7, %v8082_v13  ;;  %vm7693_vm10 = vmpackc.low %vm541_vm0, %vm507_vm4  ;;  %vm1083_vm4 = vcmp.eq.s32.totalorder %v8384_v41, %v10685_v60  ;;  %vm1048_vm7 = vcmp.eq.s32.totalorder %v8381_v40, %v10701_v10 }
 0x1b8   :  { %7688 = vmatpush1.bf16.msk.msra.mxu0 %vm7687_vm1, %v8082_v13  ;;  %vm575_vm1 = vcmp.eq.s32.totalorder %v8214_v18, %v10892_v5  ;;  %vm7657_vm5 = vmpackc.low %vm1015_vm14, %vm981_vm11  ;;  %vm1082_vm11 = vcmp.eq.s32.totalorder %v8384_v41, %v10701_v10 }
 0x1b9   :  { %7690 = vmatprep.subr.msk.bf16.mxu0 %vm7689_vm15, %v8082_v13  ;;  %7658 = vmatprep.subr.msk.bf16.mxu1 %vm7657_vm5, %v8082_v13  ;;  %vm7659_vm6 = vmpackc.low %vm1014_vm8, %vm980_vm12  ;;  %vm1049_vm15 = vcmp.eq.s32.totalorder %v8381_v40, %v10685_v60  ;;  %vm574_vm12 = vcmp.eq.s32.totalorder %v8214_v18, %v10933_v50  ;;  %vm608_vm8 = vcmp.eq.s32.totalorder %v8217_v19, %v10933_v50 }
 0x1ba   :  { %vm7695_vm0 = vmpackc.low %vm540_vm2, %vm506_vm13  ;;  %vm677_vm13 = vcmp.eq.s32.totalorder %v8233_v21, %v10892_v5 }
 0x1bb   :  { %7660 = vmatpush1.bf16.msk.msra.mxu1 %vm7659_vm6, %v8082_v13  ;;  %vm7697_vm14 = vmpackc.low %vm609_vm3, %vm575_vm1  ;;  %vm1151_vm1 = vcmp.eq.s32.totalorder %v8428_v45, %v10685_v60  ;;  %vm1116_vm6 = vcmp.eq.s32.totalorder %v8425_v44, %v10701_v10 }
 0x1bc   :  { %7692 = vmatpush1.bf16.msk.msra.mxu0 %vm7691_vm9, %v8082_v13  ;;  %vm643_vm9 = vcmp.eq.s32.totalorder %v8230_v20, %v10892_v5  ;;  %vm7661_vm2 = vmpackc.low %vm1083_vm4, %vm1049_vm15  ;;  %vm1150_vm15 = vcmp.eq.s32.totalorder %v8428_v45, %v10701_v10 }
 0x1bd   :  { %7694 = vmatprep.subr.msk.bf16.mxu0 %vm7693_vm10, %v8082_v13  ;;  %7662 = vmatprep.subr.msk.bf16.mxu1 %vm7661_vm2, %v8082_v13  ;;  %vm7663_vm5 = vmpackc.low %vm1082_vm11, %vm1048_vm7  ;;  %vm1117_vm10 = vcmp.eq.s32.totalorder %v8425_v44, %v10685_v60  ;;  %vm676_vm7 = vcmp.eq.s32.totalorder %v8233_v21, %v10933_v50  ;;  %vm711_vm11 = vcmp.eq.s32.totalorder %v8246_v22, %v10892_v5 }
 0x1be   :  { %vm11103_vm3 = vmpackc.low %vm608_vm8, %vm574_vm12  ;;  %vm745_vm12 = vcmp.eq.s32.totalorder %v8249_v23, %v10892_v5 }
 0x1bf   :  { %7664 = vmatpush1.bf16.msk.msra.mxu1 %vm7663_vm5, %v8082_v13  ;;  %vm11113_vm4 = vmpackc.low %vm677_vm13, %vm643_vm9  ;;  %vm1185_vm9 = vcmp.eq.s32.totalorder %v8469_v48, %v10685_v60  ;;  %vm1219_vm13 = vcmp.eq.s32.totalorder %v8472_v49, %v10685_v60  ;;  %vm1184_vm5 = vcmp.eq.s32.totalorder %v8469_v48, %v10701_v10 }
 0x1c0   :  { %7696 = vmatpush1.bf16.msk.msra.mxu0 %vm7695_vm0, %v8082_v13  ;;  %vm642_vm0 = vcmp.eq.s32.totalorder %v8230_v20, %v10933_v50  ;;  %vm7665_vm8 = vmpackc.low %vm1151_vm1, %vm1117_vm10  ;;  %vm1218_vm10 = vcmp.eq.s32.totalorder %v8472_v49, %v10701_v10 }
 0x1c1   :  { %7698 = vmatprep.subr.msk.bf16.mxu0 %vm7697_vm14, %v8082_v13  ;;  %7666 = vmatprep.subr.msk.bf16.mxu1 %vm7665_vm8, %v8082_v13  ;;  %vm7667_vm14 = vmpackc.low %vm1150_vm15, %vm1116_vm6  ;;  %vm744_vm6 = vcmp.eq.s32.totalorder %v8249_v23, %v10933_v50  ;;  %vm779_vm15 = vcmp.eq.s32.totalorder %v8258_v24, %v10892_v5 }
 0x1c2   :  { %v3826_v8 = vpop.f32.mrb[4].mxu0  ;;  %vm11133_vm2 = vmpackc.low %vm676_vm7, %vm642_vm0 }
 0x1c3   :  { %4691 = vst [vmem:[#allocation7 + $0x40] sm:$0xff] %v3826_v8  ;;  %v3828_v34 = vpop.f32.mrb[5].mxu0  ;;  %7668 = vmatpush1.bf16.msk.msra.mxu1 %vm7667_vm14, %v8082_v13  ;;  %vm11151_vm1 = vmpackc.low %vm745_vm12, %vm711_vm11  ;;  %vm1253_vm11 = vcmp.eq.s32.totalorder %v8509_v52, %v10685_v60  ;;  %vm1287_vm12 = vcmp.eq.s32.totalorder %v8516_v53, %v10685_v60  ;;  %vm1252_vm14 = vcmp.eq.s32.totalorder %v8509_v52, %v10701_v10 }
 0x1c4   :  { %4692 = vst [vmem:[#allocation7 + $0x48] sm:$0xff] %v3828_v34  ;;  %7700 = vmatpush1.bf16.msk.msra.mxu0 %vm11103_vm3, %v8082_v13  ;;  %vm710_vm3 = vcmp.eq.s32.totalorder %v8246_v22, %v10933_v50  ;;  %vm7669_vm0 = vmpackc.low %vm1219_vm13, %vm1185_vm9  ;;  %vm1286_vm9 = vcmp.eq.s32.totalorder %v8516_v53, %v10701_v10 }
 0x1c5   :  { %7702 = vmatprep.subr.msk.bf16.mxu0 %vm11113_vm4, %v8082_v13  ;;  %vm813_vm4 = vcmp.eq.s32.totalorder %v8265_v25, %v10892_v5  ;;  %7670 = vmatprep.subr.msk.bf16.mxu1 %vm7669_vm0, %v8082_v13  ;;  %vm7671_vm7 = vmpackc.low %vm1218_vm10, %vm1184_vm5  ;;  %vm812_vm5 = vcmp.eq.s32.totalorder %v8265_v25, %v10933_v50  ;;  %vm847_vm10 = vcmp.eq.s32.totalorder %v8280_v28, %v10892_v5 }
 0x1c6   :  { %vm11175_vm8 = vmpackc.low %vm744_vm6, %vm710_vm3  ;;  %vm881_vm3 = vcmp.eq.s32.totalorder %v8283_v29, %v10892_v5 }
 0x1c7   :  { %7672 = vmatpush1.bf16.msk.msra.mxu1 %vm7671_vm7, %v8082_v13  ;;  %vm7709_vm13 = vmpackc.low %vm813_vm4, %vm779_vm15  ;;  %vm237_vm15 = vcmp.eq.s32.totalorder %v8123_v1, %v11170_v62  ;;  %vm271_vm4 = vcmp.eq.s32.totalorder %v8132_v4, %v11170_v62  ;;  %vm236_vm7 = vcmp.eq.s32.totalorder %v8123_v1, %v11186_v26 }
 0x1c8   :  { %7704 = vmatpush1.bf16.msk.msra.mxu0 %vm11133_vm2, %v8082_v13  ;;  %vm778_vm2 = vcmp.eq.s32.totalorder %v8258_v24, %v10933_v50  ;;  %vm7675_vm6 = vmpackc.low %vm1286_vm9, %vm1252_vm14  ;;  %vm880_vm14 = vcmp.eq.s32.totalorder %v8283_v29, %v10933_v50  ;;  %vm915_vm9 = vcmp.eq.s32.totalorder %v8308_v32, %v10892_v5 }
 0x1c9   :  { %7706 = vmatprep.subr.msk.bf16.mxu0 %vm11151_vm1, %v8082_v13  ;;  %vm7673_vm1 = vmpackc.low %vm1287_vm12, %vm1253_vm11  ;;  %vm270_vm11 = vcmp.eq.s32.totalorder %v8132_v4, %v11186_v26 }
 0x1ca   :  { %7674 = vmatprep.subr.msk.bf16.mxu1 %vm7673_vm1, %v8082_v13  ;;  %vm11213_vm0 = vmpackc.low %vm812_vm5, %vm778_vm2  ;;  %vm949_vm2 = vcmp.eq.s32.totalorder %v8311_v33, %v10892_v5 }
 0x1cb   :  { %7676 = vmatpush1.bf16.msk.msra.mxu1 %vm7675_vm6, %v8082_v13  ;;  %vm11223_vm12 = vmpackc.low %vm881_vm3, %vm847_vm10  ;;  %vm305_vm10 = vcmp.eq.s32.totalorder %v8137_v6, %v11170_v62  ;;  %vm339_vm3 = vcmp.eq.s32.totalorder %v8140_v7, %v11170_v62  ;;  %vm304_vm6 = vcmp.eq.s32.totalorder %v8137_v6, %v11186_v26 }
 0x1cc   :  { %7708 = vmatpush1.bf16.msk.msra.mxu0 %vm11175_vm8, %v8082_v13  ;;  %vm846_vm8 = vcmp.eq.s32.totalorder %v8280_v28, %v10933_v50  ;;  %vm7741_vm5 = vmpackc.low %vm271_vm4, %vm237_vm15  ;;  %vm338_vm15 = vcmp.eq.s32.totalorder %v8140_v7, %v11186_v26 }
 0x1cd   :  { %7710 = vmatprep.subr.msk.bf16.mxu0 %vm7709_vm13, %v8082_v13  ;;  %7742 = vmatprep.subr.msk.bf16.mxu1 %vm7741_vm5, %v8082_v13  ;;  %vm7743_vm13 = vmpackc.low %vm270_vm11, %vm236_vm7  ;;  %vm948_vm7 = vcmp.eq.s32.totalorder %v8311_v33, %v10933_v50  ;;  %vm983_vm11 = vcmp.eq.s32.totalorder %v8340_v36, %v10892_v5 }
 0x1ce   :  { %4322 = vmatmul.mubr.f32.vlgmr.msra.gmra.mrb[10].mxu1 %v10509_v59  ;;  %vm11244_vm1 = vmpackc.low %vm880_vm14, %vm846_vm8  ;;  %vm1017_vm8 = vcmp.eq.s32.totalorder %v8343_v37, %v10892_v5  ;;  %v40_v59 = vld [vmem:[#allocation2 + $0x20] sm:$0x3] }
 0x1cf   :  { %7744 = vmatpush1.bf16.msk.msra.mxu1 %vm7743_vm13, %v8082_v13  ;;  %vm11256_vm4 = vmpackc.low %vm949_vm2, %vm915_vm9  ;;  %4463 = vmatprep.mubr.f32.mxu1 %v11023_v0  ;;  %vm373_vm9 = vcmp.eq.s32.totalorder %v8153_v11, %v11170_v62  ;;  %vm407_vm2 = vcmp.eq.s32.totalorder %v8156_v12, %v11170_v62  ;;  %vm372_vm13 = vcmp.eq.s32.totalorder %v8153_v11, %v11186_v26 }
 0x1d0   :  { %7712 = vmatpush1.bf16.msk.msra.mxu0 %vm11213_vm0, %v8082_v13  ;;  %vm914_vm0 = vcmp.eq.s32.totalorder %v8308_v32, %v10933_v50  ;;  %vm7745_vm14 = vmpackc.low %vm339_vm3, %vm305_vm10  ;;  %vm406_vm10 = vcmp.eq.s32.totalorder %v8156_v12, %v11186_v26  ;;  %v11885_v57 = vrot.slane %v40_v59, %v8129_v3 }
 0x1d1   :  { %7714 = vmatprep.subr.msk.bf16.mxu0 %vm11223_vm12, %v8082_v13  ;;  %7746 = vmatprep.subr.msk.bf16.mxu1 %vm7745_vm14, %v8082_v13  ;;  %vm7747_vm12 = vmpackc.low %vm338_vm15, %vm304_vm6  ;;  %vm982_vm6 = vcmp.eq.s32.totalorder %v8340_v36, %v10933_v50  ;;  %vm1051_vm15 = vcmp.eq.s32.totalorder %v8381_v40, %v10892_v5 }
 0x1d2   :  { %vm7719_vm5 = vmpackc.low %vm948_vm7, %vm914_vm0  ;;  %vm1085_vm0 = vcmp.eq.s32.totalorder %v8384_v41, %v10892_v5 }
 0x1d3   :  { %7748 = vmatpush1.bf16.msk.msra.mxu1 %vm7747_vm12, %v8082_v13  ;;  %vm7721_vm3 = vmpackc.low %vm1017_vm8, %vm983_vm11  ;;  %vm475_vm11 = vcmp.eq.s32.totalorder %v8185_v15, %v11170_v62  ;;  %vm440_vm12 = vcmp.eq.s32.totalorder %v8182_v14, %v11186_v26 }
 0x1d4   :  { %7716 = vmatpush1.bf16.msk.msra.mxu0 %vm11244_vm1, %v8082_v13  ;;  %vm1016_vm1 = vcmp.eq.s32.totalorder %v8343_v37, %v10933_v50  ;;  %vm7749_vm7 = vmpackc.low %vm407_vm2, %vm373_vm9  ;;  %vm474_vm9 = vcmp.eq.s32.totalorder %v8185_v15, %v11186_v26 }
 0x1d5   :  { %7718 = vmatprep.subr.msk.bf16.mxu0 %vm11256_vm4, %v8082_v13  ;;  %7750 = vmatprep.subr.msk.bf16.mxu1 %vm7749_vm7, %v8082_v13  ;;  %vm7751_vm14 = vmpackc.low %vm406_vm10, %vm372_vm13  ;;  %vm441_vm4 = vcmp.eq.s32.totalorder %v8182_v14, %v11170_v62  ;;  %vm1050_vm13 = vcmp.eq.s32.totalorder %v8381_v40, %v10933_v50  ;;  %vm1084_vm10 = vcmp.eq.s32.totalorder %v8384_v41, %v10933_v50 }
 0x1d6   :  { %vm7723_vm8 = vmpackc.low %vm1016_vm1, %vm982_vm6  ;;  %vm1153_vm6 = vcmp.eq.s32.totalorder %v8428_v45, %v10892_v5 }
 0x1d7   :  { %7752 = vmatpush1.bf16.msk.msra.mxu1 %vm7751_vm14, %v8082_v13  ;;  %vm7725_vm2 = vmpackc.low %vm1085_vm0, %vm1051_vm15  ;;  %vm543_vm15 = vcmp.eq.s32.totalorder %v8201_v17, %v11170_v62  ;;  %vm508_vm14 = vcmp.eq.s32.totalorder %v8198_v16, %v11186_v26 }
 0x1d8   :  { %7720 = vmatpush1.bf16.msk.msra.mxu0 %vm7719_vm5, %v8082_v13  ;;  %vm1119_vm5 = vcmp.eq.s32.totalorder %v8425_v44, %v10892_v5  ;;  %vm7753_vm1 = vmpackc.low %vm475_vm11, %vm441_vm4  ;;  %vm542_vm4 = vcmp.eq.s32.totalorder %v8201_v17, %v11186_v26 }
 0x1d9   :  { %7722 = vmatprep.subr.msk.bf16.mxu0 %vm7721_vm3, %v8082_v13  ;;  %7754 = vmatprep.subr.msk.bf16.mxu1 %vm7753_vm1, %v8082_v13  ;;  %vm7755_vm7 = vmpackc.low %vm474_vm9, %vm440_vm12  ;;  %vm509_vm3 = vcmp.eq.s32.totalorder %v8198_v16, %v11170_v62  ;;  %vm1118_vm12 = vcmp.eq.s32.totalorder %v8425_v44, %v10933_v50  ;;  %vm1152_vm9 = vcmp.eq.s32.totalorder %v8428_v45, %v10933_v50 }
 0x1da   :  { %vm7727_vm0 = vmpackc.low %vm1084_vm10, %vm1050_vm13  ;;  %vm1221_vm13 = vcmp.eq.s32.totalorder %v8472_v49, %v10892_v5 }
 0x1db   :  { %7756 = vmatpush1.bf16.msk.msra.mxu1 %vm7755_vm7, %v8082_v13  ;;  %vm7729_vm11 = vmpackc.low %vm1153_vm6, %vm1119_vm5  ;;  %vm611_vm5 = vcmp.eq.s32.totalorder %v8217_v19, %v11170_v62  ;;  %vm576_vm7 = vcmp.eq.s32.totalorder %v8214_v18, %v11186_v26 }
 0x1dc   :  { %7724 = vmatpush1.bf16.msk.msra.mxu0 %vm7723_vm8, %v8082_v13  ;;  %vm1187_vm8 = vcmp.eq.s32.totalorder %v8469_v48, %v10892_v5  ;;  %vm7757_vm10 = vmpackc.low %vm543_vm15, %vm509_vm3  ;;  %vm610_vm3 = vcmp.eq.s32.totalorder %v8217_v19, %v11186_v26 }
 0x1dd   :  { %7726 = vmatprep.subr.msk.bf16.mxu0 %vm7725_vm2, %v8082_v13  ;;  %7758 = vmatprep.subr.msk.bf16.mxu1 %vm7757_vm10, %v8082_v13  ;;  %vm7759_vm1 = vmpackc.low %vm542_vm4, %vm508_vm14  ;;  %vm577_vm2 = vcmp.eq.s32.totalorder %v8214_v18, %v11170_v62  ;;  %vm1220_vm14 = vcmp.eq.s32.totalorder %v8472_v49, %v10933_v50  ;;  %vm1255_vm4 = vcmp.eq.s32.totalorder %v8509_v52, %v10892_v5 }
 0x1de   :  { %vm11339_vm6 = vmpackc.low %vm1152_vm9, %vm1118_vm12  ;;  %vm1289_vm12 = vcmp.eq.s32.totalorder %v8516_v53, %v10892_v5 }
 0x1df   :  { %7760 = vmatpush1.bf16.msk.msra.mxu1 %vm7759_vm1, %v8082_v13  ;;  %vm11349_vm15 = vmpackc.low %vm1221_vm13, %vm1187_vm8  ;;  %vm645_vm8 = vcmp.eq.s32.totalorder %v8230_v20, %v11170_v62  ;;  %vm679_vm13 = vcmp.eq.s32.totalorder %v8233_v21, %v11170_v62  ;;  %vm644_vm1 = vcmp.eq.s32.totalorder %v8230_v20, %v11186_v26 }
 0x1e0   :  { %7728 = vmatpush1.bf16.msk.msra.mxu0 %vm7727_vm0, %v8082_v13  ;;  %vm1186_vm0 = vcmp.eq.s32.totalorder %v8469_v48, %v10933_v50  ;;  %vm7763_vm9 = vmpackc.low %vm610_vm3, %vm576_vm7  ;;  %vm1288_vm7 = vcmp.eq.s32.totalorder %v8516_v53, %v10933_v50  ;;  %vm239_vm3 = vcmp.eq.s32.totalorder %v8123_v1, %v11363_v55 }
 0x1e1   :  { %7730 = vmatprep.subr.msk.bf16.mxu0 %vm7729_vm11, %v8082_v13  ;;  %v3897_v51 = vpop.f32.mrb[4].mxu1  ;;  %vm7761_vm11 = vmpackc.low %vm611_vm5, %vm577_vm2  ;;  %vm678_vm2 = vcmp.eq.s32.totalorder %v8233_v21, %v11186_v26 }
 0x1e2   :  { %4693 = vst [vmem:[#allocation7 + $0x50] sm:$0xff] %v3897_v51  ;;  %7762 = vmatprep.subr.msk.bf16.mxu1 %vm7761_vm11, %v8082_v13  ;;  %v3899_v58 = vpop.f32.mrb[5].mxu1  ;;  %vm11376_vm10 = vmpackc.low %vm1220_vm14, %vm1186_vm0  ;;  %v11845_v51 = vrot.slane %v40_v59, %v8126_v2 }
 0x1e3   :  { %4694 = vst [vmem:[#allocation7 + $0x58] sm:$0xff] %v3899_v58  ;;  %7764 = vmatpush1.bf16.msk.msra.mxu1 %vm7763_vm9, %v8082_v13  ;;  %vm11394_vm5 = vmpackc.low %vm1289_vm12, %vm1255_vm4  ;;  %vm713_vm4 = vcmp.eq.s32.totalorder %v8246_v22, %v11170_v62  ;;  %vm747_vm12 = vcmp.eq.s32.totalorder %v8249_v23, %v11170_v62  ;;  %vm712_vm9 = vcmp.eq.s32.totalorder %v8246_v22, %v11186_v26 }
 0x1e4   :  { %7732 = vmatpush1.bf16.msk.msra.mxu0 %vm11339_vm6, %v8082_v13  ;;  %vm1254_vm6 = vcmp.eq.s32.totalorder %v8509_v52, %v10933_v50  ;;  %vm7765_vm0 = vmpackc.low %vm679_vm13, %vm645_vm8  ;;  %vm746_vm8 = vcmp.eq.s32.totalorder %v8249_v23, %v11186_v26  ;;  %v11465_v50 = vld [vmem:[#allocation5] sm:$0xff] }
 0x1e5   :  { %7734 = vmatprep.subr.msk.bf16.mxu0 %vm11349_vm15, %v8082_v13  ;;  %vm273_vm15 = vcmp.eq.s32.totalorder %v8132_v4, %v11363_v55  ;;  %7766 = vmatprep.subr.msk.bf16.mxu1 %vm7765_vm0, %v8082_v13  ;;  %vm7767_vm14 = vmpackc.low %vm678_vm2, %vm644_vm1  ;;  %vm238_vm1 = vcmp.eq.s32.totalorder %v8123_v1, %v11404_v56  ;;  %vm307_vm2 = vcmp.eq.s32.totalorder %v8137_v6, %v11363_v55 }
 0x1e6   :  { %vm7739_vm11 = vmpackc.low %vm1288_vm7, %vm1254_vm6  ;;  %vm341_vm6 = vcmp.eq.s32.totalorder %v8140_v7, %v11363_v55 }
 0x1e7   :  { %7768 = vmatpush1.bf16.msk.msra.mxu1 %vm7767_vm14, %v8082_v13  ;;  %vm7805_vm13 = vmpackc.low %vm273_vm15, %vm239_vm3  ;;  %vm815_vm3 = vcmp.eq.s32.totalorder %v8265_v25, %v11170_v62  ;;  %vm780_vm14 = vcmp.eq.s32.totalorder %v8258_v24, %v11186_v26 }
 0x1e8   :  { %7736 = vmatpush1.bf16.msk.msra.mxu0 %vm11376_vm10, %v8082_v13  ;;  %vm272_vm10 = vcmp.eq.s32.totalorder %v8132_v4, %v11404_v56  ;;  %vm7769_vm7 = vmpackc.low %vm747_vm12, %vm713_vm4  ;;  %vm814_vm4 = vcmp.eq.s32.totalorder %v8265_v25, %v11186_v26 }
 0x1e9   :  { %7738 = vmatprep.subr.msk.bf16.mxu0 %vm11394_vm5, %v8082_v13  ;;  %7770 = vmatprep.subr.msk.bf16.mxu1 %vm7769_vm7, %v8082_v13  ;;  %vm7771_vm0 = vmpackc.low %vm746_vm8, %vm712_vm9  ;;  %vm781_vm5 = vcmp.eq.s32.totalorder %v8258_v24, %v11170_v62  ;;  %vm340_vm9 = vcmp.eq.s32.totalorder %v8140_v7, %v11404_v56  ;;  %vm375_vm8 = vcmp.eq.s32.totalorder %v8153_v11, %v11363_v55 }
 0x1ea   :  { %vm11443_vm15 = vmpackc.low %vm272_vm10, %vm238_vm1  ;;  %vm409_vm1 = vcmp.eq.s32.totalorder %v8156_v12, %v11363_v55 }
 0x1eb   :  { %7772 = vmatpush1.bf16.msk.msra.mxu1 %vm7771_vm0, %v8082_v13  ;;  %vm11453_vm12 = vmpackc.low %vm341_vm6, %vm307_vm2  ;;  %vm849_vm2 = vcmp.eq.s32.totalorder %v8280_v28, %v11170_v62  ;;  %vm883_vm6 = vcmp.eq.s32.totalorder %v8283_v29, %v11170_v62  ;;  %vm848_vm0 = vcmp.eq.s32.totalorder %v8280_v28, %v11186_v26 }
 0x1ec   :  { %7740 = vmatpush1.bf16.msk.msra.mxu0 %vm7739_vm11, %v8082_v13  ;;  %vm306_vm11 = vcmp.eq.s32.totalorder %v8137_v6, %v11404_v56  ;;  %vm7773_vm10 = vmpackc.low %vm815_vm3, %vm781_vm5  ;;  %vm882_vm5 = vcmp.eq.s32.totalorder %v8283_v29, %v11186_v26 }
 0x1ed   :  { %7806 = vmatprep.subr.msk.bf16.mxu0 %vm7805_vm13, %v8082_v13  ;;  %7774 = vmatprep.subr.msk.bf16.mxu1 %vm7773_vm10, %v8082_v13  ;;  %vm7775_vm13 = vmpackc.low %vm814_vm4, %vm780_vm14  ;;  %vm408_vm14 = vcmp.eq.s32.totalorder %v8156_v12, %v11404_v56  ;;  %vm443_vm4 = vcmp.eq.s32.totalorder %v8182_v14, %v11363_v55 }
 0x1ee   :  { %vm11476_vm7 = vmpackc.low %vm340_vm9, %vm306_vm11 }
 0x1ef   :  { %4393 = vmatmul.mubr.f32.vlgmr.msra.gmra.mrb[12].mxu0 %v11465_v50  ;;  %7776 = vmatpush1.bf16.msk.msra.mxu1 %vm7775_vm13, %v8082_v13  ;;  %vm11491_vm3 = vmpackc.low %vm409_vm1, %vm375_vm8  ;;  %vm917_vm8 = vcmp.eq.s32.totalorder %v8308_v32, %v11170_v62  ;;  %vm951_vm1 = vcmp.eq.s32.totalorder %v8311_v33, %v11170_v62  ;;  %vm916_vm13 = vcmp.eq.s32.totalorder %v8308_v32, %v11186_v26 }
 0x1f0   :  { %7808 = vmatpush1.bf16.msk.msra.mxu0 %vm11443_vm15, %v8082_v13  ;;  %vm374_vm15 = vcmp.eq.s32.totalorder %v8153_v11, %v11404_v56  ;;  %4534 = vmatprep.mubr.f32.mxu0 %v11023_v0  ;;  %vm7777_vm11 = vmpackc.low %vm883_vm6, %vm849_vm2  ;;  %vm950_vm2 = vcmp.eq.s32.totalorder %v8311_v33, %v11186_v26 }
 0x1f1   :  { %7810 = vmatprep.subr.msk.bf16.mxu0 %vm11453_vm12, %v8082_v13  ;;  %vm477_vm12 = vcmp.eq.s32.totalorder %v8185_v15, %v11363_v55  ;;  %7778 = vmatprep.subr.msk.bf16.mxu1 %vm7777_vm11, %v8082_v13  ;;  %vm7779_vm9 = vmpackc.low %vm882_vm5, %vm848_vm0  ;;  %vm442_vm0 = vcmp.eq.s32.totalorder %v8182_v14, %v11404_v56  ;;  %vm511_vm5 = vcmp.eq.s32.totalorder %v8198_v16, %v11363_v55 }
 0x1f2   :  { %vm7815_vm10 = vmpackc.low %vm408_vm14, %vm374_vm15  ;;  %vm545_vm15 = vcmp.eq.s32.totalorder %v8201_v17, %v11363_v55 }
 0x1f3   :  { %7780 = vmatpush1.bf16.msk.msra.mxu1 %vm7779_vm9, %v8082_v13  ;;  %vm7817_vm6 = vmpackc.low %vm477_vm12, %vm443_vm4  ;;  %vm1019_vm4 = vcmp.eq.s32.totalorder %v8343_v37, %v11170_v62  ;;  %vm984_vm9 = vcmp.eq.s32.totalorder %v8340_v36, %v11186_v26 }
 0x1f4   :  { %7812 = vmatpush1.bf16.msk.msra.mxu0 %vm11476_vm7, %v8082_v13  ;;  %vm476_vm7 = vcmp.eq.s32.totalorder %v8185_v15, %v11404_v56  ;;  %vm7781_vm14 = vmpackc.low %vm951_vm1, %vm917_vm8  ;;  %vm1018_vm8 = vcmp.eq.s32.totalorder %v8343_v37, %v11186_v26 }
 0x1f5   :  { %7814 = vmatprep.subr.msk.bf16.mxu0 %vm11491_vm3, %v8082_v13  ;;  %7782 = vmatprep.subr.msk.bf16.mxu1 %vm7781_vm14, %v8082_v13  ;;  %vm7783_vm11 = vmpackc.low %vm950_vm2, %vm916_vm13  ;;  %vm985_vm3 = vcmp.eq.s32.totalorder %v8340_v36, %v11170_v62  ;;  %vm510_vm13 = vcmp.eq.s32.totalorder %v8198_v16, %v11404_v56  ;;  %vm544_vm2 = vcmp.eq.s32.totalorder %v8201_v17, %v11404_v56 }
 0x1f6   :  { %vm7819_vm12 = vmpackc.low %vm476_vm7, %vm442_vm0  ;;  %vm613_vm0 = vcmp.eq.s32.totalorder %v8217_v19, %v11363_v55 }
 0x1f7   :  { %7784 = vmatpush1.bf16.msk.msra.mxu1 %vm7783_vm11, %v8082_v13  ;;  %vm7821_vm1 = vmpackc.low %vm545_vm15, %vm511_vm5  ;;  %vm1087_vm5 = vcmp.eq.s32.totalorder %v8384_v41, %v11170_v62  ;;  %vm1052_vm11 = vcmp.eq.s32.totalorder %v8381_v40, %v11186_v26 }
 0x1f8   :  { %7816 = vmatpush1.bf16.msk.msra.mxu0 %vm7815_vm10, %v8082_v13  ;;  %vm579_vm10 = vcmp.eq.s32.totalorder %v8214_v18, %v11363_v55  ;;  %vm7785_vm7 = vmpackc.low %vm1019_vm4, %vm985_vm3  ;;  %vm1086_vm3 = vcmp.eq.s32.totalorder %v8384_v41, %v11186_v26 }
 0x1f9   :  { %7818 = vmatprep.subr.msk.bf16.mxu0 %vm7817_vm6, %v8082_v13  ;;  %7786 = vmatprep.subr.msk.bf16.mxu1 %vm7785_vm7, %v8082_v13  ;;  %vm7787_vm14 = vmpackc.low %vm1018_vm8, %vm984_vm9  ;;  %vm1053_vm6 = vcmp.eq.s32.totalorder %v8381_v40, %v11170_v62  ;;  %vm578_vm9 = vcmp.eq.s32.totalorder %v8214_v18, %v11404_v56  ;;  %vm612_vm8 = vcmp.eq.s32.totalorder %v8217_v19, %v11404_v56 }
 0x1fa   :  { %vm7823_vm15 = vmpackc.low %vm544_vm2, %vm510_vm13  ;;  %vm681_vm13 = vcmp.eq.s32.totalorder %v8233_v21, %v11363_v55 }
 0x1fb   :  { %7788 = vmatpush1.bf16.msk.msra.mxu1 %vm7787_vm14, %v8082_v13  ;;  %vm7825_vm4 = vmpackc.low %vm613_vm0, %vm579_vm10  ;;  %vm1155_vm10 = vcmp.eq.s32.totalorder %v8428_v45, %v11170_v62  ;;  %vm1120_vm14 = vcmp.eq.s32.totalorder %v8425_v44, %v11186_v26 }
 0x1fc   :  { %7820 = vmatpush1.bf16.msk.msra.mxu0 %vm7819_vm12, %v8082_v13  ;;  %vm647_vm12 = vcmp.eq.s32.totalorder %v8230_v20, %v11363_v55  ;;  %vm7789_vm2 = vmpackc.low %vm1087_vm5, %vm1053_vm6  ;;  %vm1154_vm6 = vcmp.eq.s32.totalorder %v8428_v45, %v11186_v26 }
 0x1fd   :  { %7822 = vmatprep.subr.msk.bf16.mxu0 %vm7821_vm1, %v8082_v13  ;;  %7790 = vmatprep.subr.msk.bf16.mxu1 %vm7789_vm2, %v8082_v13  ;;  %vm7791_vm7 = vmpackc.low %vm1086_vm3, %vm1052_vm11  ;;  %vm1121_vm1 = vcmp.eq.s32.totalorder %v8425_v44, %v11170_v62  ;;  %vm680_vm11 = vcmp.eq.s32.totalorder %v8233_v21, %v11404_v56  ;;  %vm715_vm3 = vcmp.eq.s32.totalorder %v8246_v22, %v11363_v55 }
 0x1fe   :  { %vm11574_vm0 = vmpackc.low %vm612_vm8, %vm578_vm9  ;;  %vm749_vm9 = vcmp.eq.s32.totalorder %v8249_v23, %v11363_v55 }
 0x1ff   :  { %7792 = vmatpush1.bf16.msk.msra.mxu1 %vm7791_vm7, %v8082_v13  ;;  %vm11584_vm5 = vmpackc.low %vm681_vm13, %vm647_vm12  ;;  %vm1189_vm12 = vcmp.eq.s32.totalorder %v8469_v48, %v11170_v62  ;;  %vm1223_vm13 = vcmp.eq.s32.totalorder %v8472_v49, %v11170_v62  ;;  %vm1188_vm7 = vcmp.eq.s32.totalorder %v8469_v48, %v11186_v26 }
 0x200   :  { %7824 = vmatpush1.bf16.msk.msra.mxu0 %vm7823_vm15, %v8082_v13  ;;  %vm646_vm15 = vcmp.eq.s32.totalorder %v8230_v20, %v11404_v56  ;;  %vm7793_vm8 = vmpackc.low %vm1155_vm10, %vm1121_vm1  ;;  %vm1222_vm1 = vcmp.eq.s32.totalorder %v8472_v49, %v11186_v26 }
 0x201   :  { %7826 = vmatprep.subr.msk.bf16.mxu0 %vm7825_vm4, %v8082_v13  ;;  %7794 = vmatprep.subr.msk.bf16.mxu1 %vm7793_vm8, %v8082_v13  ;;  %vm7795_vm4 = vmpackc.low %vm1154_vm6, %vm1120_vm14  ;;  %vm748_vm14 = vcmp.eq.s32.totalorder %v8249_v23, %v11404_v56  ;;  %vm783_vm6 = vcmp.eq.s32.totalorder %v8258_v24, %v11363_v55 }
 0x202   :  { %v3968_v34 = vpop.f32.mrb[6].mxu0  ;;  %vm11604_vm2 = vmpackc.low %vm680_vm11, %vm646_vm15 }
 0x203   :  { %4695 = vst [vmem:[#allocation7 + $0x60] sm:$0xff] %v3968_v34  ;;  %v3970_v38 = vpop.f32.mrb[7].mxu0  ;;  %7796 = vmatpush1.bf16.msk.msra.mxu1 %vm7795_vm4, %v8082_v13  ;;  %vm11622_vm10 = vmpackc.low %vm749_vm9, %vm715_vm3  ;;  %vm1257_vm3 = vcmp.eq.s32.totalorder %v8509_v52, %v11170_v62  ;;  %vm1291_vm9 = vcmp.eq.s32.totalorder %v8516_v53, %v11170_v62  ;;  %vm1256_vm4 = vcmp.eq.s32.totalorder %v8509_v52, %v11186_v26 }
 0x204   :  { %4696 = vst [vmem:[#allocation7 + $0x68] sm:$0xff] %v3970_v38  ;;  %7828 = vmatpush1.bf16.msk.msra.mxu0 %vm11574_vm0, %v8082_v13  ;;  %vm714_vm0 = vcmp.eq.s32.totalorder %v8246_v22, %v11404_v56  ;;  %vm7797_vm15 = vmpackc.low %vm1223_vm13, %vm1189_vm12  ;;  %vm1290_vm12 = vcmp.eq.s32.totalorder %v8516_v53, %v11186_v26 }
 0x205   :  { %7830 = vmatprep.subr.msk.bf16.mxu0 %vm11584_vm5, %v8082_v13  ;;  %vm817_vm5 = vcmp.eq.s32.totalorder %v8265_v25, %v11363_v55  ;;  %7798 = vmatprep.subr.msk.bf16.mxu1 %vm7797_vm15, %v8082_v13  ;;  %vm7799_vm11 = vmpackc.low %vm1222_vm1, %vm1188_vm7  ;;  %vm816_vm7 = vcmp.eq.s32.totalorder %v8265_v25, %v11404_v56  ;;  %vm851_vm1 = vcmp.eq.s32.totalorder %v8280_v28, %v11363_v55 }
 0x206   :  { %vm11646_vm8 = vmpackc.low %vm748_vm14, %vm714_vm0  ;;  %vm885_vm0 = vcmp.eq.s32.totalorder %v8283_v29, %v11363_v55 }
 0x207   :  { %7800 = vmatpush1.bf16.msk.msra.mxu1 %vm7799_vm11, %v8082_v13  ;;  %vm7837_vm13 = vmpackc.low %vm817_vm5, %vm783_vm6  ;;  %vm241_vm6 = vcmp.eq.s32.totalorder %v8123_v1, %v11641_v27  ;;  %vm275_vm5 = vcmp.eq.s32.totalorder %v8132_v4, %v11641_v27  ;;  %vm240_vm11 = vcmp.eq.s32.totalorder %v8123_v1, %v11657_v39 }
 0x208   :  { %7832 = vmatpush1.bf16.msk.msra.mxu0 %vm11604_vm2, %v8082_v13  ;;  %vm782_vm2 = vcmp.eq.s32.totalorder %v8258_v24, %v11404_v56  ;;  %vm7803_vm14 = vmpackc.low %vm1290_vm12, %vm1256_vm4  ;;  %vm884_vm4 = vcmp.eq.s32.totalorder %v8283_v29, %v11404_v56  ;;  %vm919_vm12 = vcmp.eq.s32.totalorder %v8308_v32, %v11363_v55 }
 0x209   :  { %7834 = vmatprep.subr.msk.bf16.mxu0 %vm11622_vm10, %v8082_v13  ;;  %vm7801_vm10 = vmpackc.low %vm1291_vm9, %vm1257_vm3  ;;  %vm274_vm3 = vcmp.eq.s32.totalorder %v8132_v4, %v11657_v39 }
 0x20a   :  { %7802 = vmatprep.subr.msk.bf16.mxu1 %vm7801_vm10, %v8082_v13  ;;  %vm11684_vm15 = vmpackc.low %vm816_vm7, %vm782_vm2  ;;  %vm953_vm2 = vcmp.eq.s32.totalorder %v8311_v33, %v11363_v55 }
 0x20b   :  { %7804 = vmatpush1.bf16.msk.msra.mxu1 %vm7803_vm14, %v8082_v13  ;;  %vm11694_vm9 = vmpackc.low %vm885_vm0, %vm851_vm1  ;;  %vm309_vm1 = vcmp.eq.s32.totalorder %v8137_v6, %v11641_v27  ;;  %vm343_vm0 = vcmp.eq.s32.totalorder %v8140_v7, %v11641_v27  ;;  %vm308_vm14 = vcmp.eq.s32.totalorder %v8137_v6, %v11657_v39 }
 0x20c   :  { %7836 = vmatpush1.bf16.msk.msra.mxu0 %vm11646_vm8, %v8082_v13  ;;  %vm850_vm8 = vcmp.eq.s32.totalorder %v8280_v28, %v11404_v56  ;;  %vm7869_vm7 = vmpackc.low %vm275_vm5, %vm241_vm6  ;;  %vm342_vm6 = vcmp.eq.s32.totalorder %v8140_v7, %v11657_v39 }
 0x20d   :  { %7838 = vmatprep.subr.msk.bf16.mxu0 %vm7837_vm13, %v8082_v13  ;;  %7870 = vmatprep.subr.msk.bf16.mxu1 %vm7869_vm7, %v8082_v13  ;;  %vm7871_vm13 = vmpackc.low %vm274_vm3, %vm240_vm11  ;;  %vm952_vm11 = vcmp.eq.s32.totalorder %v8311_v33, %v11404_v56  ;;  %vm987_vm3 = vcmp.eq.s32.totalorder %v8340_v36, %v11363_v55 }
 0x20e   :  { %4464 = vmatmul.mubr.f32.vlgmr.msra.gmra.mrb[12].mxu1 %v11465_v50  ;;  %vm11715_vm10 = vmpackc.low %vm884_vm4, %vm850_vm8  ;;  %vm1021_vm8 = vcmp.eq.s32.totalorder %v8343_v37, %v11363_v55 }
 0x20f   :  { %7872 = vmatpush1.bf16.msk.msra.mxu1 %vm7871_vm13, %v8082_v13  ;;  %vm11727_vm5 = vmpackc.low %vm953_vm2, %vm919_vm12  ;;  %4605 = vmatprep.mubr.f32.mxu1 %v11023_v0  ;;  %vm377_vm12 = vcmp.eq.s32.totalorder %v8153_v11, %v11641_v27  ;;  %vm411_vm2 = vcmp.eq.s32.totalorder %v8156_v12, %v11641_v27  ;;  %vm376_vm13 = vcmp.eq.s32.totalorder %v8153_v11, %v11657_v39 }
 0x210   :  { %7840 = vmatpush1.bf16.msk.msra.mxu0 %vm11684_vm15, %v8082_v13  ;;  %vm918_vm15 = vcmp.eq.s32.totalorder %v8308_v32, %v11404_v56  ;;  %vm7873_vm4 = vmpackc.low %vm343_vm0, %vm309_vm1  ;;  %vm410_vm1 = vcmp.eq.s32.totalorder %v8156_v12, %v11657_v39 }
 0x211   :  { %7842 = vmatprep.subr.msk.bf16.mxu0 %vm11694_vm9, %v8082_v13  ;;  %7874 = vmatprep.subr.msk.bf16.mxu1 %vm7873_vm4, %v8082_v13  ;;  %vm7875_vm9 = vmpackc.low %vm342_vm6, %vm308_vm14  ;;  %vm986_vm14 = vcmp.eq.s32.totalorder %v8340_v36, %v11404_v56  ;;  %vm1055_vm6 = vcmp.eq.s32.totalorder %v8381_v40, %v11363_v55 }
 0x212   :  { %vm7847_vm7 = vmpackc.low %vm952_vm11, %vm918_vm15  ;;  %vm1089_vm15 = vcmp.eq.s32.totalorder %v8384_v41, %v11363_v55 }
 0x213   :  { %7876 = vmatpush1.bf16.msk.msra.mxu1 %vm7875_vm9, %v8082_v13  ;;  %vm7849_vm0 = vmpackc.low %vm1021_vm8, %vm987_vm3  ;;  %vm479_vm3 = vcmp.eq.s32.totalorder %v8185_v15, %v11641_v27  ;;  %vm444_vm9 = vcmp.eq.s32.totalorder %v8182_v14, %v11657_v39 }
 0x214   :  { %7844 = vmatpush1.bf16.msk.msra.mxu0 %vm11715_vm10, %v8082_v13  ;;  %vm1020_vm10 = vcmp.eq.s32.totalorder %v8343_v37, %v11404_v56  ;;  %vm7877_vm11 = vmpackc.low %vm411_vm2, %vm377_vm12  ;;  %vm478_vm12 = vcmp.eq.s32.totalorder %v8185_v15, %v11657_v39 }
 0x215   :  { %7846 = vmatprep.subr.msk.bf16.mxu0 %vm11727_vm5, %v8082_v13  ;;  %7878 = vmatprep.subr.msk.bf16.mxu1 %vm7877_vm11, %v8082_v13  ;;  %vm7879_vm4 = vmpackc.low %vm410_vm1, %vm376_vm13  ;;  %vm445_vm5 = vcmp.eq.s32.totalorder %v8182_v14, %v11641_v27  ;;  %vm1054_vm13 = vcmp.eq.s32.totalorder %v8381_v40, %v11404_v56  ;;  %vm1088_vm1 = vcmp.eq.s32.totalorder %v8384_v41, %v11404_v56 }
 0x216   :  { %vm7851_vm8 = vmpackc.low %vm1020_vm10, %vm986_vm14  ;;  %vm1157_vm14 = vcmp.eq.s32.totalorder %v8428_v45, %v11363_v55 }
 0x217   :  { %7880 = vmatpush1.bf16.msk.msra.mxu1 %vm7879_vm4, %v8082_v13  ;;  %vm7853_vm2 = vmpackc.low %vm1089_vm15, %vm1055_vm6  ;;  %vm547_vm6 = vcmp.eq.s32.totalorder %v8201_v17, %v11641_v27  ;;  %vm512_vm4 = vcmp.eq.s32.totalorder %v8198_v16, %v11657_v39 }
 0x218   :  { %7848 = vmatpush1.bf16.msk.msra.mxu0 %vm7847_vm7, %v8082_v13  ;;  %vm1123_vm7 = vcmp.eq.s32.totalorder %v8425_v44, %v11363_v55  ;;  %vm7881_vm10 = vmpackc.low %vm479_vm3, %vm445_vm5  ;;  %vm546_vm5 = vcmp.eq.s32.totalorder %v8201_v17, %v11657_v39 }
 0x219   :  { %7850 = vmatprep.subr.msk.bf16.mxu0 %vm7849_vm0, %v8082_v13  ;;  %7882 = vmatprep.subr.msk.bf16.mxu1 %vm7881_vm10, %v8082_v13  ;;  %vm7883_vm11 = vmpackc.low %vm478_vm12, %vm444_vm9  ;;  %vm513_vm0 = vcmp.eq.s32.totalorder %v8198_v16, %v11641_v27  ;;  %vm1156_vm9 = vcmp.eq.s32.totalorder %v8428_v45, %v11404_v56  ;;  %vm1191_vm12 = vcmp.eq.s32.totalorder %v8469_v48, %v11363_v55 }
 0x21a   :  { %vm11790_vm15 = vmpackc.low %vm1088_vm1, %vm1054_vm13  ;;  %vm1225_vm13 = vcmp.eq.s32.totalorder %v8472_v49, %v11363_v55 }
 0x21b   :  { %7884 = vmatpush1.bf16.msk.msra.mxu1 %vm7883_vm11, %v8082_v13  ;;  %vm11800_vm3 = vmpackc.low %vm1157_vm14, %vm1123_vm7  ;;  %vm581_vm7 = vcmp.eq.s32.totalorder %v8214_v18, %v11641_v27  ;;  %vm615_vm14 = vcmp.eq.s32.totalorder %v8217_v19, %v11641_v27  ;;  %vm580_vm11 = vcmp.eq.s32.totalorder %v8214_v18, %v11657_v39 }
 0x21c   :  { %7852 = vmatpush1.bf16.msk.msra.mxu0 %vm7851_vm8, %v8082_v13  ;;  %vm1122_vm8 = vcmp.eq.s32.totalorder %v8425_v44, %v11404_v56  ;;  %vm7885_vm1 = vmpackc.low %vm547_vm6, %vm513_vm0  ;;  %vm614_vm0 = vcmp.eq.s32.totalorder %v8217_v19, %v11657_v39 }
 0x21d   :  { %7854 = vmatprep.subr.msk.bf16.mxu0 %vm7853_vm2, %v8082_v13  ;;  %7886 = vmatprep.subr.msk.bf16.mxu1 %vm7885_vm1, %v8082_v13  ;;  %vm7887_vm2 = vmpackc.low %vm546_vm5, %vm512_vm4  ;;  %vm1224_vm4 = vcmp.eq.s32.totalorder %v8472_v49, %v11404_v56  ;;  %vm1259_vm5 = vcmp.eq.s32.totalorder %v8509_v52, %v11363_v55 }
 0x21e   :  { %vm11820_vm10 = vmpackc.low %vm1156_vm9, %vm1122_vm8  ;;  %vm1293_vm8 = vcmp.eq.s32.totalorder %v8516_v53, %v11363_v55 }
 0x21f   :  { %7888 = vmatpush1.bf16.msk.msra.mxu1 %vm7887_vm2, %v8082_v13  ;;  %vm11832_vm6 = vmpackc.low %vm1225_vm13, %vm1191_vm12  ;;  %vm649_vm12 = vcmp.eq.s32.totalorder %v8230_v20, %v11641_v27  ;;  %vm683_vm13 = vcmp.eq.s32.totalorder %v8233_v21, %v11641_v27  ;;  %vm648_vm2 = vcmp.eq.s32.totalorder %v8230_v20, %v11657_v39 }
 0x220   :  { %7856 = vmatpush1.bf16.msk.msra.mxu0 %vm11790_vm15, %v8082_v13  ;;  %vm1190_vm15 = vcmp.eq.s32.totalorder %v8469_v48, %v11404_v56  ;;  %vm7891_vm9 = vmpackc.low %vm614_vm0, %vm580_vm11  ;;  %vm1292_vm11 = vcmp.eq.s32.totalorder %v8516_v53, %v11404_v56  ;;  %vm243_vm0 = vcmp.eq.s32.totalorder %v8123_v1, %v11845_v51 }
 0x221   :  { %7858 = vmatprep.subr.msk.bf16.mxu0 %vm11800_vm3, %v8082_v13  ;;  %v4039_v58 = vpop.f32.mrb[6].mxu1  ;;  %vm7889_vm3 = vmpackc.low %vm615_vm14, %vm581_vm7  ;;  %vm682_vm7 = vcmp.eq.s32.totalorder %v8233_v21, %v11657_v39 }
 0x222   :  { %4697 = vst [vmem:[#allocation7 + $0x70] sm:$0xff] %v4039_v58  ;;  %7890 = vmatprep.subr.msk.bf16.mxu1 %vm7889_vm3, %v8082_v13  ;;  %v4041_v54 = vpop.f32.mrb[7].mxu1  ;;  %vm11858_vm1 = vmpackc.low %vm1224_vm4, %vm1190_vm15 }
 0x223   :  { %4698 = vst [vmem:[#allocation7 + $0x78] sm:$0xff] %v4041_v54  ;;  %7892 = vmatpush1.bf16.msk.msra.mxu1 %vm7891_vm9, %v8082_v13  ;;  %vm11876_vm14 = vmpackc.low %vm1293_vm8, %vm1259_vm5  ;;  %vm717_vm5 = vcmp.eq.s32.totalorder %v8246_v22, %v11641_v27  ;;  %vm751_vm8 = vcmp.eq.s32.totalorder %v8249_v23, %v11641_v27  ;;  %vm716_vm9 = vcmp.eq.s32.totalorder %v8246_v22, %v11657_v39 }
 0x224   :  { %7860 = vmatpush1.bf16.msk.msra.mxu0 %vm11820_vm10, %v8082_v13  ;;  %vm1258_vm10 = vcmp.eq.s32.totalorder %v8509_v52, %v11404_v56  ;;  %vm7893_vm15 = vmpackc.low %vm683_vm13, %vm649_vm12  ;;  %vm750_vm12 = vcmp.eq.s32.totalorder %v8249_v23, %v11657_v39 }
 0x225   :  { %7862 = vmatprep.subr.msk.bf16.mxu0 %vm11832_vm6, %v8082_v13  ;;  %vm277_vm6 = vcmp.eq.s32.totalorder %v8132_v4, %v11845_v51  ;;  %7894 = vmatprep.subr.msk.bf16.mxu1 %vm7893_vm15, %v8082_v13  ;;  %vm7895_vm4 = vmpackc.low %vm682_vm7, %vm648_vm2  ;;  %vm242_vm2 = vcmp.eq.s32.totalorder %v8123_v1, %v11885_v57  ;;  %vm311_vm7 = vcmp.eq.s32.totalorder %v8137_v6, %v11845_v51 }
 0x226   :  { %vm7867_vm3 = vmpackc.low %vm1292_vm11, %vm1258_vm10  ;;  %vm345_vm10 = vcmp.eq.s32.totalorder %v8140_v7, %v11845_v51 }
 0x227   :  { %7896 = vmatpush1.bf16.msk.msra.mxu1 %vm7895_vm4, %v8082_v13  ;;  %vm7933_vm13 = vmpackc.low %vm277_vm6, %vm243_vm0  ;;  %vm819_vm0 = vcmp.eq.s32.totalorder %v8265_v25, %v11641_v27  ;;  %vm784_vm4 = vcmp.eq.s32.totalorder %v8258_v24, %v11657_v39 }
 0x228   :  { %7864 = vmatpush1.bf16.msk.msra.mxu0 %vm11858_vm1, %v8082_v13  ;;  %vm276_vm1 = vcmp.eq.s32.totalorder %v8132_v4, %v11885_v57  ;;  %vm7897_vm11 = vmpackc.low %vm751_vm8, %vm717_vm5  ;;  %vm818_vm5 = vcmp.eq.s32.totalorder %v8265_v25, %v11657_v39 }
 0x229   :  { %7866 = vmatprep.subr.msk.bf16.mxu0 %vm11876_vm14, %v8082_v13  ;;  %7898 = vmatprep.subr.msk.bf16.mxu1 %vm7897_vm11, %v8082_v13  ;;  %vm7899_vm15 = vmpackc.low %vm750_vm12, %vm716_vm9  ;;  %vm785_vm14 = vcmp.eq.s32.totalorder %v8258_v24, %v11641_v27  ;;  %vm344_vm9 = vcmp.eq.s32.totalorder %v8140_v7, %v11885_v57  ;;  %vm379_vm12 = vcmp.eq.s32.totalorder %v8153_v11, %v11845_v51  ;;  %v8007_v7 = vld [vmem:[#allocation5 + $0x8] sm:$0xff] }
 0x22a   :  { %vm11924_vm6 = vmpackc.low %vm276_vm1, %vm242_vm2  ;;  %vm413_vm2 = vcmp.eq.s32.totalorder %v8156_v12, %v11845_v51 }
 0x22b   :  { %7900 = vmatpush1.bf16.msk.msra.mxu1 %vm7899_vm15, %v8082_v13  ;;  %vm11934_vm8 = vmpackc.low %vm345_vm10, %vm311_vm7  ;;  %vm853_vm7 = vcmp.eq.s32.totalorder %v8280_v28, %v11641_v27  ;;  %vm887_vm10 = vcmp.eq.s32.totalorder %v8283_v29, %v11641_v27  ;;  %vm852_vm15 = vcmp.eq.s32.totalorder %v8280_v28, %v11657_v39 }
 0x22c   :  { %7868 = vmatpush1.bf16.msk.msra.mxu0 %vm7867_vm3, %v8082_v13  ;;  %vm310_vm3 = vcmp.eq.s32.totalorder %v8137_v6, %v11885_v57  ;;  %vm7901_vm1 = vmpackc.low %vm819_vm0, %vm785_vm14  ;;  %vm886_vm14 = vcmp.eq.s32.totalorder %v8283_v29, %v11657_v39 }
 0x22d   :  { %7934 = vmatprep.subr.msk.bf16.mxu0 %vm7933_vm13, %v8082_v13  ;;  %7902 = vmatprep.subr.msk.bf16.mxu1 %vm7901_vm1, %v8082_v13  ;;  %vm7903_vm13 = vmpackc.low %vm818_vm5, %vm784_vm4  ;;  %vm412_vm4 = vcmp.eq.s32.totalorder %v8156_v12, %v11885_v57  ;;  %vm447_vm5 = vcmp.eq.s32.totalorder %v8182_v14, %v11845_v51 }
 0x22e   :  { %vm11955_vm11 = vmpackc.low %vm344_vm9, %vm310_vm3  ;;  %vm481_vm3 = vcmp.eq.s32.totalorder %v8185_v15, %v11845_v51 }
 0x22f   :  { %4535 = vmatmul.mubr.f32.vlgmr.msra.gmra.mrb[14].mxu0 %v11465_v50  ;;  %7904 = vmatpush1.bf16.msk.msra.mxu1 %vm7903_vm13, %v8082_v13  ;;  %vm11967_vm0 = vmpackc.low %vm413_vm2, %vm379_vm12  ;;  %vm921_vm12 = vcmp.eq.s32.totalorder %v8308_v32, %v11641_v27  ;;  %vm955_vm2 = vcmp.eq.s32.totalorder %v8311_v33, %v11641_v27  ;;  %vm920_vm13 = vcmp.eq.s32.totalorder %v8308_v32, %v11657_v39 }
 0x230   :  { %7936 = vmatpush1.bf16.msk.msra.mxu0 %vm11924_vm6, %v8082_v13  ;;  %vm378_vm6 = vcmp.eq.s32.totalorder %v8153_v11, %v11885_v57  ;;  %4676 = vmatprep.mubr.f32.mxu0 %v8007_v7  ;;  %vm7907_vm9 = vmpackc.low %vm886_vm14, %vm852_vm15  ;;  %vm446_vm15 = vcmp.eq.s32.totalorder %v8182_v14, %v11885_v57  ;;  %vm515_vm14 = vcmp.eq.s32.totalorder %v8198_v16, %v11845_v51 }
 0x231   :  { %7938 = vmatprep.subr.msk.bf16.mxu0 %vm11934_vm8, %v8082_v13  ;;  %vm7905_vm8 = vmpackc.low %vm887_vm10, %vm853_vm7  ;;  %vm954_vm7 = vcmp.eq.s32.totalorder %v8311_v33, %v11657_v39 }
 0x232   :  { %7906 = vmatprep.subr.msk.bf16.mxu1 %vm7905_vm8, %v8082_v13  ;;  %vm7943_vm1 = vmpackc.low %vm412_vm4, %vm378_vm6  ;;  %vm549_vm6 = vcmp.eq.s32.totalorder %v8201_v17, %v11845_v51 }
 0x233   :  { %7908 = vmatpush1.bf16.msk.msra.mxu1 %vm7907_vm9, %v8082_v13  ;;  %vm7945_vm10 = vmpackc.low %vm481_vm3, %vm447_vm5  ;;  %vm1023_vm5 = vcmp.eq.s32.totalorder %v8343_v37, %v11641_v27  ;;  %vm988_vm9 = vcmp.eq.s32.totalorder %v8340_v36, %v11657_v39 }
 0x234   :  { %7940 = vmatpush1.bf16.msk.msra.mxu0 %vm11955_vm11, %v8082_v13  ;;  %vm480_vm11 = vcmp.eq.s32.totalorder %v8185_v15, %v11885_v57  ;;  %vm7909_vm4 = vmpackc.low %vm955_vm2, %vm921_vm12  ;;  %vm1022_vm12 = vcmp.eq.s32.totalorder %v8343_v37, %v11657_v39 }
 0x235   :  { %7942 = vmatprep.subr.msk.bf16.mxu0 %vm11967_vm0, %v8082_v13  ;;  %7910 = vmatprep.subr.msk.bf16.mxu1 %vm7909_vm4, %v8082_v13  ;;  %vm7911_vm8 = vmpackc.low %vm954_vm7, %vm920_vm13  ;;  %vm989_vm0 = vcmp.eq.s32.totalorder %v8340_v36, %v11641_v27  ;;  %vm514_vm13 = vcmp.eq.s32.totalorder %v8198_v16, %v11885_v57  ;;  %vm548_vm7 = vcmp.eq.s32.totalorder %v8201_v17, %v11885_v57 }
 0x236   :  { %vm7947_vm3 = vmpackc.low %vm480_vm11, %vm446_vm15  ;;  %vm617_vm15 = vcmp.eq.s32.totalorder %v8217_v19, %v11845_v51 }
 0x237   :  { %7912 = vmatpush1.bf16.msk.msra.mxu1 %vm7911_vm8, %v8082_v13  ;;  %vm7949_vm2 = vmpackc.low %vm549_vm6, %vm515_vm14  ;;  %vm1091_vm14 = vcmp.eq.s32.totalorder %v8384_v41, %v11641_v27  ;;  %vm1056_vm8 = vcmp.eq.s32.totalorder %v8381_v40, %v11657_v39 }
 0x238   :  { %7944 = vmatpush1.bf16.msk.msra.mxu0 %vm7943_vm1, %v8082_v13  ;;  %vm583_vm1 = vcmp.eq.s32.totalorder %v8214_v18, %v11845_v51  ;;  %vm7913_vm11 = vmpackc.low %vm1023_vm5, %vm989_vm0  ;;  %vm1090_vm0 = vcmp.eq.s32.totalorder %v8384_v41, %v11657_v39 }
 0x239   :  { %7946 = vmatprep.subr.msk.bf16.mxu0 %vm7945_vm10, %v8082_v13  ;;  %7914 = vmatprep.subr.msk.bf16.mxu1 %vm7913_vm11, %v8082_v13  ;;  %vm7915_vm4 = vmpackc.low %vm1022_vm12, %vm988_vm9  ;;  %vm1057_vm10 = vcmp.eq.s32.totalorder %v8381_v40, %v11641_v27  ;;  %vm582_vm9 = vcmp.eq.s32.totalorder %v8214_v18, %v11885_v57  ;;  %vm616_vm12 = vcmp.eq.s32.totalorder %v8217_v19, %v11885_v57 }
 0x23a   :  { %vm7951_vm6 = vmpackc.low %vm548_vm7, %vm514_vm13  ;;  %vm685_vm13 = vcmp.eq.s32.totalorder %v8233_v21, %v11845_v51 }
 0x23b   :  { %7916 = vmatpush1.bf16.msk.msra.mxu1 %vm7915_vm4, %v8082_v13  ;;  %vm7953_vm5 = vmpackc.low %vm617_vm15, %vm583_vm1  ;;  %vm1159_vm1 = vcmp.eq.s32.totalorder %v8428_v45, %v11641_v27  ;;  %vm1124_vm4 = vcmp.eq.s32.totalorder %v8425_v44, %v11657_v39 }
 0x23c   :  { %7948 = vmatpush1.bf16.msk.msra.mxu0 %vm7947_vm3, %v8082_v13  ;;  %vm651_vm3 = vcmp.eq.s32.totalorder %v8230_v20, %v11845_v51  ;;  %vm7917_vm7 = vmpackc.low %vm1091_vm14, %vm1057_vm10  ;;  %vm1158_vm10 = vcmp.eq.s32.totalorder %v8428_v45, %v11657_v39 }
 0x23d   :  { %7950 = vmatprep.subr.msk.bf16.mxu0 %vm7949_vm2, %v8082_v13  ;;  %7918 = vmatprep.subr.msk.bf16.mxu1 %vm7917_vm7, %v8082_v13  ;;  %vm7919_vm11 = vmpackc.low %vm1090_vm0, %vm1056_vm8  ;;  %vm1125_vm2 = vcmp.eq.s32.totalorder %v8425_v44, %v11641_v27  ;;  %vm684_vm8 = vcmp.eq.s32.totalorder %v8233_v21, %v11885_v57  ;;  %vm719_vm0 = vcmp.eq.s32.totalorder %v8246_v22, %v11845_v51 }
 0x23e   :  { %vm12052_vm15 = vmpackc.low %vm616_vm12, %vm582_vm9  ;;  %vm753_vm9 = vcmp.eq.s32.totalorder %v8249_v23, %v11845_v51 }
 0x23f   :  { %7920 = vmatpush1.bf16.msk.msra.mxu1 %vm7919_vm11, %v8082_v13  ;;  %vm12062_vm14 = vmpackc.low %vm685_vm13, %vm651_vm3  ;;  %vm1193_vm3 = vcmp.eq.s32.totalorder %v8469_v48, %v11641_v27  ;;  %vm1227_vm13 = vcmp.eq.s32.totalorder %v8472_v49, %v11641_v27  ;;  %vm1192_vm11 = vcmp.eq.s32.totalorder %v8469_v48, %v11657_v39 }
 0x240   :  { %7952 = vmatpush1.bf16.msk.msra.mxu0 %vm7951_vm6, %v8082_v13  ;;  %vm650_vm6 = vcmp.eq.s32.totalorder %v8230_v20, %v11885_v57  ;;  %vm7921_vm12 = vmpackc.low %vm1159_vm1, %vm1125_vm2  ;;  %vm1226_vm2 = vcmp.eq.s32.totalorder %v8472_v49, %v11657_v39 }
 0x241   :  { %7954 = vmatprep.subr.msk.bf16.mxu0 %vm7953_vm5, %v8082_v13  ;;  %7922 = vmatprep.subr.msk.bf16.mxu1 %vm7921_vm12, %v8082_v13  ;;  %vm7923_vm5 = vmpackc.low %vm1158_vm10, %vm1124_vm4  ;;  %vm752_vm4 = vcmp.eq.s32.totalorder %v8249_v23, %v11885_v57  ;;  %vm787_vm10 = vcmp.eq.s32.totalorder %v8258_v24, %v11845_v51  ;;  %vm1261_vm12 = vcmp.eq.s32.totalorder %v8509_v52, %v11641_v27 }
 0x242   :  { %v4110_v14 = vpop.f32.mrb[8].mxu0  ;;  %vm7959_vm7 = vmpackc.low %vm684_vm8, %vm650_vm6  ;;  %vm821_vm6 = vcmp.eq.s32.totalorder %v8265_v25, %v11845_v51 }
 0x243   :  { %4699 = vst [vmem:[#allocation7 + $0x80] sm:$0xff] %v4110_v14  ;;  %v4112_v15 = vpop.f32.mrb[9].mxu0  ;;  %7924 = vmatpush1.bf16.msk.msra.mxu1 %vm7923_vm5, %v8082_v13  ;;  %vm7961_vm1 = vmpackc.low %vm753_vm9, %vm719_vm0  ;;  %vm1295_vm0 = vcmp.eq.s32.totalorder %v8516_v53, %v11641_v27  ;;  %vm1260_vm5 = vcmp.eq.s32.totalorder %v8509_v52, %v11657_v39 }
 0x244   :  { %4700 = vst [vmem:[#allocation7 + $0x88] sm:$0xff] %v4112_v15  ;;  %7956 = vmatpush1.bf16.msk.msra.mxu0 %vm12052_vm15, %v8082_v13  ;;  %vm718_vm15 = vcmp.eq.s32.totalorder %v8246_v22, %v11885_v57  ;;  %vm7927_vm8 = vmpackc.low %vm1226_vm2, %vm1192_vm11  ;;  %vm786_vm11 = vcmp.eq.s32.totalorder %v8258_v24, %v11885_v57  ;;  %vm820_vm2 = vcmp.eq.s32.totalorder %v8265_v25, %v11885_v57 }
 0x245   :  { %7958 = vmatprep.subr.msk.bf16.mxu0 %vm12062_vm14, %v8082_v13  ;;  %vm7925_vm14 = vmpackc.low %vm1227_vm13, %vm1193_vm3  ;;  %vm1294_vm3 = vcmp.eq.s32.totalorder %v8516_v53, %v11657_v39 }
 0x246   :  { %7926 = vmatprep.subr.msk.bf16.mxu1 %vm7925_vm14, %v8082_v13  ;;  %vm7963_vm9 = vmpackc.low %vm752_vm4, %vm718_vm15  ;;  %vm889_vm15 = vcmp.eq.s32.totalorder %v8283_v29, %v11845_v51 }
 0x247   :  { %7928 = vmatpush1.bf16.msk.msra.mxu1 %vm7927_vm8, %v8082_v13  ;;  %vm7965_vm13 = vmpackc.low %vm821_vm6, %vm787_vm10  ;;  %vm854_vm6 = vcmp.eq.s32.totalorder %v8280_v28, %v11885_v57  ;;  %vm888_vm8 = vcmp.eq.s32.totalorder %v8283_v29, %v11885_v57 }
 0x248   :  { %7960 = vmatpush1.bf16.msk.msra.mxu0 %vm7959_vm7, %v8082_v13  ;;  %vm7929_vm14 = vmpackc.low %vm1295_vm0, %vm1261_vm12  ;;  %vm855_vm7 = vcmp.eq.s32.totalorder %v8280_v28, %v11845_v51  ;;  %vm923_vm12 = vcmp.eq.s32.totalorder %v8308_v32, %v11845_v51  ;;  %vm957_vm0 = vcmp.eq.s32.totalorder %v8311_v33, %v11845_v51 }
 0x249   :  { %7962 = vmatprep.subr.msk.bf16.mxu0 %vm7961_vm1, %v8082_v13  ;;  %7930 = vmatprep.subr.msk.bf16.mxu1 %vm7929_vm14, %v8082_v13  ;;  %vm7931_vm4 = vmpackc.low %vm1294_vm3, %vm1260_vm5  ;;  %vm922_vm3 = vcmp.eq.s32.totalorder %v8308_v32, %v11885_v57 }
 0x24a   :  { %vm7967_vm1 = vmpackc.low %vm820_vm2, %vm786_vm11  ;;  %vm991_vm11 = vcmp.eq.s32.totalorder %v8340_v36, %v11845_v51  ;;  %vm1025_vm2 = vcmp.eq.s32.totalorder %v8343_v37, %v11845_v51 }
 0x24b   :  { %7932 = vmatpush1.bf16.msk.msra.mxu1 %vm7931_vm4, %v8082_v13  ;;  %vm7969_vm10 = vmpackc.low %vm889_vm15, %vm855_vm7  ;;  %vm990_vm15 = vcmp.eq.s32.totalorder %v8340_v36, %v11885_v57  ;;  %vm1024_vm4 = vcmp.eq.s32.totalorder %v8343_v37, %v11885_v57 }
 0x24c   :  { %7964 = vmatpush1.bf16.msk.msra.mxu0 %vm7963_vm9, %v8082_v13  ;;  %vm7971_vm9 = vmpackc.low %vm888_vm8, %vm854_vm6 }
 0x24d   :  { %7966 = vmatprep.subr.msk.bf16.mxu0 %vm7965_vm13, %v8082_v13  ;;  %vm7973_vm5 = vmpackc.low %vm957_vm0, %vm923_vm12  ;;  %vm956_vm13 = vcmp.eq.s32.totalorder %v8311_v33, %v11885_v57  ;;  %vm1058_vm12 = vcmp.eq.s32.totalorder %v8381_v40, %v11885_v57  ;;  %vm1092_vm0 = vcmp.eq.s32.totalorder %v8384_v41, %v11885_v57 }
 0x24e   :  { %4606 = vmatmul.mubr.f32.vlgmr.msra.gmra.mrb[14].mxu1 %v11465_v50  ;;  %vm7975_vm14 = vmpackc.low %vm956_vm13, %vm922_vm3 }
 0x24f   :  { %vm7977_vm7 = vmpackc.low %vm1025_vm2, %vm991_vm11  ;;  %vm1126_vm11 = vcmp.eq.s32.totalorder %v8425_v44, %v11885_v57  ;;  %vm1160_vm2 = vcmp.eq.s32.totalorder %v8428_v45, %v11885_v57 }
 0x250   :  { %7968 = vmatpush1.bf16.msk.msra.mxu0 %vm7967_vm1, %v8082_v13  ;;  %vm1059_vm1 = vcmp.eq.s32.totalorder %v8381_v40, %v11845_v51  ;;  %vm7979_vm6 = vmpackc.low %vm1024_vm4, %vm990_vm15 }
 0x251   :  { %7970 = vmatprep.subr.msk.bf16.mxu0 %vm7969_vm10, %v8082_v13  ;;  %vm1093_vm10 = vcmp.eq.s32.totalorder %v8384_v41, %v11845_v51  ;;  %vm7983_vm3 = vmpackc.low %vm1092_vm0, %vm1058_vm12 }
 0x252   :  { %vm7981_vm8 = vmpackc.low %vm1093_vm10, %vm1059_vm1  ;;  %vm1194_vm1 = vcmp.eq.s32.totalorder %v8469_v48, %v11885_v57  ;;  %vm1228_vm10 = vcmp.eq.s32.totalorder %v8472_v49, %v11885_v57 }
 0x253   :  { %vm7987_vm15 = vmpackc.low %vm1160_vm2, %vm1126_vm11 }
 0x254   :  { %7972 = vmatpush1.bf16.msk.msra.mxu0 %vm7971_vm9, %v8082_v13  ;;  %vm1127_vm9 = vcmp.eq.s32.totalorder %v8425_v44, %v11845_v51  ;;  %vm7991_vm12 = vmpackc.low %vm1228_vm10, %vm1194_vm1 }
 0x255   :  { %7974 = vmatprep.subr.msk.bf16.mxu0 %vm7973_vm5, %v8082_v13  ;;  %vm1161_vm5 = vcmp.eq.s32.totalorder %v8428_v45, %v11845_v51 }
 0x256   :  { %vm7985_vm13 = vmpackc.low %vm1161_vm5, %vm1127_vm9  ;;  %vm1262_vm9 = vcmp.eq.s32.totalorder %v8509_v52, %v11885_v57  ;;  %vm1296_vm5 = vcmp.eq.s32.totalorder %v8516_v53, %v11885_v57 }
 0x258   :  { %7976 = vmatpush1.bf16.msk.msra.mxu0 %vm7975_vm14, %v8082_v13  ;;  %vm1195_vm14 = vcmp.eq.s32.totalorder %v8469_v48, %v11845_v51 }
 0x259   :  { %7978 = vmatprep.subr.msk.bf16.mxu0 %vm7977_vm7, %v8082_v13  ;;  %vm1229_vm7 = vcmp.eq.s32.totalorder %v8472_v49, %v11845_v51 }
 0x25a   :  { %vm7989_vm4 = vmpackc.low %vm1229_vm7, %vm1195_vm14 }
 0x25c   :  { %7980 = vmatpush1.bf16.msk.msra.mxu0 %vm7979_vm6, %v8082_v13  ;;  %vm1263_vm6 = vcmp.eq.s32.totalorder %v8509_v52, %v11845_v51 }
 0x25d   :  { %7982 = vmatprep.subr.msk.bf16.mxu0 %vm7981_vm8, %v8082_v13  ;;  %vm1297_vm8 = vcmp.eq.s32.totalorder %v8516_v53, %v11845_v51 }
 0x25e   :  { %vm7993_vm0 = vmpackc.low %vm1297_vm8, %vm1263_vm6 }
 0x260   :  { %7984 = vmatpush1.bf16.msk.msra.mxu0 %vm7983_vm3, %v8082_v13  ;;  %vm7995_vm3 = vmpackc.low %vm1296_vm5, %vm1262_vm9 }
 0x261   :  { %7986 = vmatprep.subr.msk.bf16.mxu0 %vm7985_vm13, %v8082_v13  ;;  %v4181_v16 = vpop.f32.mrb[8].mxu1 }
 0x262   :  { %4701 = vst [vmem:[#allocation7 + $0x90] sm:$0xff] %v4181_v16  ;;  %v4183_v17 = vpop.f32.mrb[9].mxu1 }
 0x263   :  { %4702 = vst [vmem:[#allocation7 + $0x98] sm:$0xff] %v4183_v17 }
 0x264   :  { %7988 = vmatpush1.bf16.msk.msra.mxu0 %vm7987_vm15, %v8082_v13 }
 0x265   :  { %7990 = vmatprep.subr.msk.bf16.mxu0 %vm7989_vm4, %v8082_v13 }
 0x268   :  { %7992 = vmatpush1.bf16.msk.msra.mxu0 %vm7991_vm12, %v8082_v13 }
 0x269   :  { %7994 = vmatprep.subr.msk.bf16.mxu0 %vm7993_vm0, %v8082_v13 }
 0x26c   :  { %7996 = vmatpush1.bf16.msk.msra.mxu0 %vm7995_vm3, %v8082_v13 }
 0x26f   :  { %4677 = vmatmul.mubr.f32.vlgmr.msra.gmra.mrb[16].mxu0 %v11465_v50 }
 0x282   :  { %v4252_v18 = vpop.f32.mrb[10].mxu0 }
 0x283   :  { %4703 = vst [vmem:[#allocation7 + $0xa0] sm:$0xff] %v4252_v18  ;;  %v4254_v19 = vpop.f32.mrb[11].mxu0 }
 0x284   :  { %4704 = vst [vmem:[#allocation7 + $0xa8] sm:$0xff] %v4254_v19 }
 0x2a1   :  { %v4323_v20 = vpop.f32.mrb[10].mxu1 }
 0x2a2   :  { %4705 = vst [vmem:[#allocation7 + $0xb0] sm:$0xff] %v4323_v20  ;;  %v4325_v21 = vpop.f32.mrb[11].mxu1 }
 0x2a3   :  { %4706 = vst [vmem:[#allocation7 + $0xb8] sm:$0xff] %v4325_v21 }
 0x2c2   :  { %v4394_v22 = vpop.f32.mrb[12].mxu0 }
 0x2c3   :  { %4707 = vst [vmem:[#allocation7 + $0xc0] sm:$0xff] %v4394_v22  ;;  %v4396_v23 = vpop.f32.mrb[13].mxu0 }
 0x2c4   :  { %4708 = vst [vmem:[#allocation7 + $0xc8] sm:$0xff] %v4396_v23 }
 0x2e1   :  { %v4465_v24 = vpop.f32.mrb[12].mxu1 }
 0x2e2   :  { %4709 = vst [vmem:[#allocation7 + $0xd0] sm:$0xff] %v4465_v24  ;;  %v4467_v25 = vpop.f32.mrb[13].mxu1 }
 0x2e3   :  { %4710 = vst [vmem:[#allocation7 + $0xd8] sm:$0xff] %v4467_v25 }
 0x302   :  { %v4536_v28 = vpop.f32.mrb[14].mxu0 }
 0x303   :  { %4711 = vst [vmem:[#allocation7 + $0xe0] sm:$0xff] %v4536_v28  ;;  %v4538_v13 = vpop.f32.mrb[15].mxu0 }
 0x304   :  { %4712 = vst [vmem:[#allocation7 + $0xe8] sm:$0xff] %v4538_v13 }
 0x321   :  { %v4607_v29 = vpop.f32.mrb[14].mxu1 }
 0x322   :  { %4713 = vst [vmem:[#allocation7 + $0xf0] sm:$0xff] %v4607_v29  ;;  %v4609_v32 = vpop.f32.mrb[15].mxu1 }
 0x323   :  { %4714 = vst [vmem:[#allocation7 + $0xf8] sm:$0xff] %v4609_v32 }
 0x342   :  { %v4678_v33 = vpop.f32.mrb[16].mxu0 }
 0x343   :  { %4715 = vst [vmem:[#allocation7 + $0x100] sm:$0xff] %v4678_v33  ;;  %v4680_v36 = vpop.f32.mrb[17].mxu0 }
 0x344   :  { %4716 = vst [vmem:[#allocation7 + $0x108] sm:$0xff] %v4680_v36 }
 0x345   :  { %8063 = shalt.err (!%p8060_p6)
}
 0x346   :  { %s8064_s8 = scalar_lea.hbm %s12211_s2, 4352 }
 0x347   :  { %p8065_p7 = scmp.ne.s32.totalorder %s12211_s2, %s8064_s8  ;;  %p8068_p8 = scmp.lt.u32.totalorder %s8064_s8, %s12211_s2 }
 0x349   :  { %p8070_p9 = pnand %p8068_p8, %p8065_p7 }
 0x34b   :  { %8073 = shalt.err (!%p8070_p9)
}
 0x34c   :  { %4726 = dma.vmem_to_hbm [thread:$0]  %s4724_s4, 4352, %s12211_s2, [#allocation4]  }
 0x34d   :  { %8078 = dma.done.wait [#allocation4], 4352  }
 0x34e   :  { %8079 = vsyncadd [#allocation4], 4294962944 }
 0x34f   :  { %4730 = vsyncpa [#allocation3], 1 }
 0x350   :  { %4731 = vsyncpa [#allocation6], 1 }
 0x351   :  { %4732 = vsyncpa [#allocation4], 1 }

</bundles_post_ra>
